<compile_context>
chip_gen: v5e
topology: v5e:2x2
jax: 0.10.0
libtpu: 0.0.40
codegen_flags: <defaults>
</compile_context>

<pallas_src>
import functools
import math

import jax
import jax.numpy as jnp
from jax.experimental import pallas as pl
from jax.experimental.pallas import tpu as pltpu

_NEG_INF = -1e30
_MB = 1024 * 1024


# ----------------------------------------------------------------------------
# Small helpers
# ----------------------------------------------------------------------------

def _pick_tile(n, target, quantum):
    """Largest divisor of n that is <= target and a multiple of quantum.

    Falls back to n itself (a full-extent block is always layout-legal)."""
    if n <= target:
        return n
    t = (target // quantum) * quantum
    while t >= quantum:
        if n % t == 0:
            return t
        t -= quantum
    return n


def _bcast(shape):
    """Grid-invariant (weight / bias) block: full array, constant block index.

    # TODO(synk): on v7x add pipeline_mode=pl.Buffered(1) here so invariant
    #             weights are single-buffered (halves weight VMEM)."""
    return pl.BlockSpec(shape, lambda *_: (0,) * len(shape))


def _compiler_params(semantics, working_bytes):
    # Scoped-VMEM request derived from the tile working set, clamped so it is
    # valid on every chip (v7x physical VMEM is 64 MiB; v5e default scoped
    # limit is only 16 MiB, so the 32 MiB floor already helps there).
    limit = int(min(60 * _MB, max(32 * _MB, 3 * working_bytes)))
    return pltpu.CompilerParams(dimension_semantics=semantics,
                                vmem_limit_bytes=limit)


# ----------------------------------------------------------------------------
# In-kernel math (operates on VMEM-resident values)
# ----------------------------------------------------------------------------

def _layer_norm_val(z, g, b, eps):
    # z: (N, D) f32; g/b: (1, D) f32 — statistics in f32.
    mu = jnp.mean(z, axis=-1, keepdims=True)
    var = jnp.mean((z - mu) ** 2, axis=-1, keepdims=True)
    return (z - mu) * jax.lax.rsqrt(var + eps) * g + b


def _causal_neg_mask(tq, skv, q_start):
    rows = q_start + jax.lax.broadcasted_iota(jnp.int32, (tq, skv), 0)
    cols = jax.lax.broadcasted_iota(jnp.int32, (tq, skv), 1)
    return jnp.where(cols > rows, _NEG_INF, 0.0).astype(jnp.float32)


def _mha_accumulate(q_b16, kv_b16, wo_b16, bo_f32, *, num_heads, neg_mask):
    """Multi-head attention with per-head output-projection accumulation.

    q_b16:  (Sq, D)  bf16, already scaled by 1/sqrt(dh) (folded into W_q)
    kv_b16: (Sk, 2D) bf16, [K | V] fused
    wo_b16: (D, D)   bf16, rows h*dh:(h+1)*dh are head h's projection
    bo_f32: (1, D)   f32
    Returns (Sq, D) f32 — lane-dense; no per-head concat.
    """
    _, D = q_b16.shape
    dh = D // num_heads
    acc = None
    for h in range(num_heads):                      # static unrolled loop
        lo = h * dh
        q_h = q_b16[:, lo:lo + dh]
        k_h = kv_b16[:, lo:lo + dh]
        v_h = kv_b16[:, D + lo:D + lo + dh]
        s = jax.lax.dot_general(q_h, k_h, (((1,), (1,)), ((), ())),
                                preferred_element_type=jnp.float32)  # (Sq,Sk)
        if neg_mask is not None:
            s = s + neg_mask
        m = jnp.max(s, axis=-1, keepdims=True)
        p = jnp.exp(s - m)
        l = jnp.sum(p, axis=-1, keepdims=True)
        o_h = jnp.dot(p.astype(jnp.bfloat16), v_h,
                      preferred_element_type=jnp.float32)            # (Sq,dh)
        # deferred softmax normalization: Sq*dh multiplies, reciprocal on EUP
        o_h = o_h * pl.reciprocal(l, approx=True)
        part = jnp.dot(o_h.astype(jnp.bfloat16), wo_b16[lo:lo + dh, :],
                       preferred_element_type=jnp.float32)           # (Sq, D)
        acc = part if acc is None else acc + part
    return acc + bo_f32


# ----------------------------------------------------------------------------
# Fused block kernels
# ----------------------------------------------------------------------------

def _self_attn_block_kernel(*refs, num_heads, causal, eps, tq, seq):
    if tq == seq:          # single query tile: one fused (D,3D) QKV matmul
        (x_ref, spk_ref, wqkv_ref, bqkv_ref,
         wo_ref, bo_ref, g_ref, b_ref, o_ref) = refs
        xkv_ref = None
    else:                  # query tiled: Q from tile, K/V from full sequence
        (x_ref, xkv_ref, spk_ref, wqkv_ref, bqkv_ref,
         wo_ref, bo_ref, g_ref, b_ref, o_ref) = refs

    D = x_ref.shape[-1]
    spk = spk_ref[...].astype(jnp.float32)                 # (1, D)
    xq32 = x_ref[...].astype(jnp.float32) + spk            # residual base

    if xkv_ref is None:
        qkv = (jnp.dot(xq32.astype(jnp.bfloat16), wqkv_ref[...],
                       preferred_element_type=jnp.float32)
               + bqkv_ref[...]).astype(jnp.bfloat16)       # (S, 3D), cast once
        q_b16 = qkv[:, :D]
        kv_b16 = qkv[:, D:]
    else:
        xkv32 = xkv_ref[...].astype(jnp.float32) + spk     # (S, D)
        q_b16 = (jnp.dot(xq32.astype(jnp.bfloat16), wqkv_ref[:, :D],
                         preferred_element_type=jnp.float32)
                 + bqkv_ref[:, :D]).astype(jnp.bfloat16)
        kv_b16 = (jnp.dot(xkv32.astype(jnp.bfloat16), wqkv_ref[:, D:],
                          preferred_element_type=jnp.float32)
                  + bqkv_ref[:, D:]).astype(jnp.bfloat16)

    neg = None
    if causal:
        neg = _causal_neg_mask(tq, seq, pl.program_id(1) * tq)

    attn = _mha_accumulate(q_b16, kv_b16, wo_ref[...], bo_ref[...],
                           num_heads=num_heads, neg_mask=neg)
    z = _layer_norm_val(xq32 + attn, g_ref[...], b_ref[...], eps)
    o_ref[...] = z.astype(o_ref.dtype)


def _cross_attn_block_kernel(x_ref, mem_ref, wq_ref, bq_ref, wkv_ref, bkv_ref,
                             wo_ref, bo_ref, g_ref, b_ref, o_ref, *,
                             num_heads, eps):
    x_in = x_ref[...]
    xq32 = x_in.astype(jnp.float32)
    q_b16 = (jnp.dot(x_in.astype(jnp.bfloat16), wq_ref[...],
                     preferred_element_type=jnp.float32)
             + bq_ref[...]).astype(jnp.bfloat16)
    kv_b16 = (jnp.dot(mem_ref[...].astype(jnp.bfloat16), wkv_ref[...],
                      preferred_element_type=jnp.float32)
              + bkv_ref[...]).astype(jnp.bfloat16)
    attn = _mha_accumulate(q_b16, kv_b16, wo_ref[...], bo_ref[...],
                           num_heads=num_heads, neg_mask=None)
    z = _layer_norm_val(xq32 + attn, g_ref[...], b_ref[...], eps)
    o_ref[...] = z.astype(o_ref.dtype)


def _ffn_block_kernel(x_ref, w1_ref, b1_ref, w2_ref, b2_ref, g_ref, b_ref,
                      *rest, eps, nk, final_ln):
    # FF dimension is streamed along grid axis 1 (k) with an f32 accumulator.
    if final_ln:
        gf_ref, bf_ref, o_ref, acc_ref = rest
    else:
        o_ref, acc_ref = rest
    k = pl.program_id(1)

    x_in = x_ref[...]                                               # (t, D)
    h = jnp.dot(x_in.astype(jnp.bfloat16), w1_ref[...],
                preferred_element_type=jnp.float32) + b1_ref[...]   # (t, fk)
    h = jnp.maximum(h, 0.0).astype(jnp.bfloat16)                    # ReLU
    y = jnp.dot(h, w2_ref[...], preferred_element_type=jnp.float32)  # (t, D)

    @pl.when(k == 0)
    def _():
        acc_ref[...] = y

    @pl.when(k > 0)
    def _():
        acc_ref[...] += y

    @pl.when(k == nk - 1)
    def _():
        z = x_in.astype(jnp.float32) + acc_ref[...] + b2_ref[...]
        z = _layer_norm_val(z, g_ref[...], b_ref[...], eps)
        if final_ln:                              # fused decoder-final LN
            z = _layer_norm_val(z, gf_ref[...], bf_ref[...], eps)
        o_ref[...] = z.astype(o_ref.dtype)


# ----------------------------------------------------------------------------
# pallas_call wrappers
# ----------------------------------------------------------------------------

def self_attn_block(x, spk, p, *, num_heads, causal, eps=1e-5,
                    q_tile=256, out_dtype=jnp.bfloat16):
    B, S, D = x.shape
    tq = _pick_tile(S, q_tile, 8)
    nq = S // tq
    spk3 = spk.reshape(B, 1, D).astype(jnp.float32)

    kernel = functools.partial(_self_attn_block_kernel, num_heads=num_heads,
                               causal=causal, eps=eps, tq=tq, seq=S)

    in_specs = [pl.BlockSpec((None, tq, D), lambda b, q: (b, q, 0))]
    args = [x]
    if nq > 1:
        # full-sequence K/V source; block index constant over q => DMA reused
        in_specs.append(pl.BlockSpec((None, S, D), lambda b, q: (b, 0, 0)))
        args.append(x)
    in_specs += [
        pl.BlockSpec((None, 1, D), lambda b, q: (b, 0, 0)),
        _bcast((D, 3 * D)), _bcast((1, 3 * D)),
        _bcast((D, D)), _bcast((1, D)),
        _bcast((1, D)), _bcast((1, D)),
    ]
    args += [spk3, p["wqkv"], p["bqkv"], p["wo"], p["bo"],
             p["ln_g"], p["ln_b"]]

    working = (2 * (tq + S) * D * 2            # double-buffered bf16 activations
               + 2 * 4 * D * D * 2             # double-buffered bf16 weights
               + (tq * S + (tq + 3 * S) * D) * 4)  # scores + f32 temporaries
    return pl.pallas_call(
        kernel,
        out_shape=jax.ShapeDtypeStruct((B, S, D), out_dtype),
        grid=(B, nq),
        in_specs=in_specs,
        out_specs=pl.BlockSpec((None, tq, D), lambda b, q: (b, q, 0)),
        compiler_params=_compiler_params(("parallel", "parallel"), working),
    )(*args)


def cross_attn_block(x, memory, p, *, num_heads, eps=1e-5,
                     q_tile=256, out_dtype=jnp.bfloat16):
    B, S, D = x.shape
    Sm = memory.shape[1]
    tq = _pick_tile(S, q_tile, 8)
    nq = S // tq
    kernel = functools.partial(_cross_attn_block_kernel,
                               num_heads=num_heads, eps=eps)
    working = (2 * (tq + Sm) * D * 2 + 2 * 4 * D * D * 2
               + (tq * Sm + (tq + 3 * Sm) * D) * 4)
    return pl.pallas_call(
        kernel,
        out_shape=jax.ShapeDtypeStruct((B, S, D), out_dtype),
        grid=(B, nq),
        in_specs=[
            pl.BlockSpec((None, tq, D), lambda b, q: (b, q, 0)),
            pl.BlockSpec((None, Sm, D), lambda b, q: (b, 0, 0)),
            _bcast((D, D)), _bcast((1, D)),
            _bcast((D, 2 * D)), _bcast((1, 2 * D)),
            _bcast((D, D)), _bcast((1, D)),
            _bcast((1, D)), _bcast((1, D)),
        ],
        out_specs=pl.BlockSpec((None, tq, D), lambda b, q: (b, q, 0)),
        compiler_params=_compiler_params(("parallel", "parallel"), working),
    )(x, memory, p["wq"], p["bq"], p["wkv"], p["bkv"], p["wo"], p["bo"],
      p["ln_g"], p["ln_b"])


def ffn_block(x, p, *, eps=1e-5, row_tile=512, ff_tile=2048,
              final_norm=None, out_dtype=jnp.bfloat16):
    B, S, D = x.shape
    N = B * S
    F = p["w1"].shape[1]
    x2 = x.reshape(N, D)
    t = _pick_tile(N, row_tile, 8)        # row tile (v5e likes it large)
    fk = _pick_tile(F, ff_tile, 128)      # FF stream tile (caps VMEM on v7x)
    nk = F // fk
    final_ln = final_norm is not None

    kernel = functools.partial(_ffn_block_kernel, eps=eps, nk=nk,
                               final_ln=final_ln)
    in_specs = [
        pl.BlockSpec((t, D), lambda i, k: (i, 0)),
        pl.BlockSpec((D, fk), lambda i, k: (0, k)),
        pl.BlockSpec((1, fk), lambda i, k: (0, k)),
        pl.BlockSpec((fk, D), lambda i, k: (k, 0)),
        _bcast((1, D)), _bcast((1, D)), _bcast((1, D)),
    ]
    args = [x2, p["w1"], p["b1"], p["w2"], p["b2"], p["ln_g"], p["ln_b"]]
    if final_ln:
        gf, bf = final_norm
        in_specs += [_bcast((1, D)), _bcast((1, D))]
        args += [gf, bf]

    working = (2 * t * D * 2 + 2 * 2 * D * fk * 2
               + (t * fk + 2 * t * D) * 4)
    out = pl.pallas_call(
        kernel,
        out_shape=jax.ShapeDtypeStruct((N, D), out_dtype),
        grid=(N // t, nk),
        in_specs=in_specs,
        out_specs=pl.BlockSpec((t, D), lambda i, k: (i, 0)),
        scratch_shapes=[pltpu.VMEM((t, D), jnp.float32)],
        compiler_params=_compiler_params(("parallel", "arbitrary"), working),
    )(*args)
    return out.reshape(B, S, D)


# ----------------------------------------------------------------------------
# Decoder glue
# ----------------------------------------------------------------------------

def decoder_layer(x, memory, spk, p, *, num_heads, tgt_is_causal,
                  final_norm=None, out_dtype=jnp.bfloat16):
    x = self_attn_block(x, spk, p["self_attn"], num_heads=num_heads,
                        causal=tgt_is_causal)
    x = cross_attn_block(x, memory, p["cross_attn"], num_heads=num_heads)
    x = ffn_block(x, p["ffn"], final_norm=final_norm, out_dtype=out_dtype)
    return x


def custom_transformer_decoder(tgt, memory, spk, params, *, num_heads,
                               tgt_is_causal=True):
    """tgt: (St, B, D), memory: (Sm, B, D), spk: (B, D) -> (St, B, D) f32."""
    # TODO(synk): arbitrary additive tgt/memory masks and key-padding masks
    #             are not supported (causal / none only).
    # Entry transposes run in bf16 (half the HBM traffic); inter-block
    # activations stay bf16, the last kernel emits f32.
    x = jnp.transpose(tgt.astype(jnp.bfloat16), (1, 0, 2))       # (B, St, D)
    mem = jnp.transpose(memory.astype(jnp.bfloat16), (1, 0, 2))  # (B, Sm, D)
    spk = spk.astype(jnp.float32)

    layers = params["layers"]
    final_norm = params.get("final_norm")
    n = len(layers)
    for li, layer_p in enumerate(layers):
        last = li == n - 1
        x = decoder_layer(
            x, mem, spk, layer_p, num_heads=num_heads,
            tgt_is_causal=tgt_is_causal,
            final_norm=final_norm if last else None,     # fused into last FFN
            out_dtype=jnp.float32 if last else jnp.bfloat16)
    return jnp.transpose(x, (1, 0, 2))                   # (St, B, D)


# ----------------------------------------------------------------------------
# Deterministic parameter construction
# (weights bf16, biases / LN params f32; 1/sqrt(dh) folded into Q weights)
# ----------------------------------------------------------------------------

def _rand(key, shape, scale=0.05):
    return scale * jax.random.normal(key, shape, jnp.float32)


def make_params(key, num_layers, d_model, num_heads, dim_ff):
    dh = d_model // num_heads
    qscale = 1.0 / math.sqrt(dh)
    layers = []
    for _ in range(num_layers):
        keys = jax.random.split(key, 21)
        key = keys[0]
        k = keys[1:]

        # self-attention: fused (D, 3D) QKV with 1/sqrt(dh) folded into Q
        wq = _rand(k[0], (d_model, d_model)) * qscale
        bq = _rand(k[1], (1, d_model)) * qscale
        wk = _rand(k[2], (d_model, d_model)); bk = _rand(k[3], (1, d_model))
        wv = _rand(k[4], (d_model, d_model)); bv = _rand(k[5], (1, d_model))
        self_attn = dict(
            wqkv=jnp.concatenate([wq, wk, wv], axis=1).astype(jnp.bfloat16),
            bqkv=jnp.concatenate([bq, bk, bv], axis=1),
            wo=_rand(k[6], (d_model, d_model)).astype(jnp.bfloat16),
            bo=_rand(k[7], (1, d_model)),
            ln_g=jnp.ones((1, d_model), jnp.float32),
            ln_b=jnp.zeros((1, d_model), jnp.float32))

        # cross-attention: Q separate (scale folded), fused (D, 2D) KV
        cwq = _rand(k[8], (d_model, d_model)) * qscale
        cbq = _rand(k[9], (1, d_model)) * qscale
        cwk = _rand(k[10], (d_model, d_model)); cbk = _rand(k[11], (1, d_model))
        cwv = _rand(k[12], (d_model, d_model)); cbv = _rand(k[13], (1, d_model))
        cross_attn = dict(
            wq=cwq.astype(jnp.bfloat16), bq=cbq,
            wkv=jnp.concatenate([cwk, cwv], axis=1).astype(jnp.bfloat16),
            bkv=jnp.concatenate([cbk, cbv], axis=1),
            wo=_rand(k[14], (d_model, d_model)).astype(jnp.bfloat16),
            bo=_rand(k[15], (1, d_model)),
            ln_g=jnp.ones((1, d_model), jnp.float32),
            ln_b=jnp.zeros((1, d_model), jnp.float32))

        ffn = dict(
            w1=_rand(k[16], (d_model, dim_ff)).astype(jnp.bfloat16),
            b1=_rand(k[17], (1, dim_ff)),
            w2=_rand(k[18], (dim_ff, d_model)).astype(jnp.bfloat16),
            b2=_rand(k[19], (1, d_model)),
            ln_g=jnp.ones((1, d_model), jnp.float32),
            ln_b=jnp.zeros((1, d_model), jnp.float32))

        layers.append(dict(self_attn=self_attn, cross_attn=cross_attn,
                           ffn=ffn))

    final_norm = (jnp.ones((1, d_model), jnp.float32),
                  jnp.zeros((1, d_model), jnp.float32))
    return dict(layers=layers, final_norm=final_norm)


# ----------------------------------------------------------------------------
# Example run
# ----------------------------------------------------------------------------

if __name__ == "__main__":
    B, S_TGT, S_MEM, D, H, FF, NUM_LAYERS = 2, 8, 16, 32, 4, 64, 2

    key = jax.random.PRNGKey(0)
    k_tgt, k_mem, k_spk, k_par = jax.random.split(key, 4)

    tgt = jax.random.normal(k_tgt, (S_TGT, B, D), jnp.float32)
    memory = jax.random.normal(k_mem, (S_MEM, B, D), jnp.float32)
    spk = jax.random.normal(k_spk, (B, D), jnp.float32)

    params = make_params(k_par, NUM_LAYERS, D, H, FF)

    fwd = jax.jit(functools.partial(custom_transformer_decoder,
                                    num_heads=H, tgt_is_causal=True))
    out = jax.block_until_ready(fwd(tgt, memory, spk, params))

    assert out.shape == (S_TGT, B, D)
    assert out.dtype == jnp.float32
    assert bool(jnp.all(jnp.isfinite(out)))
    print("KERNEL_OK")
</pallas_src>

<mosaic_0001>
module attributes {stable_mosaic.version = 11 : i64} {
  func.func @_self_attn_block_kernel(%arg0: i32, %arg1: i32, %arg2: memref<1x8x32xbf16, #tpu.memory_space<vmem>>, %arg3: memref<1x1x32xf32, #tpu.memory_space<vmem>>, %arg4: memref<32x96xbf16, #tpu.memory_space<vmem>>, %arg5: memref<1x96xf32, #tpu.memory_space<vmem>>, %arg6: memref<32x32xbf16, #tpu.memory_space<vmem>>, %arg7: memref<1x32xf32, #tpu.memory_space<vmem>>, %arg8: memref<1x32xf32, #tpu.memory_space<vmem>>, %arg9: memref<1x32xf32, #tpu.memory_space<vmem>>, %arg10: memref<1x8x32xbf16, #tpu.memory_space<vmem>>) attributes {dimension_semantics = [#tpu.dimension_semantics<parallel>, #tpu.dimension_semantics<parallel>], iteration_bounds = array<i64: 2, 1>, scalar_prefetch = 0 : i64, scratch_operands = 0 : i64, tpu.core_type = #tpu.core_type<tc>, window_params = [{transform_indices = @transform_0, window_bounds = array<i64: 1, 8, 32>}, {transform_indices = @transform_1, window_bounds = array<i64: 1, 1, 32>}, {pipeline_mode = #tpu.pipeline_mode<synchronous>, transform_indices = @transform_2, window_bounds = array<i64: 32, 96>}, {pipeline_mode = #tpu.pipeline_mode<synchronous>, transform_indices = @transform_3, window_bounds = array<i64: 1, 96>}, {pipeline_mode = #tpu.pipeline_mode<synchronous>, transform_indices = @transform_4, window_bounds = array<i64: 32, 32>}, {pipeline_mode = #tpu.pipeline_mode<synchronous>, transform_indices = @transform_5, window_bounds = array<i64: 1, 32>}, {pipeline_mode = #tpu.pipeline_mode<synchronous>, transform_indices = @transform_6, window_bounds = array<i64: 1, 32>}, {pipeline_mode = #tpu.pipeline_mode<synchronous>, transform_indices = @transform_7, window_bounds = array<i64: 1, 32>}, {transform_indices = @transform_8, window_bounds = array<i64: 1, 8, 32>}]} {
    %c0 = arith.constant 0 : index
    %c0_0 = arith.constant 0 : index
    %c0_1 = arith.constant 0 : index
    %0 = vector.load %arg3[%c0, %c0_0, %c0_1] : memref<1x1x32xf32, #tpu.memory_space<vmem>>, vector<1x1x32xf32>
    %1 = vector.shape_cast %0 : vector<1x1x32xf32> to vector<1x32xf32>
    %c0_2 = arith.constant 0 : index
    %c0_3 = arith.constant 0 : index
    %c0_4 = arith.constant 0 : index
    %2 = vector.load %arg2[%c0_2, %c0_3, %c0_4] : memref<1x8x32xbf16, #tpu.memory_space<vmem>>, vector<1x8x32xbf16>
    %3 = vector.shape_cast %2 : vector<1x8x32xbf16> to vector<8x32xbf16>
    %4 = arith.extf %3 : vector<8x32xbf16> to vector<8x32xf32>
    %5 = vector.broadcast %1 : vector<1x32xf32> to vector<8x32xf32>
    %6 = arith.addf %4, %5 : vector<8x32xf32>
    %7 = arith.truncf %6 : vector<8x32xf32> to vector<8x32xbf16>
    %c0_5 = arith.constant 0 : index
    %c0_6 = arith.constant 0 : index
    %8 = vector.load %arg4[%c0_5, %c0_6] : memref<32x96xbf16, #tpu.memory_space<vmem>>, vector<32x96xbf16>
    %cst = arith.constant dense<0.000000e+00> : vector<8x96xf32>
    %9 = tpu.matmul %7, %8, %cst {dimension_numbers = #tpu.dot_dimension_numbers<[1], [0], [0], [1], [0, 0, 1, 1], [], []>} : vector<8x32xbf16>, vector<32x96xbf16>, vector<8x96xf32> -> vector<8x96xf32>
    %c0_7 = arith.constant 0 : index
    %c0_8 = arith.constant 0 : index
    %10 = vector.load %arg5[%c0_7, %c0_8] : memref<1x96xf32, #tpu.memory_space<vmem>>, vector<1x96xf32>
    %11 = vector.broadcast %10 : vector<1x96xf32> to vector<8x96xf32>
    %12 = arith.addf %9, %11 : vector<8x96xf32>
    %13 = arith.truncf %12 : vector<8x96xf32> to vector<8x96xbf16>
    %14 = vector.extract_strided_slice %13 {offsets = [0, 0], sizes = [8, 32], strides = [1, 1]} : vector<8x96xbf16> to vector<8x32xbf16>
    %15 = vector.extract_strided_slice %13 {offsets = [0, 32], sizes = [8, 64], strides = [1, 1]} : vector<8x96xbf16> to vector<8x64xbf16>
    %c8_i32 = arith.constant 8 : i32
    %16 = arith.muli %arg1, %c8_i32 : i32
    %17 = tpu.iota {dimensions = array<i32: 0>} : vector<8x8xi32>
    %18 = vector.broadcast %16 : i32 to vector<8x8xi32>
    %19 = arith.addi %18, %17 : vector<8x8xi32>
    %20 = tpu.iota {dimensions = array<i32: 1>} : vector<8x8xi32>
    %21 = arith.cmpi sgt, %20, %19 : vector<8x8xi32>
    %cst_9 = arith.constant -1.000000e+30 : f32
    %cst_10 = arith.constant 0.000000e+00 : f32
    %22 = vector.broadcast %cst_9 : f32 to vector<8x8xf32>
    %23 = vector.broadcast %cst_10 : f32 to vector<8x8xf32>
    %24 = arith.select %21, %22, %23 : vector<8x8xi1>, vector<8x8xf32>
    %c0_11 = arith.constant 0 : index
    %c0_12 = arith.constant 0 : index
    %25 = vector.load %arg6[%c0_11, %c0_12] : memref<32x32xbf16, #tpu.memory_space<vmem>>, vector<32x32xbf16>
    %c0_13 = arith.constant 0 : index
    %c0_14 = arith.constant 0 : index
    %26 = vector.load %arg7[%c0_13, %c0_14] : memref<1x32xf32, #tpu.memory_space<vmem>>, vector<1x32xf32>
    %27 = vector.extract_strided_slice %14 {offsets = [0, 0], sizes = [8, 8], strides = [1, 1]} : vector<8x32xbf16> to vector<8x8xbf16>
    %28 = vector.extract_strided_slice %15 {offsets = [0, 0], sizes = [8, 8], strides = [1, 1]} : vector<8x64xbf16> to vector<8x8xbf16>
    %29 = vector.extract_strided_slice %15 {offsets = [0, 32], sizes = [8, 8], strides = [1, 1]} : vector<8x64xbf16> to vector<8x8xbf16>
    %cst_15 = arith.constant dense<0.000000e+00> : vector<8x8xf32>
    %30 = tpu.matmul %27, %28, %cst_15 {dimension_numbers = #tpu.dot_dimension_numbers<[1], [1], [0], [0], [0, 0, 1, 0], [], []>} : vector<8x8xbf16>, vector<8x8xbf16>, vector<8x8xf32> -> vector<8x8xf32>
    %31 = arith.addf %30, %24 : vector<8x8xf32>
    %cst_16 = arith.constant dense<0xFF800000> : vector<8xf32>
    %32 = vector.multi_reduction <maximumf>, %31, %cst_16 [1] : vector<8x8xf32> to vector<8xf32>
    %33 = vector.shape_cast %32 : vector<8xf32> to vector<8x1xf32>
    %34 = vector.broadcast %33 : vector<8x1xf32> to vector<8x8xf32>
    %35 = arith.subf %31, %34 : vector<8x8xf32>
    %36 = math.exp %35 : vector<8x8xf32>
    %cst_17 = arith.constant dense<0.000000e+00> : vector<8xf32>
    %37 = vector.multi_reduction <add>, %36, %cst_17 [1] : vector<8x8xf32> to vector<8xf32>
    %38 = vector.shape_cast %37 : vector<8xf32> to vector<8x1xf32>
    %39 = arith.truncf %36 : vector<8x8xf32> to vector<8x8xbf16>
    %cst_18 = arith.constant dense<0.000000e+00> : vector<8x8xf32>
    %40 = tpu.matmul %39, %29, %cst_18 {dimension_numbers = #tpu.dot_dimension_numbers<[1], [0], [0], [1], [0, 0, 1, 1], [], []>} : vector<8x8xbf16>, vector<8x8xbf16>, vector<8x8xf32> -> vector<8x8xf32>
    %41 = tpu.reciprocal %38 {approx = true} : vector<8x1xf32> -> vector<8x1xf32>
    %42 = vector.broadcast %41 : vector<8x1xf32> to vector<8x8xf32>
    %43 = arith.mulf %40, %42 : vector<8x8xf32>
    %44 = arith.truncf %43 : vector<8x8xf32> to vector<8x8xbf16>
    %45 = vector.extract_strided_slice %25 {offsets = [0, 0], sizes = [8, 32], strides = [1, 1]} : vector<32x32xbf16> to vector<8x32xbf16>
    %cst_19 = arith.constant dense<0.000000e+00> : vector<8x32xf32>
    %46 = tpu.matmul %44, %45, %cst_19 {dimension_numbers = #tpu.dot_dimension_numbers<[1], [0], [0], [1], [0, 0, 1, 1], [], []>} : vector<8x8xbf16>, vector<8x32xbf16>, vector<8x32xf32> -> vector<8x32xf32>
    %47 = vector.extract_strided_slice %14 {offsets = [0, 8], sizes = [8, 8], strides = [1, 1]} : vector<8x32xbf16> to vector<8x8xbf16>
    %48 = vector.extract_strided_slice %15 {offsets = [0, 8], sizes = [8, 8], strides = [1, 1]} : vector<8x64xbf16> to vector<8x8xbf16>
    %49 = vector.extract_strided_slice %15 {offsets = [0, 40], sizes = [8, 8], strides = [1, 1]} : vector<8x64xbf16> to vector<8x8xbf16>
    %cst_20 = arith.constant dense<0.000000e+00> : vector<8x8xf32>
    %50 = tpu.matmul %47, %48, %cst_20 {dimension_numbers = #tpu.dot_dimension_numbers<[1], [1], [0], [0], [0, 0, 1, 0], [], []>} : vector<8x8xbf16>, vector<8x8xbf16>, vector<8x8xf32> -> vector<8x8xf32>
    %51 = arith.addf %50, %24 : vector<8x8xf32>
    %cst_21 = arith.constant dense<0xFF800000> : vector<8xf32>
    %52 = vector.multi_reduction <maximumf>, %51, %cst_21 [1] : vector<8x8xf32> to vector<8xf32>
    %53 = vector.shape_cast %52 : vector<8xf32> to vector<8x1xf32>
    %54 = vector.broadcast %53 : vector<8x1xf32> to vector<8x8xf32>
    %55 = arith.subf %51, %54 : vector<8x8xf32>
    %56 = math.exp %55 : vector<8x8xf32>
    %cst_22 = arith.constant dense<0.000000e+00> : vector<8xf32>
    %57 = vector.multi_reduction <add>, %56, %cst_22 [1] : vector<8x8xf32> to vector<8xf32>
    %58 = vector.shape_cast %57 : vector<8xf32> to vector<8x1xf32>
    %59 = arith.truncf %56 : vector<8x8xf32> to vector<8x8xbf16>
    %cst_23 = arith.constant dense<0.000000e+00> : vector<8x8xf32>
    %60 = tpu.matmul %59, %49, %cst_23 {dimension_numbers = #tpu.dot_dimension_numbers<[1], [0], [0], [1], [0, 0, 1, 1], [], []>} : vector<8x8xbf16>, vector<8x8xbf16>, vector<8x8xf32> -> vector<8x8xf32>
    %61 = tpu.reciprocal %58 {approx = true} : vector<8x1xf32> -> vector<8x1xf32>
    %62 = vector.broadcast %61 : vector<8x1xf32> to vector<8x8xf32>
    %63 = arith.mulf %60, %62 : vector<8x8xf32>
    %64 = arith.truncf %63 : vector<8x8xf32> to vector<8x8xbf16>
    %65 = vector.extract_strided_slice %25 {offsets = [8, 0], sizes = [8, 32], strides = [1, 1]} : vector<32x32xbf16> to vector<8x32xbf16>
    %cst_24 = arith.constant dense<0.000000e+00> : vector<8x32xf32>
    %66 = tpu.matmul %64, %65, %cst_24 {dimension_numbers = #tpu.dot_dimension_numbers<[1], [0], [0], [1], [0, 0, 1, 1], [], []>} : vector<8x8xbf16>, vector<8x32xbf16>, vector<8x32xf32> -> vector<8x32xf32>
    %67 = arith.addf %46, %66 : vector<8x32xf32>
    %68 = vector.extract_strided_slice %14 {offsets = [0, 16], sizes = [8, 8], strides = [1, 1]} : vector<8x32xbf16> to vector<8x8xbf16>
    %69 = vector.extract_strided_slice %15 {offsets = [0, 16], sizes = [8, 8], strides = [1, 1]} : vector<8x64xbf16> to vector<8x8xbf16>
    %70 = vector.extract_strided_slice %15 {offsets = [0, 48], sizes = [8, 8], strides = [1, 1]} : vector<8x64xbf16> to vector<8x8xbf16>
    %cst_25 = arith.constant dense<0.000000e+00> : vector<8x8xf32>
    %71 = tpu.matmul %68, %69, %cst_25 {dimension_numbers = #tpu.dot_dimension_numbers<[1], [1], [0], [0], [0, 0, 1, 0], [], []>} : vector<8x8xbf16>, vector<8x8xbf16>, vector<8x8xf32> -> vector<8x8xf32>
    %72 = arith.addf %71, %24 : vector<8x8xf32>
    %cst_26 = arith.constant dense<0xFF800000> : vector<8xf32>
    %73 = vector.multi_reduction <maximumf>, %72, %cst_26 [1] : vector<8x8xf32> to vector<8xf32>
    %74 = vector.shape_cast %73 : vector<8xf32> to vector<8x1xf32>
    %75 = vector.broadcast %74 : vector<8x1xf32> to vector<8x8xf32>
    %76 = arith.subf %72, %75 : vector<8x8xf32>
    %77 = math.exp %76 : vector<8x8xf32>
    %cst_27 = arith.constant dense<0.000000e+00> : vector<8xf32>
    %78 = vector.multi_reduction <add>, %77, %cst_27 [1] : vector<8x8xf32> to vector<8xf32>
    %79 = vector.shape_cast %78 : vector<8xf32> to vector<8x1xf32>
    %80 = arith.truncf %77 : vector<8x8xf32> to vector<8x8xbf16>
    %cst_28 = arith.constant dense<0.000000e+00> : vector<8x8xf32>
    %81 = tpu.matmul %80, %70, %cst_28 {dimension_numbers = #tpu.dot_dimension_numbers<[1], [0], [0], [1], [0, 0, 1, 1], [], []>} : vector<8x8xbf16>, vector<8x8xbf16>, vector<8x8xf32> -> vector<8x8xf32>
    %82 = tpu.reciprocal %79 {approx = true} : vector<8x1xf32> -> vector<8x1xf32>
    %83 = vector.broadcast %82 : vector<8x1xf32> to vector<8x8xf32>
    %84 = arith.mulf %81, %83 : vector<8x8xf32>
    %85 = arith.truncf %84 : vector<8x8xf32> to vector<8x8xbf16>
    %86 = vector.extract_strided_slice %25 {offsets = [16, 0], sizes = [8, 32], strides = [1, 1]} : vector<32x32xbf16> to vector<8x32xbf16>
    %cst_29 = arith.constant dense<0.000000e+00> : vector<8x32xf32>
    %87 = tpu.matmul %85, %86, %cst_29 {dimension_numbers = #tpu.dot_dimension_numbers<[1], [0], [0], [1], [0, 0, 1, 1], [], []>} : vector<8x8xbf16>, vector<8x32xbf16>, vector<8x32xf32> -> vector<8x32xf32>
    %88 = arith.addf %67, %87 : vector<8x32xf32>
    %89 = vector.extract_strided_slice %14 {offsets = [0, 24], sizes = [8, 8], strides = [1, 1]} : vector<8x32xbf16> to vector<8x8xbf16>
    %90 = vector.extract_strided_slice %15 {offsets = [0, 24], sizes = [8, 8], strides = [1, 1]} : vector<8x64xbf16> to vector<8x8xbf16>
    %91 = vector.extract_strided_slice %15 {offsets = [0, 56], sizes = [8, 8], strides = [1, 1]} : vector<8x64xbf16> to vector<8x8xbf16>
    %cst_30 = arith.constant dense<0.000000e+00> : vector<8x8xf32>
    %92 = tpu.matmul %89, %90, %cst_30 {dimension_numbers = #tpu.dot_dimension_numbers<[1], [1], [0], [0], [0, 0, 1, 0], [], []>} : vector<8x8xbf16>, vector<8x8xbf16>, vector<8x8xf32> -> vector<8x8xf32>
    %93 = arith.addf %92, %24 : vector<8x8xf32>
    %cst_31 = arith.constant dense<0xFF800000> : vector<8xf32>
    %94 = vector.multi_reduction <maximumf>, %93, %cst_31 [1] : vector<8x8xf32> to vector<8xf32>
    %95 = vector.shape_cast %94 : vector<8xf32> to vector<8x1xf32>
    %96 = vector.broadcast %95 : vector<8x1xf32> to vector<8x8xf32>
    %97 = arith.subf %93, %96 : vector<8x8xf32>
    %98 = math.exp %97 : vector<8x8xf32>
    %cst_32 = arith.constant dense<0.000000e+00> : vector<8xf32>
    %99 = vector.multi_reduction <add>, %98, %cst_32 [1] : vector<8x8xf32> to vector<8xf32>
    %100 = vector.shape_cast %99 : vector<8xf32> to vector<8x1xf32>
    %101 = arith.truncf %98 : vector<8x8xf32> to vector<8x8xbf16>
    %cst_33 = arith.constant dense<0.000000e+00> : vector<8x8xf32>
    %102 = tpu.matmul %101, %91, %cst_33 {dimension_numbers = #tpu.dot_dimension_numbers<[1], [0], [0], [1], [0, 0, 1, 1], [], []>} : vector<8x8xbf16>, vector<8x8xbf16>, vector<8x8xf32> -> vector<8x8xf32>
    %103 = tpu.reciprocal %100 {approx = true} : vector<8x1xf32> -> vector<8x1xf32>
    %104 = vector.broadcast %103 : vector<8x1xf32> to vector<8x8xf32>
    %105 = arith.mulf %102, %104 : vector<8x8xf32>
    %106 = arith.truncf %105 : vector<8x8xf32> to vector<8x8xbf16>
    %107 = vector.extract_strided_slice %25 {offsets = [24, 0], sizes = [8, 32], strides = [1, 1]} : vector<32x32xbf16> to vector<8x32xbf16>
    %cst_34 = arith.constant dense<0.000000e+00> : vector<8x32xf32>
    %108 = tpu.matmul %106, %107, %cst_34 {dimension_numbers = #tpu.dot_dimension_numbers<[1], [0], [0], [1], [0, 0, 1, 1], [], []>} : vector<8x8xbf16>, vector<8x32xbf16>, vector<8x32xf32> -> vector<8x32xf32>
    %109 = arith.addf %88, %108 : vector<8x32xf32>
    %110 = vector.broadcast %26 : vector<1x32xf32> to vector<8x32xf32>
    %111 = arith.addf %109, %110 : vector<8x32xf32>
    %112 = arith.addf %6, %111 : vector<8x32xf32>
    %c0_35 = arith.constant 0 : index
    %c0_36 = arith.constant 0 : index
    %113 = vector.load %arg8[%c0_35, %c0_36] : memref<1x32xf32, #tpu.memory_space<vmem>>, vector<1x32xf32>
    %c0_37 = arith.constant 0 : index
    %c0_38 = arith.constant 0 : index
    %114 = vector.load %arg9[%c0_37, %c0_38] : memref<1x32xf32, #tpu.memory_space<vmem>>, vector<1x32xf32>
    %cst_39 = arith.constant dense<0.000000e+00> : vector<8xf32>
    %115 = vector.multi_reduction <add>, %112, %cst_39 [1] : vector<8x32xf32> to vector<8xf32>
    %116 = vector.shape_cast %115 : vector<8xf32> to vector<8x1xf32>
    %cst_40 = arith.constant 3.200000e+01 : f32
    %117 = vector.broadcast %cst_40 : f32 to vector<8x1xf32>
    %118 = arith.divf %116, %117 : vector<8x1xf32>
    %119 = vector.broadcast %118 : vector<8x1xf32> to vector<8x32xf32>
    %120 = arith.subf %112, %119 : vector<8x32xf32>
    %121 = arith.mulf %120, %120 : vector<8x32xf32>
    %cst_41 = arith.constant dense<0.000000e+00> : vector<8xf32>
    %122 = vector.multi_reduction <add>, %121, %cst_41 [1] : vector<8x32xf32> to vector<8xf32>
    %123 = vector.shape_cast %122 : vector<8xf32> to vector<8x1xf32>
    %cst_42 = arith.constant 3.200000e+01 : f32
    %124 = vector.broadcast %cst_42 : f32 to vector<8x1xf32>
    %125 = arith.divf %123, %124 : vector<8x1xf32>
    %126 = vector.broadcast %118 : vector<8x1xf32> to vector<8x32xf32>
    %127 = arith.subf %112, %126 : vector<8x32xf32>
    %cst_43 = arith.constant 9.99999974E-6 : f32
    %128 = vector.broadcast %cst_43 : f32 to vector<8x1xf32>
    %129 = arith.addf %125, %128 : vector<8x1xf32>
    %130 = math.rsqrt %129 : vector<8x1xf32>
    %131 = vector.broadcast %130 : vector<8x1xf32> to vector<8x32xf32>
    %132 = arith.mulf %127, %131 : vector<8x32xf32>
    %133 = vector.broadcast %113 : vector<1x32xf32> to vector<8x32xf32>
    %134 = arith.mulf %132, %133 : vector<8x32xf32>
    %135 = vector.broadcast %114 : vector<1x32xf32> to vector<8x32xf32>
    %136 = arith.addf %134, %135 : vector<8x32xf32>
    %137 = arith.truncf %136 : vector<8x32xf32> to vector<8x32xbf16>
    %c0_44 = arith.constant 0 : index
    %c0_45 = arith.constant 0 : index
    %c0_46 = arith.constant 0 : index
    %138 = vector.load %arg10[%c0_44, %c0_45, %c0_46] : memref<1x8x32xbf16, #tpu.memory_space<vmem>>, vector<1x8x32xbf16>
    %139 = vector.shape_cast %138 : vector<1x8x32xbf16> to vector<8x32xbf16>
    %140 = vector.shape_cast %137 : vector<8x32xbf16> to vector<1x8x32xbf16>
    tpu.vector_store %arg10[%c0_44, %c0_45, %c0_46], %140 {strides = array<i32>} : memref<1x8x32xbf16, #tpu.memory_space<vmem>>, vector<1x8x32xbf16>,
    return
  }
  func.func @transform_0(%arg0: i32, %arg1: i32) -> (i32, i32, i32) {
    %c0_i32 = arith.constant 0 : i32
    %c0_i32_0 = arith.constant 0 : i32
    return %arg0, %arg1, %c0_i32 : i32, i32, i32
  }
  func.func @transform_1(%arg0: i32, %arg1: i32) -> (i32, i32, i32) {
    %c0_i32 = arith.constant 0 : i32
    %c0_i32_0 = arith.constant 0 : i32
    %c0_i32_1 = arith.constant 0 : i32
    return %arg0, %c0_i32, %c0_i32_0 : i32, i32, i32
  }
  func.func @transform_2(%arg0: i32, %arg1: i32) -> (i32, i32) {
    %c0_i32 = arith.constant 0 : i32
    %c0_i32_0 = arith.constant 0 : i32
    %c0_i32_1 = arith.constant 0 : i32
    return %c0_i32, %c0_i32_0 : i32, i32
  }
  func.func @transform_3(%arg0: i32, %arg1: i32) -> (i32, i32) {
    %c0_i32 = arith.constant 0 : i32
    %c0_i32_0 = arith.constant 0 : i32
    %c0_i32_1 = arith.constant 0 : i32
    return %c0_i32, %c0_i32_0 : i32, i32
  }
  func.func @transform_4(%arg0: i32, %arg1: i32) -> (i32, i32) {
    %c0_i32 = arith.constant 0 : i32
    %c0_i32_0 = arith.constant 0 : i32
    %c0_i32_1 = arith.constant 0 : i32
    return %c0_i32, %c0_i32_0 : i32, i32
  }
  func.func @transform_5(%arg0: i32, %arg1: i32) -> (i32, i32) {
    %c0_i32 = arith.constant 0 : i32
    %c0_i32_0 = arith.constant 0 : i32
    %c0_i32_1 = arith.constant 0 : i32
    return %c0_i32, %c0_i32_0 : i32, i32
  }
  func.func @transform_6(%arg0: i32, %arg1: i32) -> (i32, i32) {
    %c0_i32 = arith.constant 0 : i32
    %c0_i32_0 = arith.constant 0 : i32
    %c0_i32_1 = arith.constant 0 : i32
    return %c0_i32, %c0_i32_0 : i32, i32
  }
  func.func @transform_7(%arg0: i32, %arg1: i32) -> (i32, i32) {
    %c0_i32 = arith.constant 0 : i32
    %c0_i32_0 = arith.constant 0 : i32
    %c0_i32_1 = arith.constant 0 : i32
    return %c0_i32, %c0_i32_0 : i32, i32
  }
  func.func @transform_8(%arg0: i32, %arg1: i32) -> (i32, i32, i32) {
    %c0_i32 = arith.constant 0 : i32
    %c0_i32_0 = arith.constant 0 : i32
    return %arg0, %arg1, %c0_i32 : i32, i32, i32
  }
}

module attributes {stable_mosaic.version = 11 : i64} {
  func.func @_cross_attn_block_kernel(%arg0: i32, %arg1: i32, %arg2: memref<1x8x32xbf16, #tpu.memory_space<vmem>>, %arg3: memref<1x16x32xbf16, #tpu.memory_space<vmem>>, %arg4: memref<32x32xbf16, #tpu.memory_space<vmem>>, %arg5: memref<1x32xf32, #tpu.memory_space<vmem>>, %arg6: memref<32x64xbf16, #tpu.memory_space<vmem>>, %arg7: memref<1x64xf32, #tpu.memory_space<vmem>>, %arg8: memref<32x32xbf16, #tpu.memory_space<vmem>>, %arg9: memref<1x32xf32, #tpu.memory_space<vmem>>, %arg10: memref<1x32xf32, #tpu.memory_space<vmem>>, %arg11: memref<1x32xf32, #tpu.memory_space<vmem>>, %arg12: memref<1x8x32xbf16, #tpu.memory_space<vmem>>) attributes {dimension_semantics = [#tpu.dimension_semantics<parallel>, #tpu.dimension_semantics<parallel>], iteration_bounds = array<i64: 2, 1>, scalar_prefetch = 0 : i64, scratch_operands = 0 : i64, tpu.core_type = #tpu.core_type<tc>, window_params = [{transform_indices = @transform_0, window_bounds = array<i64: 1, 8, 32>}, {transform_indices = @transform_1, window_bounds = array<i64: 1, 16, 32>}, {pipeline_mode = #tpu.pipeline_mode<synchronous>, transform_indices = @transform_2, window_bounds = array<i64: 32, 32>}, {pipeline_mode = #tpu.pipeline_mode<synchronous>, transform_indices = @transform_3, window_bounds = array<i64: 1, 32>}, {pipeline_mode = #tpu.pipeline_mode<synchronous>, transform_indices = @transform_4, window_bounds = array<i64: 32, 64>}, {pipeline_mode = #tpu.pipeline_mode<synchronous>, transform_indices = @transform_5, window_bounds = array<i64: 1, 64>}, {pipeline_mode = #tpu.pipeline_mode<synchronous>, transform_indices = @transform_6, window_bounds = array<i64: 32, 32>}, {pipeline_mode = #tpu.pipeline_mode<synchronous>, transform_indices = @transform_7, window_bounds = array<i64: 1, 32>}, {pipeline_mode = #tpu.pipeline_mode<synchronous>, transform_indices = @transform_8, window_bounds = array<i64: 1, 32>}, {pipeline_mode = #tpu.pipeline_mode<synchronous>, transform_indices = @transform_9, window_bounds = array<i64: 1, 32>}, {transform_indices = @transform_10, window_bounds = array<i64: 1, 8, 32>}]} {
    %c0 = arith.constant 0 : index
    %c0_0 = arith.constant 0 : index
    %c0_1 = arith.constant 0 : index
    %0 = vector.load %arg2[%c0, %c0_0, %c0_1] : memref<1x8x32xbf16, #tpu.memory_space<vmem>>, vector<1x8x32xbf16>
    %1 = vector.shape_cast %0 : vector<1x8x32xbf16> to vector<8x32xbf16>
    %2 = arith.extf %1 : vector<8x32xbf16> to vector<8x32xf32>
    %c0_2 = arith.constant 0 : index
    %c0_3 = arith.constant 0 : index
    %3 = vector.load %arg4[%c0_2, %c0_3] : memref<32x32xbf16, #tpu.memory_space<vmem>>, vector<32x32xbf16>
    %cst = arith.constant dense<0.000000e+00> : vector<8x32xf32>
    %4 = tpu.matmul %1, %3, %cst {dimension_numbers = #tpu.dot_dimension_numbers<[1], [0], [0], [1], [0, 0, 1, 1], [], []>} : vector<8x32xbf16>, vector<32x32xbf16>, vector<8x32xf32> -> vector<8x32xf32>
    %c0_4 = arith.constant 0 : index
    %c0_5 = arith.constant 0 : index
    %5 = vector.load %arg5[%c0_4, %c0_5] : memref<1x32xf32, #tpu.memory_space<vmem>>, vector<1x32xf32>
    %6 = vector.broadcast %5 : vector<1x32xf32> to vector<8x32xf32>
    %7 = arith.addf %4, %6 : vector<8x32xf32>
    %8 = arith.truncf %7 : vector<8x32xf32> to vector<8x32xbf16>
    %c0_6 = arith.constant 0 : index
    %c0_7 = arith.constant 0 : index
    %c0_8 = arith.constant 0 : index
    %9 = vector.load %arg3[%c0_6, %c0_7, %c0_8] : memref<1x16x32xbf16, #tpu.memory_space<vmem>>, vector<1x16x32xbf16>
    %10 = vector.shape_cast %9 : vector<1x16x32xbf16> to vector<16x32xbf16>
    %c0_9 = arith.constant 0 : index
    %c0_10 = arith.constant 0 : index
    %11 = vector.load %arg6[%c0_9, %c0_10] : memref<32x64xbf16, #tpu.memory_space<vmem>>, vector<32x64xbf16>
    %cst_11 = arith.constant dense<0.000000e+00> : vector<16x64xf32>
    %12 = tpu.matmul %10, %11, %cst_11 {dimension_numbers = #tpu.dot_dimension_numbers<[1], [0], [0], [1], [0, 0, 1, 1], [], []>} : vector<16x32xbf16>, vector<32x64xbf16>, vector<16x64xf32> -> vector<16x64xf32>
    %c0_12 = arith.constant 0 : index
    %c0_13 = arith.constant 0 : index
    %13 = vector.load %arg7[%c0_12, %c0_13] : memref<1x64xf32, #tpu.memory_space<vmem>>, vector<1x64xf32>
    %14 = vector.broadcast %13 : vector<1x64xf32> to vector<16x64xf32>
    %15 = arith.addf %12, %14 : vector<16x64xf32>
    %16 = arith.truncf %15 : vector<16x64xf32> to vector<16x64xbf16>
    %c0_14 = arith.constant 0 : index
    %c0_15 = arith.constant 0 : index
    %17 = vector.load %arg8[%c0_14, %c0_15] : memref<32x32xbf16, #tpu.memory_space<vmem>>, vector<32x32xbf16>
    %c0_16 = arith.constant 0 : index
    %c0_17 = arith.constant 0 : index
    %18 = vector.load %arg9[%c0_16, %c0_17] : memref<1x32xf32, #tpu.memory_space<vmem>>, vector<1x32xf32>
    %19 = vector.extract_strided_slice %8 {offsets = [0, 0], sizes = [8, 8], strides = [1, 1]} : vector<8x32xbf16> to vector<8x8xbf16>
    %20 = vector.extract_strided_slice %16 {offsets = [0, 0], sizes = [16, 8], strides = [1, 1]} : vector<16x64xbf16> to vector<16x8xbf16>
    %21 = vector.extract_strided_slice %16 {offsets = [0, 32], sizes = [16, 8], strides = [1, 1]} : vector<16x64xbf16> to vector<16x8xbf16>
    %cst_18 = arith.constant dense<0.000000e+00> : vector<8x16xf32>
    %22 = tpu.matmul %19, %20, %cst_18 {dimension_numbers = #tpu.dot_dimension_numbers<[1], [1], [0], [0], [0, 0, 1, 0], [], []>} : vector<8x8xbf16>, vector<16x8xbf16>, vector<8x16xf32> -> vector<8x16xf32>
    %cst_19 = arith.constant dense<0xFF800000> : vector<8xf32>
    %23 = vector.multi_reduction <maximumf>, %22, %cst_19 [1] : vector<8x16xf32> to vector<8xf32>
    %24 = vector.shape_cast %23 : vector<8xf32> to vector<8x1xf32>
    %25 = vector.broadcast %24 : vector<8x1xf32> to vector<8x16xf32>
    %26 = arith.subf %22, %25 : vector<8x16xf32>
    %27 = math.exp %26 : vector<8x16xf32>
    %cst_20 = arith.constant dense<0.000000e+00> : vector<8xf32>
    %28 = vector.multi_reduction <add>, %27, %cst_20 [1] : vector<8x16xf32> to vector<8xf32>
    %29 = vector.shape_cast %28 : vector<8xf32> to vector<8x1xf32>
    %30 = arith.truncf %27 : vector<8x16xf32> to vector<8x16xbf16>
    %cst_21 = arith.constant dense<0.000000e+00> : vector<8x8xf32>
    %31 = tpu.matmul %30, %21, %cst_21 {dimension_numbers = #tpu.dot_dimension_numbers<[1], [0], [0], [1], [0, 0, 1, 1], [], []>} : vector<8x16xbf16>, vector<16x8xbf16>, vector<8x8xf32> -> vector<8x8xf32>
    %32 = tpu.reciprocal %29 {approx = true} : vector<8x1xf32> -> vector<8x1xf32>
    %33 = vector.broadcast %32 : vector<8x1xf32> to vector<8x8xf32>
    %34 = arith.mulf %31, %33 : vector<8x8xf32>
    %35 = arith.truncf %34 : vector<8x8xf32> to vector<8x8xbf16>
    %36 = vector.extract_strided_slice %17 {offsets = [0, 0], sizes = [8, 32], strides = [1, 1]} : vector<32x32xbf16> to vector<8x32xbf16>
    %cst_22 = arith.constant dense<0.000000e+00> : vector<8x32xf32>
    %37 = tpu.matmul %35, %36, %cst_22 {dimension_numbers = #tpu.dot_dimension_numbers<[1], [0], [0], [1], [0, 0, 1, 1], [], []>} : vector<8x8xbf16>, vector<8x32xbf16>, vector<8x32xf32> -> vector<8x32xf32>
    %38 = vector.extract_strided_slice %8 {offsets = [0, 8], sizes = [8, 8], strides = [1, 1]} : vector<8x32xbf16> to vector<8x8xbf16>
    %39 = vector.extract_strided_slice %16 {offsets = [0, 8], sizes = [16, 8], strides = [1, 1]} : vector<16x64xbf16> to vector<16x8xbf16>
    %40 = vector.extract_strided_slice %16 {offsets = [0, 40], sizes = [16, 8], strides = [1, 1]} : vector<16x64xbf16> to vector<16x8xbf16>
    %cst_23 = arith.constant dense<0.000000e+00> : vector<8x16xf32>
    %41 = tpu.matmul %38, %39, %cst_23 {dimension_numbers = #tpu.dot_dimension_numbers<[1], [1], [0], [0], [0, 0, 1, 0], [], []>} : vector<8x8xbf16>, vector<16x8xbf16>, vector<8x16xf32> -> vector<8x16xf32>
    %cst_24 = arith.constant dense<0xFF800000> : vector<8xf32>
    %42 = vector.multi_reduction <maximumf>, %41, %cst_24 [1] : vector<8x16xf32> to vector<8xf32>
    %43 = vector.shape_cast %42 : vector<8xf32> to vector<8x1xf32>
    %44 = vector.broadcast %43 : vector<8x1xf32> to vector<8x16xf32>
    %45 = arith.subf %41, %44 : vector<8x16xf32>
    %46 = math.exp %45 : vector<8x16xf32>
    %cst_25 = arith.constant dense<0.000000e+00> : vector<8xf32>
    %47 = vector.multi_reduction <add>, %46, %cst_25 [1] : vector<8x16xf32> to vector<8xf32>
    %48 = vector.shape_cast %47 : vector<8xf32> to vector<8x1xf32>
    %49 = arith.truncf %46 : vector<8x16xf32> to vector<8x16xbf16>
    %cst_26 = arith.constant dense<0.000000e+00> : vector<8x8xf32>
    %50 = tpu.matmul %49, %40, %cst_26 {dimension_numbers = #tpu.dot_dimension_numbers<[1], [0], [0], [1], [0, 0, 1, 1], [], []>} : vector<8x16xbf16>, vector<16x8xbf16>, vector<8x8xf32> -> vector<8x8xf32>
    %51 = tpu.reciprocal %48 {approx = true} : vector<8x1xf32> -> vector<8x1xf32>
    %52 = vector.broadcast %51 : vector<8x1xf32> to vector<8x8xf32>
    %53 = arith.mulf %50, %52 : vector<8x8xf32>
    %54 = arith.truncf %53 : vector<8x8xf32> to vector<8x8xbf16>
    %55 = vector.extract_strided_slice %17 {offsets = [8, 0], sizes = [8, 32], strides = [1, 1]} : vector<32x32xbf16> to vector<8x32xbf16>
    %cst_27 = arith.constant dense<0.000000e+00> : vector<8x32xf32>
    %56 = tpu.matmul %54, %55, %cst_27 {dimension_numbers = #tpu.dot_dimension_numbers<[1], [0], [0], [1], [0, 0, 1, 1], [], []>} : vector<8x8xbf16>, vector<8x32xbf16>, vector<8x32xf32> -> vector<8x32xf32>
    %57 = arith.addf %37, %56 : vector<8x32xf32>
    %58 = vector.extract_strided_slice %8 {offsets = [0, 16], sizes = [8, 8], strides = [1, 1]} : vector<8x32xbf16> to vector<8x8xbf16>
    %59 = vector.extract_strided_slice %16 {offsets = [0, 16], sizes = [16, 8], strides = [1, 1]} : vector<16x64xbf16> to vector<16x8xbf16>
    %60 = vector.extract_strided_slice %16 {offsets = [0, 48], sizes = [16, 8], strides = [1, 1]} : vector<16x64xbf16> to vector<16x8xbf16>
    %cst_28 = arith.constant dense<0.000000e+00> : vector<8x16xf32>
    %61 = tpu.matmul %58, %59, %cst_28 {dimension_numbers = #tpu.dot_dimension_numbers<[1], [1], [0], [0], [0, 0, 1, 0], [], []>} : vector<8x8xbf16>, vector<16x8xbf16>, vector<8x16xf32> -> vector<8x16xf32>
    %cst_29 = arith.constant dense<0xFF800000> : vector<8xf32>
    %62 = vector.multi_reduction <maximumf>, %61, %cst_29 [1] : vector<8x16xf32> to vector<8xf32>
    %63 = vector.shape_cast %62 : vector<8xf32> to vector<8x1xf32>
    %64 = vector.broadcast %63 : vector<8x1xf32> to vector<8x16xf32>
    %65 = arith.subf %61, %64 : vector<8x16xf32>
    %66 = math.exp %65 : vector<8x16xf32>
    %cst_30 = arith.constant dense<0.000000e+00> : vector<8xf32>
    %67 = vector.multi_reduction <add>, %66, %cst_30 [1] : vector<8x16xf32> to vector<8xf32>
    %68 = vector.shape_cast %67 : vector<8xf32> to vector<8x1xf32>
    %69 = arith.truncf %66 : vector<8x16xf32> to vector<8x16xbf16>
    %cst_31 = arith.constant dense<0.000000e+00> : vector<8x8xf32>
    %70 = tpu.matmul %69, %60, %cst_31 {dimension_numbers = #tpu.dot_dimension_numbers<[1], [0], [0], [1], [0, 0, 1, 1], [], []>} : vector<8x16xbf16>, vector<16x8xbf16>, vector<8x8xf32> -> vector<8x8xf32>
    %71 = tpu.reciprocal %68 {approx = true} : vector<8x1xf32> -> vector<8x1xf32>
    %72 = vector.broadcast %71 : vector<8x1xf32> to vector<8x8xf32>
    %73 = arith.mulf %70, %72 : vector<8x8xf32>
    %74 = arith.truncf %73 : vector<8x8xf32> to vector<8x8xbf16>
    %75 = vector.extract_strided_slice %17 {offsets = [16, 0], sizes = [8, 32], strides = [1, 1]} : vector<32x32xbf16> to vector<8x32xbf16>
    %cst_32 = arith.constant dense<0.000000e+00> : vector<8x32xf32>
    %76 = tpu.matmul %74, %75, %cst_32 {dimension_numbers = #tpu.dot_dimension_numbers<[1], [0], [0], [1], [0, 0, 1, 1], [], []>} : vector<8x8xbf16>, vector<8x32xbf16>, vector<8x32xf32> -> vector<8x32xf32>
    %77 = arith.addf %57, %76 : vector<8x32xf32>
    %78 = vector.extract_strided_slice %8 {offsets = [0, 24], sizes = [8, 8], strides = [1, 1]} : vector<8x32xbf16> to vector<8x8xbf16>
    %79 = vector.extract_strided_slice %16 {offsets = [0, 24], sizes = [16, 8], strides = [1, 1]} : vector<16x64xbf16> to vector<16x8xbf16>
    %80 = vector.extract_strided_slice %16 {offsets = [0, 56], sizes = [16, 8], strides = [1, 1]} : vector<16x64xbf16> to vector<16x8xbf16>
    %cst_33 = arith.constant dense<0.000000e+00> : vector<8x16xf32>
    %81 = tpu.matmul %78, %79, %cst_33 {dimension_numbers = #tpu.dot_dimension_numbers<[1], [1], [0], [0], [0, 0, 1, 0], [], []>} : vector<8x8xbf16>, vector<16x8xbf16>, vector<8x16xf32> -> vector<8x16xf32>
    %cst_34 = arith.constant dense<0xFF800000> : vector<8xf32>
    %82 = vector.multi_reduction <maximumf>, %81, %cst_34 [1] : vector<8x16xf32> to vector<8xf32>
    %83 = vector.shape_cast %82 : vector<8xf32> to vector<8x1xf32>
    %84 = vector.broadcast %83 : vector<8x1xf32> to vector<8x16xf32>
    %85 = arith.subf %81, %84 : vector<8x16xf32>
    %86 = math.exp %85 : vector<8x16xf32>
    %cst_35 = arith.constant dense<0.000000e+00> : vector<8xf32>
    %87 = vector.multi_reduction <add>, %86, %cst_35 [1] : vector<8x16xf32> to vector<8xf32>
    %88 = vector.shape_cast %87 : vector<8xf32> to vector<8x1xf32>
    %89 = arith.truncf %86 : vector<8x16xf32> to vector<8x16xbf16>
    %cst_36 = arith.constant dense<0.000000e+00> : vector<8x8xf32>
    %90 = tpu.matmul %89, %80, %cst_36 {dimension_numbers = #tpu.dot_dimension_numbers<[1], [0], [0], [1], [0, 0, 1, 1], [], []>} : vector<8x16xbf16>, vector<16x8xbf16>, vector<8x8xf32> -> vector<8x8xf32>
    %91 = tpu.reciprocal %88 {approx = true} : vector<8x1xf32> -> vector<8x1xf32>
    %92 = vector.broadcast %91 : vector<8x1xf32> to vector<8x8xf32>
    %93 = arith.mulf %90, %92 : vector<8x8xf32>
    %94 = arith.truncf %93 : vector<8x8xf32> to vector<8x8xbf16>
    %95 = vector.extract_strided_slice %17 {offsets = [24, 0], sizes = [8, 32], strides = [1, 1]} : vector<32x32xbf16> to vector<8x32xbf16>
    %cst_37 = arith.constant dense<0.000000e+00> : vector<8x32xf32>
    %96 = tpu.matmul %94, %95, %cst_37 {dimension_numbers = #tpu.dot_dimension_numbers<[1], [0], [0], [1], [0, 0, 1, 1], [], []>} : vector<8x8xbf16>, vector<8x32xbf16>, vector<8x32xf32> -> vector<8x32xf32>
    %97 = arith.addf %77, %96 : vector<8x32xf32>
    %98 = vector.broadcast %18 : vector<1x32xf32> to vector<8x32xf32>
    %99 = arith.addf %97, %98 : vector<8x32xf32>
    %100 = arith.addf %2, %99 : vector<8x32xf32>
    %c0_38 = arith.constant 0 : index
    %c0_39 = arith.constant 0 : index
    %101 = vector.load %arg10[%c0_38, %c0_39] : memref<1x32xf32, #tpu.memory_space<vmem>>, vector<1x32xf32>
    %c0_40 = arith.constant 0 : index
    %c0_41 = arith.constant 0 : index
    %102 = vector.load %arg11[%c0_40, %c0_41] : memref<1x32xf32, #tpu.memory_space<vmem>>, vector<1x32xf32>
    %cst_42 = arith.constant dense<0.000000e+00> : vector<8xf32>
    %103 = vector.multi_reduction <add>, %100, %cst_42 [1] : vector<8x32xf32> to vector<8xf32>
    %104 = vector.shape_cast %103 : vector<8xf32> to vector<8x1xf32>
    %cst_43 = arith.constant 3.200000e+01 : f32
    %105 = vector.broadcast %cst_43 : f32 to vector<8x1xf32>
    %106 = arith.divf %104, %105 : vector<8x1xf32>
    %107 = vector.broadcast %106 : vector<8x1xf32> to vector<8x32xf32>
    %108 = arith.subf %100, %107 : vector<8x32xf32>
    %109 = arith.mulf %108, %108 : vector<8x32xf32>
    %cst_44 = arith.constant dense<0.000000e+00> : vector<8xf32>
    %110 = vector.multi_reduction <add>, %109, %cst_44 [1] : vector<8x32xf32> to vector<8xf32>
    %111 = vector.shape_cast %110 : vector<8xf32> to vector<8x1xf32>
    %cst_45 = arith.constant 3.200000e+01 : f32
    %112 = vector.broadcast %cst_45 : f32 to vector<8x1xf32>
    %113 = arith.divf %111, %112 : vector<8x1xf32>
    %114 = vector.broadcast %106 : vector<8x1xf32> to vector<8x32xf32>
    %115 = arith.subf %100, %114 : vector<8x32xf32>
    %cst_46 = arith.constant 9.99999974E-6 : f32
    %116 = vector.broadcast %cst_46 : f32 to vector<8x1xf32>
    %117 = arith.addf %113, %116 : vector<8x1xf32>
    %118 = math.rsqrt %117 : vector<8x1xf32>
    %119 = vector.broadcast %118 : vector<8x1xf32> to vector<8x32xf32>
    %120 = arith.mulf %115, %119 : vector<8x32xf32>
    %121 = vector.broadcast %101 : vector<1x32xf32> to vector<8x32xf32>
    %122 = arith.mulf %120, %121 : vector<8x32xf32>
    %123 = vector.broadcast %102 : vector<1x32xf32> to vector<8x32xf32>
    %124 = arith.addf %122, %123 : vector<8x32xf32>
    %125 = arith.truncf %124 : vector<8x32xf32> to vector<8x32xbf16>
    %c0_47 = arith.constant 0 : index
    %c0_48 = arith.constant 0 : index
    %c0_49 = arith.constant 0 : index
    %126 = vector.load %arg12[%c0_47, %c0_48, %c0_49] : memref<1x8x32xbf16, #tpu.memory_space<vmem>>, vector<1x8x32xbf16>
    %127 = vector.shape_cast %126 : vector<1x8x32xbf16> to vector<8x32xbf16>
    %128 = vector.shape_cast %125 : vector<8x32xbf16> to vector<1x8x32xbf16>
    tpu.vector_store %arg12[%c0_47, %c0_48, %c0_49], %128 {strides = array<i32>} : memref<1x8x32xbf16, #tpu.memory_space<vmem>>, vector<1x8x32xbf16>,
    return
  }
  func.func @transform_0(%arg0: i32, %arg1: i32) -> (i32, i32, i32) {
    %c0_i32 = arith.constant 0 : i32
    %c0_i32_0 = arith.constant 0 : i32
    return %arg0, %arg1, %c0_i32 : i32, i32, i32
  }
  func.func @transform_1(%arg0: i32, %arg1: i32) -> (i32, i32, i32) {
    %c0_i32 = arith.constant 0 : i32
    %c0_i32_0 = arith.constant 0 : i32
    %c0_i32_1 = arith.constant 0 : i32
    return %arg0, %c0_i32, %c0_i32_0 : i32, i32, i32
  }
  func.func @transform_2(%arg0: i32, %arg1: i32) -> (i32, i32) {
    %c0_i32 = arith.constant 0 : i32
    %c0_i32_0 = arith.constant 0 : i32
    %c0_i32_1 = arith.constant 0 : i32
    return %c0_i32, %c0_i32_0 : i32, i32
  }
  func.func @transform_3(%arg0: i32, %arg1: i32) -> (i32, i32) {
    %c0_i32 = arith.constant 0 : i32
    %c0_i32_0 = arith.constant 0 : i32
    %c0_i32_1 = arith.constant 0 : i32
    return %c0_i32, %c0_i32_0 : i32, i32
  }
  func.func @transform_4(%arg0: i32, %arg1: i32) -> (i32, i32) {
    %c0_i32 = arith.constant 0 : i32
    %c0_i32_0 = arith.constant 0 : i32
    %c0_i32_1 = arith.constant 0 : i32
    return %c0_i32, %c0_i32_0 : i32, i32
  }
  func.func @transform_5(%arg0: i32, %arg1: i32) -> (i32, i32) {
    %c0_i32 = arith.constant 0 : i32
    %c0_i32_0 = arith.constant 0 : i32
    %c0_i32_1 = arith.constant 0 : i32
    return %c0_i32, %c0_i32_0 : i32, i32
  }
  func.func @transform_6(%arg0: i32, %arg1: i32) -> (i32, i32) {
    %c0_i32 = arith.constant 0 : i32
    %c0_i32_0 = arith.constant 0 : i32
    %c0_i32_1 = arith.constant 0 : i32
    return %c0_i32, %c0_i32_0 : i32, i32
  }
  func.func @transform_7(%arg0: i32, %arg1: i32) -> (i32, i32) {
    %c0_i32 = arith.constant 0 : i32
    %c0_i32_0 = arith.constant 0 : i32
    %c0_i32_1 = arith.constant 0 : i32
    return %c0_i32, %c0_i32_0 : i32, i32
  }
  func.func @transform_8(%arg0: i32, %arg1: i32) -> (i32, i32) {
    %c0_i32 = arith.constant 0 : i32
    %c0_i32_0 = arith.constant 0 : i32
    %c0_i32_1 = arith.constant 0 : i32
    return %c0_i32, %c0_i32_0 : i32, i32
  }
  func.func @transform_9(%arg0: i32, %arg1: i32) -> (i32, i32) {
    %c0_i32 = arith.constant 0 : i32
    %c0_i32_0 = arith.constant 0 : i32
    %c0_i32_1 = arith.constant 0 : i32
    return %c0_i32, %c0_i32_0 : i32, i32
  }
  func.func @transform_10(%arg0: i32, %arg1: i32) -> (i32, i32, i32) {
    %c0_i32 = arith.constant 0 : i32
    %c0_i32_0 = arith.constant 0 : i32
    return %arg0, %arg1, %c0_i32 : i32, i32, i32
  }
}

module attributes {stable_mosaic.version = 11 : i64} {
  func.func @_ffn_block_kernel(%arg0: i32, %arg1: i32, %arg2: memref<16x32xbf16, #tpu.memory_space<vmem>>, %arg3: memref<32x64xbf16, #tpu.memory_space<vmem>>, %arg4: memref<1x64xf32, #tpu.memory_space<vmem>>, %arg5: memref<64x32xbf16, #tpu.memory_space<vmem>>, %arg6: memref<1x32xf32, #tpu.memory_space<vmem>>, %arg7: memref<1x32xf32, #tpu.memory_space<vmem>>, %arg8: memref<1x32xf32, #tpu.memory_space<vmem>>, %arg9: memref<16x32xbf16, #tpu.memory_space<vmem>>, %arg10: memref<16x32xf32, #tpu.memory_space<vmem>>) attributes {dimension_semantics = [#tpu.dimension_semantics<parallel>, #tpu.dimension_semantics<arbitrary>], iteration_bounds = array<i64: 1, 1>, scalar_prefetch = 0 : i64, scratch_operands = 1 : i64, tpu.core_type = #tpu.core_type<tc>, window_params = [{transform_indices = @transform_0, window_bounds = array<i64: 16, 32>}, {transform_indices = @transform_1, window_bounds = array<i64: 32, 64>}, {transform_indices = @transform_2, window_bounds = array<i64: 1, 64>}, {transform_indices = @transform_3, window_bounds = array<i64: 64, 32>}, {pipeline_mode = #tpu.pipeline_mode<synchronous>, transform_indices = @transform_4, window_bounds = array<i64: 1, 32>}, {pipeline_mode = #tpu.pipeline_mode<synchronous>, transform_indices = @transform_5, window_bounds = array<i64: 1, 32>}, {pipeline_mode = #tpu.pipeline_mode<synchronous>, transform_indices = @transform_6, window_bounds = array<i64: 1, 32>}, {transform_indices = @transform_7, window_bounds = array<i64: 16, 32>}]} {
    %c0 = arith.constant 0 : index
    %c0_0 = arith.constant 0 : index
    %0 = vector.load %arg2[%c0, %c0_0] : memref<16x32xbf16, #tpu.memory_space<vmem>>, vector<16x32xbf16>
    %c0_1 = arith.constant 0 : index
    %c0_2 = arith.constant 0 : index
    %1 = vector.load %arg3[%c0_1, %c0_2] : memref<32x64xbf16, #tpu.memory_space<vmem>>, vector<32x64xbf16>
    %cst = arith.constant dense<0.000000e+00> : vector<16x64xf32>
    %2 = tpu.matmul %0, %1, %cst {dimension_numbers = #tpu.dot_dimension_numbers<[1], [0], [0], [1], [0, 0, 1, 1], [], []>} : vector<16x32xbf16>, vector<32x64xbf16>, vector<16x64xf32> -> vector<16x64xf32>
    %c0_3 = arith.constant 0 : index
    %c0_4 = arith.constant 0 : index
    %3 = vector.load %arg4[%c0_3, %c0_4] : memref<1x64xf32, #tpu.memory_space<vmem>>, vector<1x64xf32>
    %4 = vector.broadcast %3 : vector<1x64xf32> to vector<16x64xf32>
    %5 = arith.addf %2, %4 : vector<16x64xf32>
    %cst_5 = arith.constant 0.000000e+00 : f32
    %6 = vector.broadcast %cst_5 : f32 to vector<16x64xf32>
    %7 = arith.maximumf %5, %6 : vector<16x64xf32>
    %8 = arith.truncf %7 : vector<16x64xf32> to vector<16x64xbf16>
    %c0_6 = arith.constant 0 : index
    %c0_7 = arith.constant 0 : index
    %9 = vector.load %arg5[%c0_6, %c0_7] : memref<64x32xbf16, #tpu.memory_space<vmem>>, vector<64x32xbf16>
    %cst_8 = arith.constant dense<0.000000e+00> : vector<16x32xf32>
    %10 = tpu.matmul %8, %9, %cst_8 {dimension_numbers = #tpu.dot_dimension_numbers<[1], [0], [0], [1], [0, 0, 1, 1], [], []>} : vector<16x64xbf16>, vector<64x32xbf16>, vector<16x32xf32> -> vector<16x32xf32>
    %c0_i32 = arith.constant 0 : i32
    %11 = arith.cmpi eq, %arg1, %c0_i32 : i32
    %12 = arith.extui %11 : i1 to i32
    %c0_i32_9 = arith.constant 0 : i32
    %13 = arith.cmpi ne, %12, %c0_i32_9 : i32
    scf.if %13 {
      %c0_14 = arith.constant 0 : index
      %c0_15 = arith.constant 0 : index
      %20 = vector.load %arg10[%c0_14, %c0_15] : memref<16x32xf32, #tpu.memory_space<vmem>>, vector<16x32xf32>
      tpu.vector_store %arg10[%c0_14, %c0_15], %10 {strides = array<i32>} : memref<16x32xf32, #tpu.memory_space<vmem>>, vector<16x32xf32>,
    } else {
    }
    %c0_i32_10 = arith.constant 0 : i32
    %14 = arith.cmpi sgt, %arg1, %c0_i32_10 : i32
    %15 = arith.extui %14 : i1 to i32
    %c0_i32_11 = arith.constant 0 : i32
    %16 = arith.cmpi ne, %15, %c0_i32_11 : i32
    scf.if %16 {
      %c0_14 = arith.constant 0 : index
      %c0_15 = arith.constant 0 : index
      %20 = vector.load %arg10[%c0_14, %c0_15] : memref<16x32xf32, #tpu.memory_space<vmem>>, vector<16x32xf32>
      %21 = arith.addf %20, %10 : vector<16x32xf32>
      %c0_16 = arith.constant 0 : index
      %c0_17 = arith.constant 0 : index
      %22 = vector.load %arg10[%c0_16, %c0_17] : memref<16x32xf32, #tpu.memory_space<vmem>>, vector<16x32xf32>
      tpu.vector_store %arg10[%c0_16, %c0_17], %21 {strides = array<i32>} : memref<16x32xf32, #tpu.memory_space<vmem>>, vector<16x32xf32>,
    } else {
    }
    %c0_i32_12 = arith.constant 0 : i32
    %17 = arith.cmpi eq, %arg1, %c0_i32_12 : i32
    %18 = arith.extui %17 : i1 to i32
    %c0_i32_13 = arith.constant 0 : i32
    %19 = arith.cmpi ne, %18, %c0_i32_13 : i32
    scf.if %19 {
      %20 = arith.extf %0 : vector<16x32xbf16> to vector<16x32xf32>
      %c0_14 = arith.constant 0 : index
      %c0_15 = arith.constant 0 : index
      %21 = vector.load %arg10[%c0_14, %c0_15] : memref<16x32xf32, #tpu.memory_space<vmem>>, vector<16x32xf32>
      %22 = arith.addf %20, %21 : vector<16x32xf32>
      %c0_16 = arith.constant 0 : index
      %c0_17 = arith.constant 0 : index
      %23 = vector.load %arg6[%c0_16, %c0_17] : memref<1x32xf32, #tpu.memory_space<vmem>>, vector<1x32xf32>
      %24 = vector.broadcast %23 : vector<1x32xf32> to vector<16x32xf32>
      %25 = arith.addf %22, %24 : vector<16x32xf32>
      %c0_18 = arith.constant 0 : index
      %c0_19 = arith.constant 0 : index
      %26 = vector.load %arg7[%c0_18, %c0_19] : memref<1x32xf32, #tpu.memory_space<vmem>>, vector<1x32xf32>
      %c0_20 = arith.constant 0 : index
      %c0_21 = arith.constant 0 : index
      %27 = vector.load %arg8[%c0_20, %c0_21] : memref<1x32xf32, #tpu.memory_space<vmem>>, vector<1x32xf32>
      %cst_22 = arith.constant dense<0.000000e+00> : vector<16xf32>
      %28 = vector.multi_reduction <add>, %25, %cst_22 [1] : vector<16x32xf32> to vector<16xf32>
      %29 = vector.shape_cast %28 : vector<16xf32> to vector<16x1xf32>
      %cst_23 = arith.constant 3.200000e+01 : f32
      %30 = vector.broadcast %cst_23 : f32 to vector<16x1xf32>
      %31 = arith.divf %29, %30 : vector<16x1xf32>
      %32 = vector.broadcast %31 : vector<16x1xf32> to vector<16x32xf32>
      %33 = arith.subf %25, %32 : vector<16x32xf32>
      %34 = arith.mulf %33, %33 : vector<16x32xf32>
      %cst_24 = arith.constant dense<0.000000e+00> : vector<16xf32>
      %35 = vector.multi_reduction <add>, %34, %cst_24 [1] : vector<16x32xf32> to vector<16xf32>
      %36 = vector.shape_cast %35 : vector<16xf32> to vector<16x1xf32>
      %cst_25 = arith.constant 3.200000e+01 : f32
      %37 = vector.broadcast %cst_25 : f32 to vector<16x1xf32>
      %38 = arith.divf %36, %37 : vector<16x1xf32>
      %39 = vector.broadcast %31 : vector<16x1xf32> to vector<16x32xf32>
      %40 = arith.subf %25, %39 : vector<16x32xf32>
      %cst_26 = arith.constant 9.99999974E-6 : f32
      %41 = vector.broadcast %cst_26 : f32 to vector<16x1xf32>
      %42 = arith.addf %38, %41 : vector<16x1xf32>
      %43 = math.rsqrt %42 : vector<16x1xf32>
      %44 = vector.broadcast %43 : vector<16x1xf32> to vector<16x32xf32>
      %45 = arith.mulf %40, %44 : vector<16x32xf32>
      %46 = vector.broadcast %26 : vector<1x32xf32> to vector<16x32xf32>
      %47 = arith.mulf %45, %46 : vector<16x32xf32>
      %48 = vector.broadcast %27 : vector<1x32xf32> to vector<16x32xf32>
      %49 = arith.addf %47, %48 : vector<16x32xf32>
      %50 = arith.truncf %49 : vector<16x32xf32> to vector<16x32xbf16>
      %c0_27 = arith.constant 0 : index
      %c0_28 = arith.constant 0 : index
      %51 = vector.load %arg9[%c0_27, %c0_28] : memref<16x32xbf16, #tpu.memory_space<vmem>>, vector<16x32xbf16>
      tpu.vector_store %arg9[%c0_27, %c0_28], %50 {strides = array<i32>} : memref<16x32xbf16, #tpu.memory_space<vmem>>, vector<16x32xbf16>,
    } else {
    }
    return
  }
  func.func @transform_0(%arg0: i32, %arg1: i32) -> (i32, i32) {
    %c0_i32 = arith.constant 0 : i32
    %c0_i32_0 = arith.constant 0 : i32
    return %arg0, %c0_i32 : i32, i32
  }
  func.func @transform_1(%arg0: i32, %arg1: i32) -> (i32, i32) {
    %c0_i32 = arith.constant 0 : i32
    %c0_i32_0 = arith.constant 0 : i32
    return %c0_i32, %arg1 : i32, i32
  }
  func.func @transform_2(%arg0: i32, %arg1: i32) -> (i32, i32) {
    %c0_i32 = arith.constant 0 : i32
    %c0_i32_0 = arith.constant 0 : i32
    return %c0_i32, %arg1 : i32, i32
  }
  func.func @transform_3(%arg0: i32, %arg1: i32) -> (i32, i32) {
    %c0_i32 = arith.constant 0 : i32
    %c0_i32_0 = arith.constant 0 : i32
    return %arg1, %c0_i32 : i32, i32
  }
  func.func @transform_4(%arg0: i32, %arg1: i32) -> (i32, i32) {
    %c0_i32 = arith.constant 0 : i32
    %c0_i32_0 = arith.constant 0 : i32
    %c0_i32_1 = arith.constant 0 : i32
    return %c0_i32, %c0_i32_0 : i32, i32
  }
  func.func @transform_5(%arg0: i32, %arg1: i32) -> (i32, i32) {
    %c0_i32 = arith.constant 0 : i32
    %c0_i32_0 = arith.constant 0 : i32
    %c0_i32_1 = arith.constant 0 : i32
    return %c0_i32, %c0_i32_0 : i32, i32
  }
  func.func @transform_6(%arg0: i32, %arg1: i32) -> (i32, i32) {
    %c0_i32 = arith.constant 0 : i32
    %c0_i32_0 = arith.constant 0 : i32
    %c0_i32_1 = arith.constant 0 : i32
    return %c0_i32, %c0_i32_0 : i32, i32
  }
  func.func @transform_7(%arg0: i32, %arg1: i32) -> (i32, i32) {
    %c0_i32 = arith.constant 0 : i32
    %c0_i32_0 = arith.constant 0 : i32
    return %arg0, %c0_i32 : i32, i32
  }
}

module attributes {stable_mosaic.version = 11 : i64} {
  func.func @_self_attn_block_kernel(%arg0: i32, %arg1: i32, %arg2: memref<1x8x32xbf16, #tpu.memory_space<vmem>>, %arg3: memref<1x1x32xf32, #tpu.memory_space<vmem>>, %arg4: memref<32x96xbf16, #tpu.memory_space<vmem>>, %arg5: memref<1x96xf32, #tpu.memory_space<vmem>>, %arg6: memref<32x32xbf16, #tpu.memory_space<vmem>>, %arg7: memref<1x32xf32, #tpu.memory_space<vmem>>, %arg8: memref<1x32xf32, #tpu.memory_space<vmem>>, %arg9: memref<1x32xf32, #tpu.memory_space<vmem>>, %arg10: memref<1x8x32xbf16, #tpu.memory_space<vmem>>) attributes {dimension_semantics = [#tpu.dimension_semantics<parallel>, #tpu.dimension_semantics<parallel>], iteration_bounds = array<i64: 2, 1>, scalar_prefetch = 0 : i64, scratch_operands = 0 : i64, tpu.core_type = #tpu.core_type<tc>, window_params = [{transform_indices = @transform_0, window_bounds = array<i64: 1, 8, 32>}, {transform_indices = @transform_1, window_bounds = array<i64: 1, 1, 32>}, {pipeline_mode = #tpu.pipeline_mode<synchronous>, transform_indices = @transform_2, window_bounds = array<i64: 32, 96>}, {pipeline_mode = #tpu.pipeline_mode<synchronous>, transform_indices = @transform_3, window_bounds = array<i64: 1, 96>}, {pipeline_mode = #tpu.pipeline_mode<synchronous>, transform_indices = @transform_4, window_bounds = array<i64: 32, 32>}, {pipeline_mode = #tpu.pipeline_mode<synchronous>, transform_indices = @transform_5, window_bounds = array<i64: 1, 32>}, {pipeline_mode = #tpu.pipeline_mode<synchronous>, transform_indices = @transform_6, window_bounds = array<i64: 1, 32>}, {pipeline_mode = #tpu.pipeline_mode<synchronous>, transform_indices = @transform_7, window_bounds = array<i64: 1, 32>}, {transform_indices = @transform_8, window_bounds = array<i64: 1, 8, 32>}]} {
    %c0 = arith.constant 0 : index
    %c0_0 = arith.constant 0 : index
    %c0_1 = arith.constant 0 : index
    %0 = vector.load %arg3[%c0, %c0_0, %c0_1] : memref<1x1x32xf32, #tpu.memory_space<vmem>>, vector<1x1x32xf32>
    %1 = vector.shape_cast %0 : vector<1x1x32xf32> to vector<1x32xf32>
    %c0_2 = arith.constant 0 : index
    %c0_3 = arith.constant 0 : index
    %c0_4 = arith.constant 0 : index
    %2 = vector.load %arg2[%c0_2, %c0_3, %c0_4] : memref<1x8x32xbf16, #tpu.memory_space<vmem>>, vector<1x8x32xbf16>
    %3 = vector.shape_cast %2 : vector<1x8x32xbf16> to vector<8x32xbf16>
    %4 = arith.extf %3 : vector<8x32xbf16> to vector<8x32xf32>
    %5 = vector.broadcast %1 : vector<1x32xf32> to vector<8x32xf32>
    %6 = arith.addf %4, %5 : vector<8x32xf32>
    %7 = arith.truncf %6 : vector<8x32xf32> to vector<8x32xbf16>
    %c0_5 = arith.constant 0 : index
    %c0_6 = arith.constant 0 : index
    %8 = vector.load %arg4[%c0_5, %c0_6] : memref<32x96xbf16, #tpu.memory_space<vmem>>, vector<32x96xbf16>
    %cst = arith.constant dense<0.000000e+00> : vector<8x96xf32>
    %9 = tpu.matmul %7, %8, %cst {dimension_numbers = #tpu.dot_dimension_numbers<[1], [0], [0], [1], [0, 0, 1, 1], [], []>} : vector<8x32xbf16>, vector<32x96xbf16>, vector<8x96xf32> -> vector<8x96xf32>
    %c0_7 = arith.constant 0 : index
    %c0_8 = arith.constant 0 : index
    %10 = vector.load %arg5[%c0_7, %c0_8] : memref<1x96xf32, #tpu.memory_space<vmem>>, vector<1x96xf32>
    %11 = vector.broadcast %10 : vector<1x96xf32> to vector<8x96xf32>
    %12 = arith.addf %9, %11 : vector<8x96xf32>
    %13 = arith.truncf %12 : vector<8x96xf32> to vector<8x96xbf16>
    %14 = vector.extract_strided_slice %13 {offsets = [0, 0], sizes = [8, 32], strides = [1, 1]} : vector<8x96xbf16> to vector<8x32xbf16>
    %15 = vector.extract_strided_slice %13 {offsets = [0, 32], sizes = [8, 64], strides = [1, 1]} : vector<8x96xbf16> to vector<8x64xbf16>
    %c8_i32 = arith.constant 8 : i32
    %16 = arith.muli %arg1, %c8_i32 : i32
    %17 = tpu.iota {dimensions = array<i32: 0>} : vector<8x8xi32>
    %18 = vector.broadcast %16 : i32 to vector<8x8xi32>
    %19 = arith.addi %18, %17 : vector<8x8xi32>
    %20 = tpu.iota {dimensions = array<i32: 1>} : vector<8x8xi32>
    %21 = arith.cmpi sgt, %20, %19 : vector<8x8xi32>
    %cst_9 = arith.constant -1.000000e+30 : f32
    %cst_10 = arith.constant 0.000000e+00 : f32
    %22 = vector.broadcast %cst_9 : f32 to vector<8x8xf32>
    %23 = vector.broadcast %cst_10 : f32 to vector<8x8xf32>
    %24 = arith.select %21, %22, %23 : vector<8x8xi1>, vector<8x8xf32>
    %c0_11 = arith.constant 0 : index
    %c0_12 = arith.constant 0 : index
    %25 = vector.load %arg6[%c0_11, %c0_12] : memref<32x32xbf16, #tpu.memory_space<vmem>>, vector<32x32xbf16>
    %c0_13 = arith.constant 0 : index
    %c0_14 = arith.constant 0 : index
    %26 = vector.load %arg7[%c0_13, %c0_14] : memref<1x32xf32, #tpu.memory_space<vmem>>, vector<1x32xf32>
    %27 = vector.extract_strided_slice %14 {offsets = [0, 0], sizes = [8, 8], strides = [1, 1]} : vector<8x32xbf16> to vector<8x8xbf16>
    %28 = vector.extract_strided_slice %15 {offsets = [0, 0], sizes = [8, 8], strides = [1, 1]} : vector<8x64xbf16> to vector<8x8xbf16>
    %29 = vector.extract_strided_slice %15 {offsets = [0, 32], sizes = [8, 8], strides = [1, 1]} : vector<8x64xbf16> to vector<8x8xbf16>
    %cst_15 = arith.constant dense<0.000000e+00> : vector<8x8xf32>
    %30 = tpu.matmul %27, %28, %cst_15 {dimension_numbers = #tpu.dot_dimension_numbers<[1], [1], [0], [0], [0, 0, 1, 0], [], []>} : vector<8x8xbf16>, vector<8x8xbf16>, vector<8x8xf32> -> vector<8x8xf32>
    %31 = arith.addf %30, %24 : vector<8x8xf32>
    %cst_16 = arith.constant dense<0xFF800000> : vector<8xf32>
    %32 = vector.multi_reduction <maximumf>, %31, %cst_16 [1] : vector<8x8xf32> to vector<8xf32>
    %33 = vector.shape_cast %32 : vector<8xf32> to vector<8x1xf32>
    %34 = vector.broadcast %33 : vector<8x1xf32> to vector<8x8xf32>
    %35 = arith.subf %31, %34 : vector<8x8xf32>
    %36 = math.exp %35 : vector<8x8xf32>
    %cst_17 = arith.constant dense<0.000000e+00> : vector<8xf32>
    %37 = vector.multi_reduction <add>, %36, %cst_17 [1] : vector<8x8xf32> to vector<8xf32>
    %38 = vector.shape_cast %37 : vector<8xf32> to vector<8x1xf32>
    %39 = arith.truncf %36 : vector<8x8xf32> to vector<8x8xbf16>
    %cst_18 = arith.constant dense<0.000000e+00> : vector<8x8xf32>
    %40 = tpu.matmul %39, %29, %cst_18 {dimension_numbers = #tpu.dot_dimension_numbers<[1], [0], [0], [1], [0, 0, 1, 1], [], []>} : vector<8x8xbf16>, vector<8x8xbf16>, vector<8x8xf32> -> vector<8x8xf32>
    %41 = tpu.reciprocal %38 {approx = true} : vector<8x1xf32> -> vector<8x1xf32>
    %42 = vector.broadcast %41 : vector<8x1xf32> to vector<8x8xf32>
    %43 = arith.mulf %40, %42 : vector<8x8xf32>
    %44 = arith.truncf %43 : vector<8x8xf32> to vector<8x8xbf16>
    %45 = vector.extract_strided_slice %25 {offsets = [0, 0], sizes = [8, 32], strides = [1, 1]} : vector<32x32xbf16> to vector<8x32xbf16>
    %cst_19 = arith.constant dense<0.000000e+00> : vector<8x32xf32>
    %46 = tpu.matmul %44, %45, %cst_19 {dimension_numbers = #tpu.dot_dimension_numbers<[1], [0], [0], [1], [0, 0, 1, 1], [], []>} : vector<8x8xbf16>, vector<8x32xbf16>, vector<8x32xf32> -> vector<8x32xf32>
    %47 = vector.extract_strided_slice %14 {offsets = [0, 8], sizes = [8, 8], strides = [1, 1]} : vector<8x32xbf16> to vector<8x8xbf16>
    %48 = vector.extract_strided_slice %15 {offsets = [0, 8], sizes = [8, 8], strides = [1, 1]} : vector<8x64xbf16> to vector<8x8xbf16>
    %49 = vector.extract_strided_slice %15 {offsets = [0, 40], sizes = [8, 8], strides = [1, 1]} : vector<8x64xbf16> to vector<8x8xbf16>
    %cst_20 = arith.constant dense<0.000000e+00> : vector<8x8xf32>
    %50 = tpu.matmul %47, %48, %cst_20 {dimension_numbers = #tpu.dot_dimension_numbers<[1], [1], [0], [0], [0, 0, 1, 0], [], []>} : vector<8x8xbf16>, vector<8x8xbf16>, vector<8x8xf32> -> vector<8x8xf32>
    %51 = arith.addf %50, %24 : vector<8x8xf32>
    %cst_21 = arith.constant dense<0xFF800000> : vector<8xf32>
    %52 = vector.multi_reduction <maximumf>, %51, %cst_21 [1] : vector<8x8xf32> to vector<8xf32>
    %53 = vector.shape_cast %52 : vector<8xf32> to vector<8x1xf32>
    %54 = vector.broadcast %53 : vector<8x1xf32> to vector<8x8xf32>
    %55 = arith.subf %51, %54 : vector<8x8xf32>
    %56 = math.exp %55 : vector<8x8xf32>
    %cst_22 = arith.constant dense<0.000000e+00> : vector<8xf32>
    %57 = vector.multi_reduction <add>, %56, %cst_22 [1] : vector<8x8xf32> to vector<8xf32>
    %58 = vector.shape_cast %57 : vector<8xf32> to vector<8x1xf32>
    %59 = arith.truncf %56 : vector<8x8xf32> to vector<8x8xbf16>
    %cst_23 = arith.constant dense<0.000000e+00> : vector<8x8xf32>
    %60 = tpu.matmul %59, %49, %cst_23 {dimension_numbers = #tpu.dot_dimension_numbers<[1], [0], [0], [1], [0, 0, 1, 1], [], []>} : vector<8x8xbf16>, vector<8x8xbf16>, vector<8x8xf32> -> vector<8x8xf32>
    %61 = tpu.reciprocal %58 {approx = true} : vector<8x1xf32> -> vector<8x1xf32>
    %62 = vector.broadcast %61 : vector<8x1xf32> to vector<8x8xf32>
    %63 = arith.mulf %60, %62 : vector<8x8xf32>
    %64 = arith.truncf %63 : vector<8x8xf32> to vector<8x8xbf16>
    %65 = vector.extract_strided_slice %25 {offsets = [8, 0], sizes = [8, 32], strides = [1, 1]} : vector<32x32xbf16> to vector<8x32xbf16>
    %cst_24 = arith.constant dense<0.000000e+00> : vector<8x32xf32>
    %66 = tpu.matmul %64, %65, %cst_24 {dimension_numbers = #tpu.dot_dimension_numbers<[1], [0], [0], [1], [0, 0, 1, 1], [], []>} : vector<8x8xbf16>, vector<8x32xbf16>, vector<8x32xf32> -> vector<8x32xf32>
    %67 = arith.addf %46, %66 : vector<8x32xf32>
    %68 = vector.extract_strided_slice %14 {offsets = [0, 16], sizes = [8, 8], strides = [1, 1]} : vector<8x32xbf16> to vector<8x8xbf16>
    %69 = vector.extract_strided_slice %15 {offsets = [0, 16], sizes = [8, 8], strides = [1, 1]} : vector<8x64xbf16> to vector<8x8xbf16>
    %70 = vector.extract_strided_slice %15 {offsets = [0, 48], sizes = [8, 8], strides = [1, 1]} : vector<8x64xbf16> to vector<8x8xbf16>
    %cst_25 = arith.constant dense<0.000000e+00> : vector<8x8xf32>
    %71 = tpu.matmul %68, %69, %cst_25 {dimension_numbers = #tpu.dot_dimension_numbers<[1], [1], [0], [0], [0, 0, 1, 0], [], []>} : vector<8x8xbf16>, vector<8x8xbf16>, vector<8x8xf32> -> vector<8x8xf32>
    %72 = arith.addf %71, %24 : vector<8x8xf32>
    %cst_26 = arith.constant dense<0xFF800000> : vector<8xf32>
    %73 = vector.multi_reduction <maximumf>, %72, %cst_26 [1] : vector<8x8xf32> to vector<8xf32>
    %74 = vector.shape_cast %73 : vector<8xf32> to vector<8x1xf32>
    %75 = vector.broadcast %74 : vector<8x1xf32> to vector<8x8xf32>
    %76 = arith.subf %72, %75 : vector<8x8xf32>
    %77 = math.exp %76 : vector<8x8xf32>
    %cst_27 = arith.constant dense<0.000000e+00> : vector<8xf32>
    %78 = vector.multi_reduction <add>, %77, %cst_27 [1] : vector<8x8xf32> to vector<8xf32>
    %79 = vector.shape_cast %78 : vector<8xf32> to vector<8x1xf32>
    %80 = arith.truncf %77 : vector<8x8xf32> to vector<8x8xbf16>
    %cst_28 = arith.constant dense<0.000000e+00> : vector<8x8xf32>
    %81 = tpu.matmul %80, %70, %cst_28 {dimension_numbers = #tpu.dot_dimension_numbers<[1], [0], [0], [1], [0, 0, 1, 1], [], []>} : vector<8x8xbf16>, vector<8x8xbf16>, vector<8x8xf32> -> vector<8x8xf32>
    %82 = tpu.reciprocal %79 {approx = true} : vector<8x1xf32> -> vector<8x1xf32>
    %83 = vector.broadcast %82 : vector<8x1xf32> to vector<8x8xf32>
    %84 = arith.mulf %81, %83 : vector<8x8xf32>
    %85 = arith.truncf %84 : vector<8x8xf32> to vector<8x8xbf16>
    %86 = vector.extract_strided_slice %25 {offsets = [16, 0], sizes = [8, 32], strides = [1, 1]} : vector<32x32xbf16> to vector<8x32xbf16>
    %cst_29 = arith.constant dense<0.000000e+00> : vector<8x32xf32>
    %87 = tpu.matmul %85, %86, %cst_29 {dimension_numbers = #tpu.dot_dimension_numbers<[1], [0], [0], [1], [0, 0, 1, 1], [], []>} : vector<8x8xbf16>, vector<8x32xbf16>, vector<8x32xf32> -> vector<8x32xf32>
    %88 = arith.addf %67, %87 : vector<8x32xf32>
    %89 = vector.extract_strided_slice %14 {offsets = [0, 24], sizes = [8, 8], strides = [1, 1]} : vector<8x32xbf16> to vector<8x8xbf16>
    %90 = vector.extract_strided_slice %15 {offsets = [0, 24], sizes = [8, 8], strides = [1, 1]} : vector<8x64xbf16> to vector<8x8xbf16>
    %91 = vector.extract_strided_slice %15 {offsets = [0, 56], sizes = [8, 8], strides = [1, 1]} : vector<8x64xbf16> to vector<8x8xbf16>
    %cst_30 = arith.constant dense<0.000000e+00> : vector<8x8xf32>
    %92 = tpu.matmul %89, %90, %cst_30 {dimension_numbers = #tpu.dot_dimension_numbers<[1], [1], [0], [0], [0, 0, 1, 0], [], []>} : vector<8x8xbf16>, vector<8x8xbf16>, vector<8x8xf32> -> vector<8x8xf32>
    %93 = arith.addf %92, %24 : vector<8x8xf32>
    %cst_31 = arith.constant dense<0xFF800000> : vector<8xf32>
    %94 = vector.multi_reduction <maximumf>, %93, %cst_31 [1] : vector<8x8xf32> to vector<8xf32>
    %95 = vector.shape_cast %94 : vector<8xf32> to vector<8x1xf32>
    %96 = vector.broadcast %95 : vector<8x1xf32> to vector<8x8xf32>
    %97 = arith.subf %93, %96 : vector<8x8xf32>
    %98 = math.exp %97 : vector<8x8xf32>
    %cst_32 = arith.constant dense<0.000000e+00> : vector<8xf32>
    %99 = vector.multi_reduction <add>, %98, %cst_32 [1] : vector<8x8xf32> to vector<8xf32>
    %100 = vector.shape_cast %99 : vector<8xf32> to vector<8x1xf32>
    %101 = arith.truncf %98 : vector<8x8xf32> to vector<8x8xbf16>
    %cst_33 = arith.constant dense<0.000000e+00> : vector<8x8xf32>
    %102 = tpu.matmul %101, %91, %cst_33 {dimension_numbers = #tpu.dot_dimension_numbers<[1], [0], [0], [1], [0, 0, 1, 1], [], []>} : vector<8x8xbf16>, vector<8x8xbf16>, vector<8x8xf32> -> vector<8x8xf32>
    %103 = tpu.reciprocal %100 {approx = true} : vector<8x1xf32> -> vector<8x1xf32>
    %104 = vector.broadcast %103 : vector<8x1xf32> to vector<8x8xf32>
    %105 = arith.mulf %102, %104 : vector<8x8xf32>
    %106 = arith.truncf %105 : vector<8x8xf32> to vector<8x8xbf16>
    %107 = vector.extract_strided_slice %25 {offsets = [24, 0], sizes = [8, 32], strides = [1, 1]} : vector<32x32xbf16> to vector<8x32xbf16>
    %cst_34 = arith.constant dense<0.000000e+00> : vector<8x32xf32>
    %108 = tpu.matmul %106, %107, %cst_34 {dimension_numbers = #tpu.dot_dimension_numbers<[1], [0], [0], [1], [0, 0, 1, 1], [], []>} : vector<8x8xbf16>, vector<8x32xbf16>, vector<8x32xf32> -> vector<8x32xf32>
    %109 = arith.addf %88, %108 : vector<8x32xf32>
    %110 = vector.broadcast %26 : vector<1x32xf32> to vector<8x32xf32>
    %111 = arith.addf %109, %110 : vector<8x32xf32>
    %112 = arith.addf %6, %111 : vector<8x32xf32>
    %c0_35 = arith.constant 0 : index
    %c0_36 = arith.constant 0 : index
    %113 = vector.load %arg8[%c0_35, %c0_36] : memref<1x32xf32, #tpu.memory_space<vmem>>, vector<1x32xf32>
    %c0_37 = arith.constant 0 : index
    %c0_38 = arith.constant 0 : index
    %114 = vector.load %arg9[%c0_37, %c0_38] : memref<1x32xf32, #tpu.memory_space<vmem>>, vector<1x32xf32>
    %cst_39 = arith.constant dense<0.000000e+00> : vector<8xf32>
    %115 = vector.multi_reduction <add>, %112, %cst_39 [1] : vector<8x32xf32> to vector<8xf32>
    %116 = vector.shape_cast %115 : vector<8xf32> to vector<8x1xf32>
    %cst_40 = arith.constant 3.200000e+01 : f32
    %117 = vector.broadcast %cst_40 : f32 to vector<8x1xf32>
    %118 = arith.divf %116, %117 : vector<8x1xf32>
    %119 = vector.broadcast %118 : vector<8x1xf32> to vector<8x32xf32>
    %120 = arith.subf %112, %119 : vector<8x32xf32>
    %121 = arith.mulf %120, %120 : vector<8x32xf32>
    %cst_41 = arith.constant dense<0.000000e+00> : vector<8xf32>
    %122 = vector.multi_reduction <add>, %121, %cst_41 [1] : vector<8x32xf32> to vector<8xf32>
    %123 = vector.shape_cast %122 : vector<8xf32> to vector<8x1xf32>
    %cst_42 = arith.constant 3.200000e+01 : f32
    %124 = vector.broadcast %cst_42 : f32 to vector<8x1xf32>
    %125 = arith.divf %123, %124 : vector<8x1xf32>
    %126 = vector.broadcast %118 : vector<8x1xf32> to vector<8x32xf32>
    %127 = arith.subf %112, %126 : vector<8x32xf32>
    %cst_43 = arith.constant 9.99999974E-6 : f32
    %128 = vector.broadcast %cst_43 : f32 to vector<8x1xf32>
    %129 = arith.addf %125, %128 : vector<8x1xf32>
    %130 = math.rsqrt %129 : vector<8x1xf32>
    %131 = vector.broadcast %130 : vector<8x1xf32> to vector<8x32xf32>
    %132 = arith.mulf %127, %131 : vector<8x32xf32>
    %133 = vector.broadcast %113 : vector<1x32xf32> to vector<8x32xf32>
    %134 = arith.mulf %132, %133 : vector<8x32xf32>
    %135 = vector.broadcast %114 : vector<1x32xf32> to vector<8x32xf32>
    %136 = arith.addf %134, %135 : vector<8x32xf32>
    %137 = arith.truncf %136 : vector<8x32xf32> to vector<8x32xbf16>
    %c0_44 = arith.constant 0 : index
    %c0_45 = arith.constant 0 : index
    %c0_46 = arith.constant 0 : index
    %138 = vector.load %arg10[%c0_44, %c0_45, %c0_46] : memref<1x8x32xbf16, #tpu.memory_space<vmem>>, vector<1x8x32xbf16>
    %139 = vector.shape_cast %138 : vector<1x8x32xbf16> to vector<8x32xbf16>
    %140 = vector.shape_cast %137 : vector<8x32xbf16> to vector<1x8x32xbf16>
    tpu.vector_store %arg10[%c0_44, %c0_45, %c0_46], %140 {strides = array<i32>} : memref<1x8x32xbf16, #tpu.memory_space<vmem>>, vector<1x8x32xbf16>,
    return
  }
  func.func @transform_0(%arg0: i32, %arg1: i32) -> (i32, i32, i32) {
    %c0_i32 = arith.constant 0 : i32
    %c0_i32_0 = arith.constant 0 : i32
    return %arg0, %arg1, %c0_i32 : i32, i32, i32
  }
  func.func @transform_1(%arg0: i32, %arg1: i32) -> (i32, i32, i32) {
    %c0_i32 = arith.constant 0 : i32
    %c0_i32_0 = arith.constant 0 : i32
    %c0_i32_1 = arith.constant 0 : i32
    return %arg0, %c0_i32, %c0_i32_0 : i32, i32, i32
  }
  func.func @transform_2(%arg0: i32, %arg1: i32) -> (i32, i32) {
    %c0_i32 = arith.constant 0 : i32
    %c0_i32_0 = arith.constant 0 : i32
    %c0_i32_1 = arith.constant 0 : i32
    return %c0_i32, %c0_i32_0 : i32, i32
  }
  func.func @transform_3(%arg0: i32, %arg1: i32) -> (i32, i32) {
    %c0_i32 = arith.constant 0 : i32
    %c0_i32_0 = arith.constant 0 : i32
    %c0_i32_1 = arith.constant 0 : i32
    return %c0_i32, %c0_i32_0 : i32, i32
  }
  func.func @transform_4(%arg0: i32, %arg1: i32) -> (i32, i32) {
    %c0_i32 = arith.constant 0 : i32
    %c0_i32_0 = arith.constant 0 : i32
    %c0_i32_1 = arith.constant 0 : i32
    return %c0_i32, %c0_i32_0 : i32, i32
  }
  func.func @transform_5(%arg0: i32, %arg1: i32) -> (i32, i32) {
    %c0_i32 = arith.constant 0 : i32
    %c0_i32_0 = arith.constant 0 : i32
    %c0_i32_1 = arith.constant 0 : i32
    return %c0_i32, %c0_i32_0 : i32, i32
  }
  func.func @transform_6(%arg0: i32, %arg1: i32) -> (i32, i32) {
    %c0_i32 = arith.constant 0 : i32
    %c0_i32_0 = arith.constant 0 : i32
    %c0_i32_1 = arith.constant 0 : i32
    return %c0_i32, %c0_i32_0 : i32, i32
  }
  func.func @transform_7(%arg0: i32, %arg1: i32) -> (i32, i32) {
    %c0_i32 = arith.constant 0 : i32
    %c0_i32_0 = arith.constant 0 : i32
    %c0_i32_1 = arith.constant 0 : i32
    return %c0_i32, %c0_i32_0 : i32, i32
  }
  func.func @transform_8(%arg0: i32, %arg1: i32) -> (i32, i32, i32) {
    %c0_i32 = arith.constant 0 : i32
    %c0_i32_0 = arith.constant 0 : i32
    return %arg0, %arg1, %c0_i32 : i32, i32, i32
  }
}

module attributes {stable_mosaic.version = 11 : i64} {
  func.func @_cross_attn_block_kernel(%arg0: i32, %arg1: i32, %arg2: memref<1x8x32xbf16, #tpu.memory_space<vmem>>, %arg3: memref<1x16x32xbf16, #tpu.memory_space<vmem>>, %arg4: memref<32x32xbf16, #tpu.memory_space<vmem>>, %arg5: memref<1x32xf32, #tpu.memory_space<vmem>>, %arg6: memref<32x64xbf16, #tpu.memory_space<vmem>>, %arg7: memref<1x64xf32, #tpu.memory_space<vmem>>, %arg8: memref<32x32xbf16, #tpu.memory_space<vmem>>, %arg9: memref<1x32xf32, #tpu.memory_space<vmem>>, %arg10: memref<1x32xf32, #tpu.memory_space<vmem>>, %arg11: memref<1x32xf32, #tpu.memory_space<vmem>>, %arg12: memref<1x8x32xbf16, #tpu.memory_space<vmem>>) attributes {dimension_semantics = [#tpu.dimension_semantics<parallel>, #tpu.dimension_semantics<parallel>], iteration_bounds = array<i64: 2, 1>, scalar_prefetch = 0 : i64, scratch_operands = 0 : i64, tpu.core_type = #tpu.core_type<tc>, window_params = [{transform_indices = @transform_0, window_bounds = array<i64: 1, 8, 32>}, {transform_indices = @transform_1, window_bounds = array<i64: 1, 16, 32>}, {pipeline_mode = #tpu.pipeline_mode<synchronous>, transform_indices = @transform_2, window_bounds = array<i64: 32, 32>}, {pipeline_mode = #tpu.pipeline_mode<synchronous>, transform_indices = @transform_3, window_bounds = array<i64: 1, 32>}, {pipeline_mode = #tpu.pipeline_mode<synchronous>, transform_indices = @transform_4, window_bounds = array<i64: 32, 64>}, {pipeline_mode = #tpu.pipeline_mode<synchronous>, transform_indices = @transform_5, window_bounds = array<i64: 1, 64>}, {pipeline_mode = #tpu.pipeline_mode<synchronous>, transform_indices = @transform_6, window_bounds = array<i64: 32, 32>}, {pipeline_mode = #tpu.pipeline_mode<synchronous>, transform_indices = @transform_7, window_bounds = array<i64: 1, 32>}, {pipeline_mode = #tpu.pipeline_mode<synchronous>, transform_indices = @transform_8, window_bounds = array<i64: 1, 32>}, {pipeline_mode = #tpu.pipeline_mode<synchronous>, transform_indices = @transform_9, window_bounds = array<i64: 1, 32>}, {transform_indices = @transform_10, window_bounds = array<i64: 1, 8, 32>}]} {
    %c0 = arith.constant 0 : index
    %c0_0 = arith.constant 0 : index
    %c0_1 = arith.constant 0 : index
    %0 = vector.load %arg2[%c0, %c0_0, %c0_1] : memref<1x8x32xbf16, #tpu.memory_space<vmem>>, vector<1x8x32xbf16>
    %1 = vector.shape_cast %0 : vector<1x8x32xbf16> to vector<8x32xbf16>
    %2 = arith.extf %1 : vector<8x32xbf16> to vector<8x32xf32>
    %c0_2 = arith.constant 0 : index
    %c0_3 = arith.constant 0 : index
    %3 = vector.load %arg4[%c0_2, %c0_3] : memref<32x32xbf16, #tpu.memory_space<vmem>>, vector<32x32xbf16>
    %cst = arith.constant dense<0.000000e+00> : vector<8x32xf32>
    %4 = tpu.matmul %1, %3, %cst {dimension_numbers = #tpu.dot_dimension_numbers<[1], [0], [0], [1], [0, 0, 1, 1], [], []>} : vector<8x32xbf16>, vector<32x32xbf16>, vector<8x32xf32> -> vector<8x32xf32>
    %c0_4 = arith.constant 0 : index
    %c0_5 = arith.constant 0 : index
    %5 = vector.load %arg5[%c0_4, %c0_5] : memref<1x32xf32, #tpu.memory_space<vmem>>, vector<1x32xf32>
    %6 = vector.broadcast %5 : vector<1x32xf32> to vector<8x32xf32>
    %7 = arith.addf %4, %6 : vector<8x32xf32>
    %8 = arith.truncf %7 : vector<8x32xf32> to vector<8x32xbf16>
    %c0_6 = arith.constant 0 : index
    %c0_7 = arith.constant 0 : index
    %c0_8 = arith.constant 0 : index
    %9 = vector.load %arg3[%c0_6, %c0_7, %c0_8] : memref<1x16x32xbf16, #tpu.memory_space<vmem>>, vector<1x16x32xbf16>
    %10 = vector.shape_cast %9 : vector<1x16x32xbf16> to vector<16x32xbf16>
    %c0_9 = arith.constant 0 : index
    %c0_10 = arith.constant 0 : index
    %11 = vector.load %arg6[%c0_9, %c0_10] : memref<32x64xbf16, #tpu.memory_space<vmem>>, vector<32x64xbf16>
    %cst_11 = arith.constant dense<0.000000e+00> : vector<16x64xf32>
    %12 = tpu.matmul %10, %11, %cst_11 {dimension_numbers = #tpu.dot_dimension_numbers<[1], [0], [0], [1], [0, 0, 1, 1], [], []>} : vector<16x32xbf16>, vector<32x64xbf16>, vector<16x64xf32> -> vector<16x64xf32>
    %c0_12 = arith.constant 0 : index
    %c0_13 = arith.constant 0 : index
    %13 = vector.load %arg7[%c0_12, %c0_13] : memref<1x64xf32, #tpu.memory_space<vmem>>, vector<1x64xf32>
    %14 = vector.broadcast %13 : vector<1x64xf32> to vector<16x64xf32>
    %15 = arith.addf %12, %14 : vector<16x64xf32>
    %16 = arith.truncf %15 : vector<16x64xf32> to vector<16x64xbf16>
    %c0_14 = arith.constant 0 : index
    %c0_15 = arith.constant 0 : index
    %17 = vector.load %arg8[%c0_14, %c0_15] : memref<32x32xbf16, #tpu.memory_space<vmem>>, vector<32x32xbf16>
    %c0_16 = arith.constant 0 : index
    %c0_17 = arith.constant 0 : index
    %18 = vector.load %arg9[%c0_16, %c0_17] : memref<1x32xf32, #tpu.memory_space<vmem>>, vector<1x32xf32>
    %19 = vector.extract_strided_slice %8 {offsets = [0, 0], sizes = [8, 8], strides = [1, 1]} : vector<8x32xbf16> to vector<8x8xbf16>
    %20 = vector.extract_strided_slice %16 {offsets = [0, 0], sizes = [16, 8], strides = [1, 1]} : vector<16x64xbf16> to vector<16x8xbf16>
    %21 = vector.extract_strided_slice %16 {offsets = [0, 32], sizes = [16, 8], strides = [1, 1]} : vector<16x64xbf16> to vector<16x8xbf16>
    %cst_18 = arith.constant dense<0.000000e+00> : vector<8x16xf32>
    %22 = tpu.matmul %19, %20, %cst_18 {dimension_numbers = #tpu.dot_dimension_numbers<[1], [1], [0], [0], [0, 0, 1, 0], [], []>} : vector<8x8xbf16>, vector<16x8xbf16>, vector<8x16xf32> -> vector<8x16xf32>
    %cst_19 = arith.constant dense<0xFF800000> : vector<8xf32>
    %23 = vector.multi_reduction <maximumf>, %22, %cst_19 [1] : vector<8x16xf32> to vector<8xf32>
    %24 = vector.shape_cast %23 : vector<8xf32> to vector<8x1xf32>
    %25 = vector.broadcast %24 : vector<8x1xf32> to vector<8x16xf32>
    %26 = arith.subf %22, %25 : vector<8x16xf32>
    %27 = math.exp %26 : vector<8x16xf32>
    %cst_20 = arith.constant dense<0.000000e+00> : vector<8xf32>
    %28 = vector.multi_reduction <add>, %27, %cst_20 [1] : vector<8x16xf32> to vector<8xf32>
    %29 = vector.shape_cast %28 : vector<8xf32> to vector<8x1xf32>
    %30 = arith.truncf %27 : vector<8x16xf32> to vector<8x16xbf16>
    %cst_21 = arith.constant dense<0.000000e+00> : vector<8x8xf32>
    %31 = tpu.matmul %30, %21, %cst_21 {dimension_numbers = #tpu.dot_dimension_numbers<[1], [0], [0], [1], [0, 0, 1, 1], [], []>} : vector<8x16xbf16>, vector<16x8xbf16>, vector<8x8xf32> -> vector<8x8xf32>
    %32 = tpu.reciprocal %29 {approx = true} : vector<8x1xf32> -> vector<8x1xf32>
    %33 = vector.broadcast %32 : vector<8x1xf32> to vector<8x8xf32>
    %34 = arith.mulf %31, %33 : vector<8x8xf32>
    %35 = arith.truncf %34 : vector<8x8xf32> to vector<8x8xbf16>
    %36 = vector.extract_strided_slice %17 {offsets = [0, 0], sizes = [8, 32], strides = [1, 1]} : vector<32x32xbf16> to vector<8x32xbf16>
    %cst_22 = arith.constant dense<0.000000e+00> : vector<8x32xf32>
    %37 = tpu.matmul %35, %36, %cst_22 {dimension_numbers = #tpu.dot_dimension_numbers<[1], [0], [0], [1], [0, 0, 1, 1], [], []>} : vector<8x8xbf16>, vector<8x32xbf16>, vector<8x32xf32> -> vector<8x32xf32>
    %38 = vector.extract_strided_slice %8 {offsets = [0, 8], sizes = [8, 8], strides = [1, 1]} : vector<8x32xbf16> to vector<8x8xbf16>
    %39 = vector.extract_strided_slice %16 {offsets = [0, 8], sizes = [16, 8], strides = [1, 1]} : vector<16x64xbf16> to vector<16x8xbf16>
    %40 = vector.extract_strided_slice %16 {offsets = [0, 40], sizes = [16, 8], strides = [1, 1]} : vector<16x64xbf16> to vector<16x8xbf16>
    %cst_23 = arith.constant dense<0.000000e+00> : vector<8x16xf32>
    %41 = tpu.matmul %38, %39, %cst_23 {dimension_numbers = #tpu.dot_dimension_numbers<[1], [1], [0], [0], [0, 0, 1, 0], [], []>} : vector<8x8xbf16>, vector<16x8xbf16>, vector<8x16xf32> -> vector<8x16xf32>
    %cst_24 = arith.constant dense<0xFF800000> : vector<8xf32>
    %42 = vector.multi_reduction <maximumf>, %41, %cst_24 [1] : vector<8x16xf32> to vector<8xf32>
    %43 = vector.shape_cast %42 : vector<8xf32> to vector<8x1xf32>
    %44 = vector.broadcast %43 : vector<8x1xf32> to vector<8x16xf32>
    %45 = arith.subf %41, %44 : vector<8x16xf32>
    %46 = math.exp %45 : vector<8x16xf32>
    %cst_25 = arith.constant dense<0.000000e+00> : vector<8xf32>
    %47 = vector.multi_reduction <add>, %46, %cst_25 [1] : vector<8x16xf32> to vector<8xf32>
    %48 = vector.shape_cast %47 : vector<8xf32> to vector<8x1xf32>
    %49 = arith.truncf %46 : vector<8x16xf32> to vector<8x16xbf16>
    %cst_26 = arith.constant dense<0.000000e+00> : vector<8x8xf32>
    %50 = tpu.matmul %49, %40, %cst_26 {dimension_numbers = #tpu.dot_dimension_numbers<[1], [0], [0], [1], [0, 0, 1, 1], [], []>} : vector<8x16xbf16>, vector<16x8xbf16>, vector<8x8xf32> -> vector<8x8xf32>
    %51 = tpu.reciprocal %48 {approx = true} : vector<8x1xf32> -> vector<8x1xf32>
    %52 = vector.broadcast %51 : vector<8x1xf32> to vector<8x8xf32>
    %53 = arith.mulf %50, %52 : vector<8x8xf32>
    %54 = arith.truncf %53 : vector<8x8xf32> to vector<8x8xbf16>
    %55 = vector.extract_strided_slice %17 {offsets = [8, 0], sizes = [8, 32], strides = [1, 1]} : vector<32x32xbf16> to vector<8x32xbf16>
    %cst_27 = arith.constant dense<0.000000e+00> : vector<8x32xf32>
    %56 = tpu.matmul %54, %55, %cst_27 {dimension_numbers = #tpu.dot_dimension_numbers<[1], [0], [0], [1], [0, 0, 1, 1], [], []>} : vector<8x8xbf16>, vector<8x32xbf16>, vector<8x32xf32> -> vector<8x32xf32>
    %57 = arith.addf %37, %56 : vector<8x32xf32>
    %58 = vector.extract_strided_slice %8 {offsets = [0, 16], sizes = [8, 8], strides = [1, 1]} : vector<8x32xbf16> to vector<8x8xbf16>
    %59 = vector.extract_strided_slice %16 {offsets = [0, 16], sizes = [16, 8], strides = [1, 1]} : vector<16x64xbf16> to vector<16x8xbf16>
    %60 = vector.extract_strided_slice %16 {offsets = [0, 48], sizes = [16, 8], strides = [1, 1]} : vector<16x64xbf16> to vector<16x8xbf16>
    %cst_28 = arith.constant dense<0.000000e+00> : vector<8x16xf32>
    %61 = tpu.matmul %58, %59, %cst_28 {dimension_numbers = #tpu.dot_dimension_numbers<[1], [1], [0], [0], [0, 0, 1, 0], [], []>} : vector<8x8xbf16>, vector<16x8xbf16>, vector<8x16xf32> -> vector<8x16xf32>
    %cst_29 = arith.constant dense<0xFF800000> : vector<8xf32>
    %62 = vector.multi_reduction <maximumf>, %61, %cst_29 [1] : vector<8x16xf32> to vector<8xf32>
    %63 = vector.shape_cast %62 : vector<8xf32> to vector<8x1xf32>
    %64 = vector.broadcast %63 : vector<8x1xf32> to vector<8x16xf32>
    %65 = arith.subf %61, %64 : vector<8x16xf32>
    %66 = math.exp %65 : vector<8x16xf32>
    %cst_30 = arith.constant dense<0.000000e+00> : vector<8xf32>
    %67 = vector.multi_reduction <add>, %66, %cst_30 [1] : vector<8x16xf32> to vector<8xf32>
    %68 = vector.shape_cast %67 : vector<8xf32> to vector<8x1xf32>
    %69 = arith.truncf %66 : vector<8x16xf32> to vector<8x16xbf16>
    %cst_31 = arith.constant dense<0.000000e+00> : vector<8x8xf32>
    %70 = tpu.matmul %69, %60, %cst_31 {dimension_numbers = #tpu.dot_dimension_numbers<[1], [0], [0], [1], [0, 0, 1, 1], [], []>} : vector<8x16xbf16>, vector<16x8xbf16>, vector<8x8xf32> -> vector<8x8xf32>
    %71 = tpu.reciprocal %68 {approx = true} : vector<8x1xf32> -> vector<8x1xf32>
    %72 = vector.broadcast %71 : vector<8x1xf32> to vector<8x8xf32>
    %73 = arith.mulf %70, %72 : vector<8x8xf32>
    %74 = arith.truncf %73 : vector<8x8xf32> to vector<8x8xbf16>
    %75 = vector.extract_strided_slice %17 {offsets = [16, 0], sizes = [8, 32], strides = [1, 1]} : vector<32x32xbf16> to vector<8x32xbf16>
    %cst_32 = arith.constant dense<0.000000e+00> : vector<8x32xf32>
    %76 = tpu.matmul %74, %75, %cst_32 {dimension_numbers = #tpu.dot_dimension_numbers<[1], [0], [0], [1], [0, 0, 1, 1], [], []>} : vector<8x8xbf16>, vector<8x32xbf16>, vector<8x32xf32> -> vector<8x32xf32>
    %77 = arith.addf %57, %76 : vector<8x32xf32>
    %78 = vector.extract_strided_slice %8 {offsets = [0, 24], sizes = [8, 8], strides = [1, 1]} : vector<8x32xbf16> to vector<8x8xbf16>
    %79 = vector.extract_strided_slice %16 {offsets = [0, 24], sizes = [16, 8], strides = [1, 1]} : vector<16x64xbf16> to vector<16x8xbf16>
    %80 = vector.extract_strided_slice %16 {offsets = [0, 56], sizes = [16, 8], strides = [1, 1]} : vector<16x64xbf16> to vector<16x8xbf16>
    %cst_33 = arith.constant dense<0.000000e+00> : vector<8x16xf32>
    %81 = tpu.matmul %78, %79, %cst_33 {dimension_numbers = #tpu.dot_dimension_numbers<[1], [1], [0], [0], [0, 0, 1, 0], [], []>} : vector<8x8xbf16>, vector<16x8xbf16>, vector<8x16xf32> -> vector<8x16xf32>
    %cst_34 = arith.constant dense<0xFF800000> : vector<8xf32>
    %82 = vector.multi_reduction <maximumf>, %81, %cst_34 [1] : vector<8x16xf32> to vector<8xf32>
    %83 = vector.shape_cast %82 : vector<8xf32> to vector<8x1xf32>
    %84 = vector.broadcast %83 : vector<8x1xf32> to vector<8x16xf32>
    %85 = arith.subf %81, %84 : vector<8x16xf32>
    %86 = math.exp %85 : vector<8x16xf32>
    %cst_35 = arith.constant dense<0.000000e+00> : vector<8xf32>
    %87 = vector.multi_reduction <add>, %86, %cst_35 [1] : vector<8x16xf32> to vector<8xf32>
    %88 = vector.shape_cast %87 : vector<8xf32> to vector<8x1xf32>
    %89 = arith.truncf %86 : vector<8x16xf32> to vector<8x16xbf16>
    %cst_36 = arith.constant dense<0.000000e+00> : vector<8x8xf32>
    %90 = tpu.matmul %89, %80, %cst_36 {dimension_numbers = #tpu.dot_dimension_numbers<[1], [0], [0], [1], [0, 0, 1, 1], [], []>} : vector<8x16xbf16>, vector<16x8xbf16>, vector<8x8xf32> -> vector<8x8xf32>
    %91 = tpu.reciprocal %88 {approx = true} : vector<8x1xf32> -> vector<8x1xf32>
    %92 = vector.broadcast %91 : vector<8x1xf32> to vector<8x8xf32>
    %93 = arith.mulf %90, %92 : vector<8x8xf32>
    %94 = arith.truncf %93 : vector<8x8xf32> to vector<8x8xbf16>
    %95 = vector.extract_strided_slice %17 {offsets = [24, 0], sizes = [8, 32], strides = [1, 1]} : vector<32x32xbf16> to vector<8x32xbf16>
    %cst_37 = arith.constant dense<0.000000e+00> : vector<8x32xf32>
    %96 = tpu.matmul %94, %95, %cst_37 {dimension_numbers = #tpu.dot_dimension_numbers<[1], [0], [0], [1], [0, 0, 1, 1], [], []>} : vector<8x8xbf16>, vector<8x32xbf16>, vector<8x32xf32> -> vector<8x32xf32>
    %97 = arith.addf %77, %96 : vector<8x32xf32>
    %98 = vector.broadcast %18 : vector<1x32xf32> to vector<8x32xf32>
    %99 = arith.addf %97, %98 : vector<8x32xf32>
    %100 = arith.addf %2, %99 : vector<8x32xf32>
    %c0_38 = arith.constant 0 : index
    %c0_39 = arith.constant 0 : index
    %101 = vector.load %arg10[%c0_38, %c0_39] : memref<1x32xf32, #tpu.memory_space<vmem>>, vector<1x32xf32>
    %c0_40 = arith.constant 0 : index
    %c0_41 = arith.constant 0 : index
    %102 = vector.load %arg11[%c0_40, %c0_41] : memref<1x32xf32, #tpu.memory_space<vmem>>, vector<1x32xf32>
    %cst_42 = arith.constant dense<0.000000e+00> : vector<8xf32>
    %103 = vector.multi_reduction <add>, %100, %cst_42 [1] : vector<8x32xf32> to vector<8xf32>
    %104 = vector.shape_cast %103 : vector<8xf32> to vector<8x1xf32>
    %cst_43 = arith.constant 3.200000e+01 : f32
    %105 = vector.broadcast %cst_43 : f32 to vector<8x1xf32>
    %106 = arith.divf %104, %105 : vector<8x1xf32>
    %107 = vector.broadcast %106 : vector<8x1xf32> to vector<8x32xf32>
    %108 = arith.subf %100, %107 : vector<8x32xf32>
    %109 = arith.mulf %108, %108 : vector<8x32xf32>
    %cst_44 = arith.constant dense<0.000000e+00> : vector<8xf32>
    %110 = vector.multi_reduction <add>, %109, %cst_44 [1] : vector<8x32xf32> to vector<8xf32>
    %111 = vector.shape_cast %110 : vector<8xf32> to vector<8x1xf32>
    %cst_45 = arith.constant 3.200000e+01 : f32
    %112 = vector.broadcast %cst_45 : f32 to vector<8x1xf32>
    %113 = arith.divf %111, %112 : vector<8x1xf32>
    %114 = vector.broadcast %106 : vector<8x1xf32> to vector<8x32xf32>
    %115 = arith.subf %100, %114 : vector<8x32xf32>
    %cst_46 = arith.constant 9.99999974E-6 : f32
    %116 = vector.broadcast %cst_46 : f32 to vector<8x1xf32>
    %117 = arith.addf %113, %116 : vector<8x1xf32>
    %118 = math.rsqrt %117 : vector<8x1xf32>
    %119 = vector.broadcast %118 : vector<8x1xf32> to vector<8x32xf32>
    %120 = arith.mulf %115, %119 : vector<8x32xf32>
    %121 = vector.broadcast %101 : vector<1x32xf32> to vector<8x32xf32>
    %122 = arith.mulf %120, %121 : vector<8x32xf32>
    %123 = vector.broadcast %102 : vector<1x32xf32> to vector<8x32xf32>
    %124 = arith.addf %122, %123 : vector<8x32xf32>
    %125 = arith.truncf %124 : vector<8x32xf32> to vector<8x32xbf16>
    %c0_47 = arith.constant 0 : index
    %c0_48 = arith.constant 0 : index
    %c0_49 = arith.constant 0 : index
    %126 = vector.load %arg12[%c0_47, %c0_48, %c0_49] : memref<1x8x32xbf16, #tpu.memory_space<vmem>>, vector<1x8x32xbf16>
    %127 = vector.shape_cast %126 : vector<1x8x32xbf16> to vector<8x32xbf16>
    %128 = vector.shape_cast %125 : vector<8x32xbf16> to vector<1x8x32xbf16>
    tpu.vector_store %arg12[%c0_47, %c0_48, %c0_49], %128 {strides = array<i32>} : memref<1x8x32xbf16, #tpu.memory_space<vmem>>, vector<1x8x32xbf16>,
    return
  }
  func.func @transform_0(%arg0: i32, %arg1: i32) -> (i32, i32, i32) {
    %c0_i32 = arith.constant 0 : i32
    %c0_i32_0 = arith.constant 0 : i32
    return %arg0, %arg1, %c0_i32 : i32, i32, i32
  }
  func.func @transform_1(%arg0: i32, %arg1: i32) -> (i32, i32, i32) {
    %c0_i32 = arith.constant 0 : i32
    %c0_i32_0 = arith.constant 0 : i32
    %c0_i32_1 = arith.constant 0 : i32
    return %arg0, %c0_i32, %c0_i32_0 : i32, i32, i32
  }
  func.func @transform_2(%arg0: i32, %arg1: i32) -> (i32, i32) {
    %c0_i32 = arith.constant 0 : i32
    %c0_i32_0 = arith.constant 0 : i32
    %c0_i32_1 = arith.constant 0 : i32
    return %c0_i32, %c0_i32_0 : i32, i32
  }
  func.func @transform_3(%arg0: i32, %arg1: i32) -> (i32, i32) {
    %c0_i32 = arith.constant 0 : i32
    %c0_i32_0 = arith.constant 0 : i32
    %c0_i32_1 = arith.constant 0 : i32
    return %c0_i32, %c0_i32_0 : i32, i32
  }
  func.func @transform_4(%arg0: i32, %arg1: i32) -> (i32, i32) {
    %c0_i32 = arith.constant 0 : i32
    %c0_i32_0 = arith.constant 0 : i32
    %c0_i32_1 = arith.constant 0 : i32
    return %c0_i32, %c0_i32_0 : i32, i32
  }
  func.func @transform_5(%arg0: i32, %arg1: i32) -> (i32, i32) {
    %c0_i32 = arith.constant 0 : i32
    %c0_i32_0 = arith.constant 0 : i32
    %c0_i32_1 = arith.constant 0 : i32
    return %c0_i32, %c0_i32_0 : i32, i32
  }
  func.func @transform_6(%arg0: i32, %arg1: i32) -> (i32, i32) {
    %c0_i32 = arith.constant 0 : i32
    %c0_i32_0 = arith.constant 0 : i32
    %c0_i32_1 = arith.constant 0 : i32
    return %c0_i32, %c0_i32_0 : i32, i32
  }
  func.func @transform_7(%arg0: i32, %arg1: i32) -> (i32, i32) {
    %c0_i32 = arith.constant 0 : i32
    %c0_i32_0 = arith.constant 0 : i32
    %c0_i32_1 = arith.constant 0 : i32
    return %c0_i32, %c0_i32_0 : i32, i32
  }
  func.func @transform_8(%arg0: i32, %arg1: i32) -> (i32, i32) {
    %c0_i32 = arith.constant 0 : i32
    %c0_i32_0 = arith.constant 0 : i32
    %c0_i32_1 = arith.constant 0 : i32
    return %c0_i32, %c0_i32_0 : i32, i32
  }
  func.func @transform_9(%arg0: i32, %arg1: i32) -> (i32, i32) {
    %c0_i32 = arith.constant 0 : i32
    %c0_i32_0 = arith.constant 0 : i32
    %c0_i32_1 = arith.constant 0 : i32
    return %c0_i32, %c0_i32_0 : i32, i32
  }
  func.func @transform_10(%arg0: i32, %arg1: i32) -> (i32, i32, i32) {
    %c0_i32 = arith.constant 0 : i32
    %c0_i32_0 = arith.constant 0 : i32
    return %arg0, %arg1, %c0_i32 : i32, i32, i32
  }
}

module attributes {stable_mosaic.version = 11 : i64} {
  func.func @_ffn_block_kernel(%arg0: i32, %arg1: i32, %arg2: memref<16x32xbf16, #tpu.memory_space<vmem>>, %arg3: memref<32x64xbf16, #tpu.memory_space<vmem>>, %arg4: memref<1x64xf32, #tpu.memory_space<vmem>>, %arg5: memref<64x32xbf16, #tpu.memory_space<vmem>>, %arg6: memref<1x32xf32, #tpu.memory_space<vmem>>, %arg7: memref<1x32xf32, #tpu.memory_space<vmem>>, %arg8: memref<1x32xf32, #tpu.memory_space<vmem>>, %arg9: memref<1x32xf32, #tpu.memory_space<vmem>>, %arg10: memref<1x32xf32, #tpu.memory_space<vmem>>, %arg11: memref<16x32xf32, #tpu.memory_space<vmem>>, %arg12: memref<16x32xf32, #tpu.memory_space<vmem>>) attributes {dimension_semantics = [#tpu.dimension_semantics<parallel>, #tpu.dimension_semantics<arbitrary>], iteration_bounds = array<i64: 1, 1>, scalar_prefetch = 0 : i64, scratch_operands = 1 : i64, tpu.core_type = #tpu.core_type<tc>, window_params = [{transform_indices = @transform_0, window_bounds = array<i64: 16, 32>}, {transform_indices = @transform_1, window_bounds = array<i64: 32, 64>}, {transform_indices = @transform_2, window_bounds = array<i64: 1, 64>}, {transform_indices = @transform_3, window_bounds = array<i64: 64, 32>}, {pipeline_mode = #tpu.pipeline_mode<synchronous>, transform_indices = @transform_4, window_bounds = array<i64: 1, 32>}, {pipeline_mode = #tpu.pipeline_mode<synchronous>, transform_indices = @transform_5, window_bounds = array<i64: 1, 32>}, {pipeline_mode = #tpu.pipeline_mode<synchronous>, transform_indices = @transform_6, window_bounds = array<i64: 1, 32>}, {pipeline_mode = #tpu.pipeline_mode<synchronous>, transform_indices = @transform_7, window_bounds = array<i64: 1, 32>}, {pipeline_mode = #tpu.pipeline_mode<synchronous>, transform_indices = @transform_8, window_bounds = array<i64: 1, 32>}, {transform_indices = @transform_9, window_bounds = array<i64: 16, 32>}]} {
    %c0 = arith.constant 0 : index
    %c0_0 = arith.constant 0 : index
    %0 = vector.load %arg2[%c0, %c0_0] : memref<16x32xbf16, #tpu.memory_space<vmem>>, vector<16x32xbf16>
    %c0_1 = arith.constant 0 : index
    %c0_2 = arith.constant 0 : index
    %1 = vector.load %arg3[%c0_1, %c0_2] : memref<32x64xbf16, #tpu.memory_space<vmem>>, vector<32x64xbf16>
    %cst = arith.constant dense<0.000000e+00> : vector<16x64xf32>
    %2 = tpu.matmul %0, %1, %cst {dimension_numbers = #tpu.dot_dimension_numbers<[1], [0], [0], [1], [0, 0, 1, 1], [], []>} : vector<16x32xbf16>, vector<32x64xbf16>, vector<16x64xf32> -> vector<16x64xf32>
    %c0_3 = arith.constant 0 : index
    %c0_4 = arith.constant 0 : index
    %3 = vector.load %arg4[%c0_3, %c0_4] : memref<1x64xf32, #tpu.memory_space<vmem>>, vector<1x64xf32>
    %4 = vector.broadcast %3 : vector<1x64xf32> to vector<16x64xf32>
    %5 = arith.addf %2, %4 : vector<16x64xf32>
    %cst_5 = arith.constant 0.000000e+00 : f32
    %6 = vector.broadcast %cst_5 : f32 to vector<16x64xf32>
    %7 = arith.maximumf %5, %6 : vector<16x64xf32>
    %8 = arith.truncf %7 : vector<16x64xf32> to vector<16x64xbf16>
    %c0_6 = arith.constant 0 : index
    %c0_7 = arith.constant 0 : index
    %9 = vector.load %arg5[%c0_6, %c0_7] : memref<64x32xbf16, #tpu.memory_space<vmem>>, vector<64x32xbf16>
    %cst_8 = arith.constant dense<0.000000e+00> : vector<16x32xf32>
    %10 = tpu.matmul %8, %9, %cst_8 {dimension_numbers = #tpu.dot_dimension_numbers<[1], [0], [0], [1], [0, 0, 1, 1], [], []>} : vector<16x64xbf16>, vector<64x32xbf16>, vector<16x32xf32> -> vector<16x32xf32>
    %c0_i32 = arith.constant 0 : i32
    %11 = arith.cmpi eq, %arg1, %c0_i32 : i32
    %12 = arith.extui %11 : i1 to i32
    %c0_i32_9 = arith.constant 0 : i32
    %13 = arith.cmpi ne, %12, %c0_i32_9 : i32
    scf.if %13 {
      %c0_14 = arith.constant 0 : index
      %c0_15 = arith.constant 0 : index
      %20 = vector.load %arg12[%c0_14, %c0_15] : memref<16x32xf32, #tpu.memory_space<vmem>>, vector<16x32xf32>
      tpu.vector_store %arg12[%c0_14, %c0_15], %10 {strides = array<i32>} : memref<16x32xf32, #tpu.memory_space<vmem>>, vector<16x32xf32>,
    } else {
    }
    %c0_i32_10 = arith.constant 0 : i32
    %14 = arith.cmpi sgt, %arg1, %c0_i32_10 : i32
    %15 = arith.extui %14 : i1 to i32
    %c0_i32_11 = arith.constant 0 : i32
    %16 = arith.cmpi ne, %15, %c0_i32_11 : i32
    scf.if %16 {
      %c0_14 = arith.constant 0 : index
      %c0_15 = arith.constant 0 : index
      %20 = vector.load %arg12[%c0_14, %c0_15] : memref<16x32xf32, #tpu.memory_space<vmem>>, vector<16x32xf32>
      %21 = arith.addf %20, %10 : vector<16x32xf32>
      %c0_16 = arith.constant 0 : index
      %c0_17 = arith.constant 0 : index
      %22 = vector.load %arg12[%c0_16, %c0_17] : memref<16x32xf32, #tpu.memory_space<vmem>>, vector<16x32xf32>
      tpu.vector_store %arg12[%c0_16, %c0_17], %21 {strides = array<i32>} : memref<16x32xf32, #tpu.memory_space<vmem>>, vector<16x32xf32>,
    } else {
    }
    %c0_i32_12 = arith.constant 0 : i32
    %17 = arith.cmpi eq, %arg1, %c0_i32_12 : i32
    %18 = arith.extui %17 : i1 to i32
    %c0_i32_13 = arith.constant 0 : i32
    %19 = arith.cmpi ne, %18, %c0_i32_13 : i32
    scf.if %19 {
      %20 = arith.extf %0 : vector<16x32xbf16> to vector<16x32xf32>
      %c0_14 = arith.constant 0 : index
      %c0_15 = arith.constant 0 : index
      %21 = vector.load %arg12[%c0_14, %c0_15] : memref<16x32xf32, #tpu.memory_space<vmem>>, vector<16x32xf32>
      %22 = arith.addf %20, %21 : vector<16x32xf32>
      %c0_16 = arith.constant 0 : index
      %c0_17 = arith.constant 0 : index
      %23 = vector.load %arg6[%c0_16, %c0_17] : memref<1x32xf32, #tpu.memory_space<vmem>>, vector<1x32xf32>
      %24 = vector.broadcast %23 : vector<1x32xf32> to vector<16x32xf32>
      %25 = arith.addf %22, %24 : vector<16x32xf32>
      %c0_18 = arith.constant 0 : index
      %c0_19 = arith.constant 0 : index
      %26 = vector.load %arg7[%c0_18, %c0_19] : memref<1x32xf32, #tpu.memory_space<vmem>>, vector<1x32xf32>
      %c0_20 = arith.constant 0 : index
      %c0_21 = arith.constant 0 : index
      %27 = vector.load %arg8[%c0_20, %c0_21] : memref<1x32xf32, #tpu.memory_space<vmem>>, vector<1x32xf32>
      %cst_22 = arith.constant dense<0.000000e+00> : vector<16xf32>
      %28 = vector.multi_reduction <add>, %25, %cst_22 [1] : vector<16x32xf32> to vector<16xf32>
      %29 = vector.shape_cast %28 : vector<16xf32> to vector<16x1xf32>
      %cst_23 = arith.constant 3.200000e+01 : f32
      %30 = vector.broadcast %cst_23 : f32 to vector<16x1xf32>
      %31 = arith.divf %29, %30 : vector<16x1xf32>
      %32 = vector.broadcast %31 : vector<16x1xf32> to vector<16x32xf32>
      %33 = arith.subf %25, %32 : vector<16x32xf32>
      %34 = arith.mulf %33, %33 : vector<16x32xf32>
      %cst_24 = arith.constant dense<0.000000e+00> : vector<16xf32>
      %35 = vector.multi_reduction <add>, %34, %cst_24 [1] : vector<16x32xf32> to vector<16xf32>
      %36 = vector.shape_cast %35 : vector<16xf32> to vector<16x1xf32>
      %cst_25 = arith.constant 3.200000e+01 : f32
      %37 = vector.broadcast %cst_25 : f32 to vector<16x1xf32>
      %38 = arith.divf %36, %37 : vector<16x1xf32>
      %39 = vector.broadcast %31 : vector<16x1xf32> to vector<16x32xf32>
      %40 = arith.subf %25, %39 : vector<16x32xf32>
      %cst_26 = arith.constant 9.99999974E-6 : f32
      %41 = vector.broadcast %cst_26 : f32 to vector<16x1xf32>
      %42 = arith.addf %38, %41 : vector<16x1xf32>
      %43 = math.rsqrt %42 : vector<16x1xf32>
      %44 = vector.broadcast %43 : vector<16x1xf32> to vector<16x32xf32>
      %45 = arith.mulf %40, %44 : vector<16x32xf32>
      %46 = vector.broadcast %26 : vector<1x32xf32> to vector<16x32xf32>
      %47 = arith.mulf %45, %46 : vector<16x32xf32>
      %48 = vector.broadcast %27 : vector<1x32xf32> to vector<16x32xf32>
      %49 = arith.addf %47, %48 : vector<16x32xf32>
      %c0_27 = arith.constant 0 : index
      %c0_28 = arith.constant 0 : index
      %50 = vector.load %arg9[%c0_27, %c0_28] : memref<1x32xf32, #tpu.memory_space<vmem>>, vector<1x32xf32>
      %c0_29 = arith.constant 0 : index
      %c0_30 = arith.constant 0 : index
      %51 = vector.load %arg10[%c0_29, %c0_30] : memref<1x32xf32, #tpu.memory_space<vmem>>, vector<1x32xf32>
      %cst_31 = arith.constant dense<0.000000e+00> : vector<16xf32>
      %52 = vector.multi_reduction <add>, %49, %cst_31 [1] : vector<16x32xf32> to vector<16xf32>
      %53 = vector.shape_cast %52 : vector<16xf32> to vector<16x1xf32>
      %cst_32 = arith.constant 3.200000e+01 : f32
      %54 = vector.broadcast %cst_32 : f32 to vector<16x1xf32>
      %55 = arith.divf %53, %54 : vector<16x1xf32>
      %56 = vector.broadcast %55 : vector<16x1xf32> to vector<16x32xf32>
      %57 = arith.subf %49, %56 : vector<16x32xf32>
      %58 = arith.mulf %57, %57 : vector<16x32xf32>
      %cst_33 = arith.constant dense<0.000000e+00> : vector<16xf32>
      %59 = vector.multi_reduction <add>, %58, %cst_33 [1] : vector<16x32xf32> to vector<16xf32>
      %60 = vector.shape_cast %59 : vector<16xf32> to vector<16x1xf32>
      %cst_34 = arith.constant 3.200000e+01 : f32
      %61 = vector.broadcast %cst_34 : f32 to vector<16x1xf32>
      %62 = arith.divf %60, %61 : vector<16x1xf32>
      %63 = vector.broadcast %55 : vector<16x1xf32> to vector<16x32xf32>
      %64 = arith.subf %49, %63 : vector<16x32xf32>
      %cst_35 = arith.constant 9.99999974E-6 : f32
      %65 = vector.broadcast %cst_35 : f32 to vector<16x1xf32>
      %66 = arith.addf %62, %65 : vector<16x1xf32>
      %67 = math.rsqrt %66 : vector<16x1xf32>
      %68 = vector.broadcast %67 : vector<16x1xf32> to vector<16x32xf32>
      %69 = arith.mulf %64, %68 : vector<16x32xf32>
      %70 = vector.broadcast %50 : vector<1x32xf32> to vector<16x32xf32>
      %71 = arith.mulf %69, %70 : vector<16x32xf32>
      %72 = vector.broadcast %51 : vector<1x32xf32> to vector<16x32xf32>
      %73 = arith.addf %71, %72 : vector<16x32xf32>
      %c0_36 = arith.constant 0 : index
      %c0_37 = arith.constant 0 : index
      %74 = vector.load %arg11[%c0_36, %c0_37] : memref<16x32xf32, #tpu.memory_space<vmem>>, vector<16x32xf32>
      tpu.vector_store %arg11[%c0_36, %c0_37], %73 {strides = array<i32>} : memref<16x32xf32, #tpu.memory_space<vmem>>, vector<16x32xf32>,
    } else {
    }
    return
  }
  func.func @transform_0(%arg0: i32, %arg1: i32) -> (i32, i32) {
    %c0_i32 = arith.constant 0 : i32
    %c0_i32_0 = arith.constant 0 : i32
    return %arg0, %c0_i32 : i32, i32
  }
  func.func @transform_1(%arg0: i32, %arg1: i32) -> (i32, i32) {
    %c0_i32 = arith.constant 0 : i32
    %c0_i32_0 = arith.constant 0 : i32
    return %c0_i32, %arg1 : i32, i32
  }
  func.func @transform_2(%arg0: i32, %arg1: i32) -> (i32, i32) {
    %c0_i32 = arith.constant 0 : i32
    %c0_i32_0 = arith.constant 0 : i32
    return %c0_i32, %arg1 : i32, i32
  }
  func.func @transform_3(%arg0: i32, %arg1: i32) -> (i32, i32) {
    %c0_i32 = arith.constant 0 : i32
    %c0_i32_0 = arith.constant 0 : i32
    return %arg1, %c0_i32 : i32, i32
  }
  func.func @transform_4(%arg0: i32, %arg1: i32) -> (i32, i32) {
    %c0_i32 = arith.constant 0 : i32
    %c0_i32_0 = arith.constant 0 : i32
    %c0_i32_1 = arith.constant 0 : i32
    return %c0_i32, %c0_i32_0 : i32, i32
  }
  func.func @transform_5(%arg0: i32, %arg1: i32) -> (i32, i32) {
    %c0_i32 = arith.constant 0 : i32
    %c0_i32_0 = arith.constant 0 : i32
    %c0_i32_1 = arith.constant 0 : i32
    return %c0_i32, %c0_i32_0 : i32, i32
  }
  func.func @transform_6(%arg0: i32, %arg1: i32) -> (i32, i32) {
    %c0_i32 = arith.constant 0 : i32
    %c0_i32_0 = arith.constant 0 : i32
    %c0_i32_1 = arith.constant 0 : i32
    return %c0_i32, %c0_i32_0 : i32, i32
  }
  func.func @transform_7(%arg0: i32, %arg1: i32) -> (i32, i32) {
    %c0_i32 = arith.constant 0 : i32
    %c0_i32_0 = arith.constant 0 : i32
    %c0_i32_1 = arith.constant 0 : i32
    return %c0_i32, %c0_i32_0 : i32, i32
  }
  func.func @transform_8(%arg0: i32, %arg1: i32) -> (i32, i32) {
    %c0_i32 = arith.constant 0 : i32
    %c0_i32_0 = arith.constant 0 : i32
    %c0_i32_1 = arith.constant 0 : i32
    return %c0_i32, %c0_i32_0 : i32, i32
  }
  func.func @transform_9(%arg0: i32, %arg1: i32) -> (i32, i32) {
    %c0_i32 = arith.constant 0 : i32
    %c0_i32_0 = arith.constant 0 : i32
    return %arg0, %c0_i32 : i32, i32
  }
}

</mosaic_0001>

<bundles_post_ra>
// kernel: custom_transformer_decoder.6
= control target key start
LH: loop header
LB: loop body
LE: loop exit
PB: predicated region body
PF: predicated region fallthrough
CT: control target
= control target key end

     0   :  { %13 = vsyncpa [#allocation3], 0  ;;  %s1646_s0 = inlined_call_operand.vmem [shape: bf16[2,8,32], index: 0, kind: input, shape index: {}]   ;;  %s1647_s1 = inlined_call_operand.hbm [shape: f32[2,1,32], index: 1, kind: input, shape index: {}]   ;;  %s1648_s2 = inlined_call_operand.vmem [shape: bf16[32,96], index: 2, kind: input, shape index: {}]   ;;  %s1649_s3 = inlined_call_operand.hbm [shape: f32[1,96], index: 3, kind: input, shape index: {}]   ;;  %s1650_s4 = inlined_call_operand.vmem [shape: bf16[32,32], index: 4, kind: input, shape index: {}]   ;;  %s1651_s5 = inlined_call_operand.hbm [shape: f32[1,32], index: 5, kind: input, shape index: {}]   ;;  %s1652_s6 = inlined_call_operand.hbm [shape: f32[1,32], index: 6, kind: input, shape index: {}]   ;;  %s1653_s7 = inlined_call_operand.hbm [shape: f32[1,32], index: 7, kind: input, shape index: {}]   ;;  %s1654_s8 = inlined_call_operand.vmem [shape: bf16[2,8,32], index: 8, kind: output, shape index: {}]  }
   0x1   :  { %15 = vsyncpa [#allocation3 + $0x1], 0 }
   0x2   :  { %16 = vsyncpa [#allocation5], 0 }
   0x3   :  { %17 = vsyncpa [#allocation8], 0  ;;  %s1420_s27 = smov 0   ;;  %s1422_s28 = smov 0  }
   0x4   :  { %s1424_s29 = smov 0   ;;  %s1426_s30 = smov 0  }
   0x5   :  { %s1428_s9 = smov 0   ;;  %s1430_s10 = smov 0  }
   0x6 LB: > { %s974_s11 = sadd.s32 4294967295, %s1356_s10   ;;  %p976_p0 = scmp.ge.s32.totalorder %s1356_s10, 1  ;;  %s1356_s10 = sphi %s1430_s10, %s23_s10   ;;  %s1352_s9 = sphi %s1428_s9, %s1664_s9   ;;  %s1348_s30 = sphi %s1426_s30, %s1663_s30   ;;  %s1344_s29 = sphi %s1424_s29, %s1662_s29   ;;  %s1340_s28 = sphi %s1422_s28, %s1661_s28   ;;  %s1336_s27 = sphi %s1420_s27, %s1660_s27  }
   0x7   : > { %p1452_p1 = scmp.eq.s32.totalorder %s974_s11, 0  ;;  %p248_p2 = scmp.lt.s32.totalorder %s1356_s10, 3 }
   0x8   : > { %s263_s15 = sshll.u32 %s1649_s3, 4  ;;  %s1358_s17 = smov [#allocation4]   ;;  %s264_s15 = int_to_ptr.hbm [resolvable:$true] %s263_s15 }
   0x9   : > { %p1460_p3 = pnand %p976_p0, %p248_p2  ;;  %s265_s18 = sshll.u32 %s1358_s17, 4  ;;  %s266_s18 = int_to_ptr.vmem [resolvable:$true] %s265_s18 }
   0xa   : > { %s290_s21 = sshll.u32 %s1652_s6, 4  ;;  %s278_s25 = sshll.u32 %s1651_s5, 4  ;;  %s291_s21 = int_to_ptr.hbm [resolvable:$true] %s290_s21  ;;  %s279_s25 = int_to_ptr.hbm [resolvable:$true] %s278_s25 }
   0xb   : > { %p1032_p4 = pneg %p1460_p3  ;;  %s1359_s26 = smov [#allocation7]  }
   0xc   : > { %s292_s11 = sshll.u32 %s1359_s26, 4  ;;  %s302_s17 = sshll.u32 %s1653_s7, 4  ;;  %s293_s11 = int_to_ptr.vmem [resolvable:$true] %s292_s11  ;;  %s303_s17 = int_to_ptr.hbm [resolvable:$true] %s302_s17 }
   0xd   : > { %p1471_p5 = pnand %p1032_p4, %p1452_p1  ;;  %s1360_s19 = smov [#allocation6]  }
   0xe   : > { %s280_s20 = sshll.u32 %s1360_s19, 4  ;;  %s70_s23 = sadd.s32 1, %s1344_s29  ;;  %s281_s20 = int_to_ptr.vmem [resolvable:$true] %s280_s20 }
   0xf   : > { %1035 = dma.hbm_to_vmem [thread:$0]  (!%p1471_p5), %s264_s15, 16, %s266_s18, [#allocation5]  }
  0x10   : > { %1041 = dma.hbm_to_vmem [thread:$0]  (!%p1471_p5), %s291_s21, 16, %s293_s11, [#allocation8]  }
  0x11   : > { %1038 = dma.hbm_to_vmem [thread:$0]  (!%p1471_p5), %s279_s25, 16, %s281_s20, [#allocation5]  }
  0x12   : > { %s1361_s15 = smov [#allocation9]   ;;  %s35_s21 = sadd.s32 1, %s1352_s9 }
  0x13   : > { %s304_s18 = sshll.u32 %s1361_s15, 4  ;;  %p37_p6 = scmp.ge.s32.totalorder %s35_s21, 2  ;;  %s305_s18 = int_to_ptr.vmem [resolvable:$true] %s304_s18 }
  0x14   : > { %1044 = dma.hbm_to_vmem [thread:$0]  (!%p1471_p5), %s303_s17, 16, %s305_s18, [#allocation8]  }
  0x15   : > { %p77_p7 = scmp.ne.s32.totalorder %s1344_s29, %s1340_s28  ;;  %p78_p8 = scmp.eq.s32.totalorder %s1356_s10, 0 }
  0x16   : > { %p83_p9 = scmp.ne.s32.totalorder %s1340_s28, %s1336_s27  ;;  %s1666_s21 = smov (%p37_p6, %s35_s21), 0 }
  0x17   : > { %p1498_p10 = por %p78_p8, %p77_p7  ;;  %s67_s22 = ssub.s32 %s1352_s9, %s1666_s21 }
  0x18   : > { %p1504_p11 = por %p1452_p1, %p83_p9  ;;  %p1053_p12 = scmp.lt.s32.totalorder %s1356_s10, 2 }
  0x19   : > { %p68_p13 = scmp.eq.s32.totalorder %s67_s22, 0  ;;  %s325_s26 = sand.u32 1, %s1344_s29  }
  0x1a   : > { %s331_s14 = scalar_lea.hbm %s1647_s1, %s1352_s9  ;;  %s328_s17 = scalar_lea.vmem [#allocation2], %s325_s26 }
  0x1b   : > { %s1513_s11 = scalar_select %p68_p13, %s1344_s29, %s70_s23  }
  0x1c   : > { %s335_s19 = sshll.u32 %s328_s17, 4  ;;  %s333_s20 = sshll.u32 %s331_s14, 4  ;;  %s336_s19 = int_to_ptr.vmem [resolvable:$true] %s335_s19  ;;  %s334_s20 = int_to_ptr.hbm [resolvable:$true] %s333_s20 }
  0x1d   : > { %p1046_p0 = pnand %p1053_p12, %p1498_p10  ;;  %s326_s15 = scalar_lea.sflag [#allocation3], %s325_s26 }
  0x1e   : > { %344 = sbr.rel (%p1460_p3) target bundleno = 1538 (0x602), region = 52  ;;  %s346_s18 = sand.u32 (!%p1460_p3), 1, %s1340_s28  }
  0x1f   : > { %1048 = dma.hbm_to_vmem [thread:$0]  (!%p1046_p0), %s334_s20, 16, %s336_s19, %s326_s15  }
  0x20   : > { %s347_s23 = scalar_lea.sflag (!%p1460_p3), [#allocation3], %s346_s18  ;;  %s349_s22 = scalar_lea.vmem (!%p1460_p3), [#allocation2], %s346_s18 }
  0x23   : > { %1323 = dma.done.wait (%p1504_p11), %s347_s23, 16  }
  0x24   : > { %1325 = vsyncadd (%p1504_p11), %s347_s23, 4294967280 }
  0x25   : > { %1327 = dma.done.wait (%p1452_p1), [#allocation5], 32  }
  0x26   : > { %1329 = vsyncadd (%p1452_p1), [#allocation5], 4294967264 }
  0x27   : > { %1331 = dma.done.wait (%p1452_p1), [#allocation8], 32  }
  0x28   : > { %1333 = vsyncadd (%p1452_p1), [#allocation8], 4294967264  ;;  %p411_p2 = scmp.lt.s32.totalorder %s1348_s30, 1  ;;  %v1013_v0 = vld [vmem:[%s1648_s2 + $0x8] sm:$0xff]  ;;  %v1123_v2 = vld [vmem:[%s349_s22] ss:$0 sm:$0xff]  ;;  %v473_v28 = vlaneseq }
  0x29   : > { %464 = vmatpush.bf16.msra.mxu0 %v1013_v0  ;;  %v1012_v3 = vld [vmem:[%s1648_s2] sm:$0xff]  ;;  %vm454_vm0 = vcmask 261120   ;;  %s1362_s17 = smov 88   ;;  %s1363_s19 = smov 64   ;;  %vm491_vm1 = vcmask 64512   ;;  %vm526_vm2 = vcmask 1043456  }
  0x2a   : > { %s1668_s30 = smov (!%p411_p2, %s1348_s30), 1  ;;  %v1124_v7 = vld [vmem:[#allocation4] ss:$0 sm:$0xff]  ;;  %s1364_s20 = smov 96   ;;  %v474_v29 = vshrl.u32 %v473_v28, 7  ;;  %v478_v30 = vand.u32 127, %v473_v28 }
  0x2b   : > { %s987_s16 = sshll.u32 %s1668_s30, 2  ;;  %s1365_s15 = smov 120   ;;  %v481_v19 = vld [vmem:[%s1650_s4] sm:$0xf]  ;;  %v1370_v31 = vmov 0.0   ;;  %vm840_vm8 = vcmask 257024  }
  0x2c   : > { %s417_s26 = scalar_lea.vmem %s1646_s0, %s987_s16  ;;  %s1366_s18 = smov 80   ;;  %v626_v24 = vsel %vm526_vm2, %v481_v19, 0  ;;  %vm479_vm3 = vcmp.gt.s32.totalorder %v478_v30, %v474_v29  ;;  %v482_v63 = vld [vmem:[%s1650_s4 + $0x4] sm:$0xf] }
  0x2d   : > { %v427_v1 = vld [vmem:[%s417_s26] sm:$0xf]  ;;  %465 = vmatpush.bf16.msra.mxu0 %v1012_v3  ;;  %s1367_s23 = smov 72   ;;  %s1368_s22 = smov 112   ;;  %v1579_v32 = vsel %vm479_vm3, -1e+30, %v1370_v31 }
  0x2e   : > { %v428_v4 = vunpack.c.l.bf16 %v427_v1  ;;  %s1369_s24 = smov 104   ;;  %s1371_s27 = smov 56   ;;  %v607_v0 = vsel %vm526_vm2, %v482_v63, 0 }
  0x2f   : > { %s1372_s13 = smov 48  }
  0x30   : > { %v1552_v5 = vadd.f32 %v1123_v2, %v428_v4 }
  0x31   : > { %616 = vmatpush.bf16.msrb.mxu0 %v607_v0 }
  0x32   : > { %v433_v6 = vpack.c.bf16 %v1552_v5, %v1552_v5 }
  0x34   : > { %997 = vmatmul.msk.bf16.vlgmr.msra.gmra.mxu0 %vm454_vm0, %v433_v6 }
  0xb1   : > { %v467_v8 = vpop.f32.mrf.mxu0 }
  0xb2   : > { %v468_v9 = vadd.f32 %v1124_v7, %v467_v8 }
  0xb4   : > { %v471_v10 = vpack.c.bf16 %v468_v9, %v468_v9 }
  0xb6   : > { %v487_v11 = vunpack.c.l.b16 %v471_v10 }
  0xb8   : > { %v1557_v12 = vpack.c.b16 %v487_v11, %v487_v11 }
  0xb9   : > { %v469_v13 = vpop.f32.mrf.mxu0 }
  0xba   : > { %548 = vrot.lane.b32.xlu2 %v1557_v12, %s1362_s17  ;;  %521 = vrot.lane.b32.xlu1 %v1557_v12, %s1363_s19  ;;  %s1373_s17 = smov 40  }
  0xbb   : > { %489 = vrot.lane.b32.xlu0 %v1557_v12, %s1364_s20 }
  0xc2   : > { %546 = vrot.lane.b32.xlu2 %v1557_v12, %s1365_s15 }
  0xca   : > { %643 = vrot.lane.b32.xlu2 %v1557_v12, %s1366_s18 }
  0xd2   : > { %720 = vrot.lane.b32.xlu2 %v1557_v12, %s1367_s23 }
  0xda   : > { %641 = vrot.lane.b32.xlu2 %v1557_v12, %s1368_s22 }
  0xe2   : > { %718 = vrot.lane.b32.xlu2 %v1557_v12, %s1369_s24  ;;  %s424_s24 = scalar_lea.vmem %s1654_s8, %s987_s16 }
 0x114   : > { %v549_v14 = vpop.permute.xlu2 %548 }
 0x115   : > { %v554_v15 = vsel %vm491_vm1, %v549_v14, 0 }
 0x116   : > { %563 = vmatpush.bf16.xpose.msra.mxu3 %v554_v15 }
 0x11c   : > { %v547_v16 = vpop.permute.xlu2 %546 }
 0x11d   : > { %1000 = vmatmul.msk.bf16.vlgmr.msra.gmra.mxu3 %vm491_vm1, %v547_v16 }
 0x124   : > { %v644_v17 = vpop.permute.xlu2 %643 }
 0x125   : > { %v649_v18 = vsel %vm491_vm1, %v644_v17, 0 }
 0x126   : > { %658 = vmatpush.bf16.xpose.msrb.mxu3 %v649_v18 }
 0x12c   : > { %v721_v20 = vpop.permute.xlu2 %720  ;;  %v522_v21 = vpop.permute.xlu1 %521 }
 0x12d   : > { %v490_v22 = vpop.permute.xlu0 %489  ;;  %v528_v23 = vsel %vm526_vm2, %v522_v21, 0  ;;  %v726_v27 = vsel %vm491_vm1, %v721_v20, 0 }
 0x12e   : > { %v496_v25 = vsel %vm491_vm1, %v490_v22, 0  ;;  %537 = vmatpush.bf16.msra.mxu2 %v528_v23 }
 0x12f   : > { %505 = vmatpush.bf16.xpose.msra.mxu1 %v496_v25 }
 0x134   : > { %v642_v26 = vpop.permute.xlu2 %641 }
 0x135   : > { %1004 = vmatmul.msk.bf16.vlgmr.msrb.gmra.mxu3 %vm491_vm1, %v642_v26 }
 0x136   : > { %998 = vmatmul.msk.bf16.vlgmr.msra.gmra.mxu1 %vm491_vm1, %v471_v10 }
 0x137   : > { %635 = vmatpush.bf16.msrb.mxu1 %v626_v24 }
 0x13b   : > { %735 = vmatpush.bf16.xpose.msra.mxu1 %v726_v27 }
 0x13c   : > { %v719_v43 = vpop.permute.xlu2 %718 }
 0x1a0   : > { %v565_v33 = vpop.f32.mrf.mxu3 }
 0x1a1   : > { %v566_v34 = vadd.f32 %v565_v33, %v1579_v32 }
 0x1a3   : > { %v569_v35 = vsel %vm491_vm1, %v566_v34, -inf }
 0x1a4   : > { %570 = vmax.xlane.f32.xlu2 %v569_v35 }
 0x1a8   : > { %v567_v36 = vpop.f32.mrf.mxu3 }
 0x1b3   : > { %v507_v37 = vpop.f32.mrf.mxu1 }
 0x1b4   : > { %v508_v38 = vadd.f32 %v507_v37, %v1579_v32 }
 0x1b6   : > { %v511_v39 = vsel %vm491_vm1, %v508_v38, -inf }
 0x1b7   : > { %512 = vmax.xlane.f32.xlu0 %v511_v39 }
 0x1b8   : > { %v660_v40 = vpop.f32.mrf.mxu3 }
 0x1b9   : > { %v661_v55 = vadd.f32 %v660_v40, %v1579_v32 }
 0x1bb   : > { %v509_v41 = vpop.f32.mrf.mxu1  ;;  %v664_v57 = vsel %vm491_vm1, %v661_v55, -inf }
 0x1c0   : > { %v662_v42 = vpop.f32.mrf.mxu3 }
 0x1cb   : > { %579 = vrot.lane.b32.xlu0 %v1557_v12, %s1371_s27 }
 0x1d3   : > { %674 = vrot.lane.b32.xlu0 %v1557_v12, %s1372_s13 }
 0x217   : > { %v571_v44 = vpop.xlane.xlu2 %570 }
 0x218   : > { %v572_v45 = vsub.f32 %v566_v34, %v571_v44  ;;  %v484_v44 = vld [vmem:[%s1650_s4 + $0xc] sm:$0xf] }
 0x21a   : > { %v573_v46 = vmul.f32 1.442695, %v572_v45  ;;  %v779_v45 = vsel %vm526_vm2, %v484_v44, 0 }
 0x21c   : > { %1128 = vpow2.f32 %v573_v46 }
 0x222   : > { %v1129_v47 = vpop.eup %1128 }
 0x223   : > { %v575_v48 = vsel %vm491_vm1, %v1129_v47, 0.0  ;;  %v578_v61 = vpack.c.bf16 %v1129_v47, %v1129_v47 }
 0x224   : > { %576 = vadd.xlane.f32.xlu0 %v575_v48 }
 0x22a   : > { %v513_v49 = vpop.xlane.xlu0 %512 }
 0x22b   : > { %v514_v50 = vsub.f32 %v508_v38, %v513_v49 }
 0x22d   : > { %v515_v51 = vmul.f32 1.442695, %v514_v50 }
 0x22f   : > { %1130 = vpow2.f32 %v515_v51 }
 0x235   : > { %v1131_v52 = vpop.eup %1130 }
 0x236   : > { %v517_v53 = vsel %vm491_vm1, %v1131_v52, 0.0  ;;  %v520_v54 = vpack.c.bf16 %v1131_v52, %v1131_v52 }
 0x237   : > { %518 = vadd.xlane.f32.xlu1 %v517_v53 }
 0x238   : > { %999 = vmatmul.msk.bf16.vlgmr.msra.gmra.mxu2 %vm491_vm1, %v520_v54 }
 0x23d   : > { %v580_v56 = vpop.permute.xlu0 %579 }
 0x23e   : > { %v585_v58 = vsel %vm526_vm2, %v580_v56, 0 }
 0x23f   : > { %665 = vmax.xlane.f32.xlu1 %v664_v57  ;;  %594 = vmatpush.bf16.msrb.mxu2 %v585_v58 }
 0x245   : > { %v675_v59 = vpop.permute.xlu0 %674 }
 0x246   : > { %v680_v60 = vsel %vm526_vm2, %v675_v59, 0 }
 0x247   : > { %689 = vmatpush.bf16.msra.mxu2 %v680_v60 }
 0x248   : > { %1001 = vmatmul.msk.bf16.vlgmr.msrb.gmra.mxu2 %vm491_vm1, %v578_v61 }
 0x24b   : > { %788 = vmatpush.bf16.msrb.mxu2 %v779_v45 }
 0x297   : > { %v577_v11 = vpop.xlane.xlu0 %576 }
 0x2aa   : > { %v519_v62 = vpop.xlane.xlu1 %518 }
 0x2ab   : > { %1132 = vrcp.f32 %v519_v62  ;;  %v1374_v62 = vmov 32.0  }
 0x2b1   : > { %v1133_v4 = vpop.eup %1132 }
 0x2b2   : > { %v666_v1 = vpop.xlane.xlu1 %665 }
 0x2b3   : > { %v667_v2 = vsub.f32 %v661_v55, %v666_v1  ;;  %v1125_v55 = vld [vmem:[#allocation6] ss:$0 sm:$0xff] }
 0x2b5   : > { %v668_v3 = vmul.f32 1.442695, %v667_v2 }
 0x2b7   : > { %1134 = vpow2.f32 %v668_v3 }
 0x2b8   : > { %1136 = vrcp.f32 %v577_v11 }
 0x2bb   : > { %v539_v6 = vpop.f32.mrf.mxu2 }
 0x2bc   : > { %v544_v7 = vmul.f32 %v1133_v4, %v539_v6 }
 0x2bd   : > { %v1135_v8 = vpop.eup %1134 }
 0x2be   : > { %v673_v9 = vpack.c.bf16 %v1135_v8, %v1135_v8  ;;  %v545_v10 = vpack.c.bf16 %v544_v7, %v544_v7  ;;  %v1137_v14 = vpop.eup %1136  ;;  %v670_v30 = vsel %vm491_vm1, %v1135_v8, 0.0 }
 0x2c0   : > { %1003 = vmatmul.msk.bf16.vlgmr.msrb.gmra.mxu1 %vm491_vm1, %v545_v10  ;;  %1005 = vmatmul.msk.bf16.vlgmr.msra.gmra.mxu2 %vm491_vm1, %v673_v9 }
 0x2c3   : > { %v541_v13 = vpop.f32.mrf.mxu2 }
 0x2cb   : > { %v596_v15 = vpop.f32.mrf.mxu2 }
 0x2cc   : > { %v601_v16 = vmul.f32 %v1137_v14, %v596_v15 }
 0x2ce   : > { %v602_v17 = vpack.c.bf16 %v601_v16, %v601_v16 }
 0x2d0   : > { %1002 = vmatmul.msk.bf16.vlgmr.msrb.gmra.mxu0 %vm491_vm1, %v602_v17  ;;  %1007 = vmatmul.msk.bf16.vlgmr.msra.gmra.mxu1 %vm491_vm1, %v719_v43 }
 0x2d3   : > { %v598_v18 = vpop.f32.mrf.mxu2 }
 0x33d   : > { %v637_v19 = vpop.f32.mrf.mxu1 }
 0x343   : > { %v691_v20 = vpop.f32.mrf.mxu2 }
 0x345   : > { %v639_v21 = vpop.f32.mrf.mxu1 }
 0x34b   : > { %v693_v22 = vpop.f32.mrf.mxu2 }
 0x34c   : > { %v1127_v22 = vld [vmem:[#allocation9] ss:$0 sm:$0xff] }
 0x34d   : > { %v618_v23 = vpop.f32.mrf.mxu0  ;;  %v737_v24 = vpop.f32.mrf.mxu1 }
 0x34e   : > { %v638_v25 = vadd.f32 %v637_v19, %v618_v23  ;;  %v738_v26 = vadd.f32 %v737_v24, %v1579_v32 }
 0x350   : > { %v741_v27 = vsel %vm491_vm1, %v738_v26, -inf }
 0x351   : > { %742 = vmax.xlane.f32.xlu1 %v741_v27 }
 0x355   : > { %v620_v28 = vpop.f32.mrf.mxu0  ;;  %v739_v29 = vpop.f32.mrf.mxu1 }
 0x36a   : > { %751 = vrot.lane.b32.xlu1 %v1557_v12, %s1373_s17  ;;  %v483_v12 = vld [vmem:[%s1650_s4 + $0x8] sm:$0xf] }
 0x36b   : > { %v702_v39 = vsel %vm526_vm2, %v483_v12, 0 }
 0x36c   : > { %711 = vmatpush.bf16.msra.mxu0 %v702_v39 }
 0x394   : > { %671 = vadd.xlane.f32.xlu1 %v670_v30 }
 0x3c4   : > { %v743_v31 = vpop.xlane.xlu1 %742 }
 0x3c5   : > { %v744_v33 = vsub.f32 %v738_v26, %v743_v31 }
 0x3c7   : > { %v745_v34 = vmul.f32 1.442695, %v744_v33 }
 0x3c9   : > { %1138 = vpow2.f32 %v745_v34 }
 0x3cf   : > { %v1139_v35 = vpop.eup %1138 }
 0x3d0   : > { %v747_v36 = vsel %vm491_vm1, %v1139_v35, 0.0  ;;  %v750_v38 = vpack.c.bf16 %v1139_v35, %v1139_v35 }
 0x3d1   : > { %748 = vadd.xlane.f32.xlu2 %v747_v36 }
 0x3dc   : > { %v752_v32 = vpop.permute.xlu1 %751 }
 0x3dd   : > { %v757_v37 = vsel %vm526_vm2, %v752_v32, 0 }
 0x3de   : > { %766 = vmatpush.bf16.msra.mxu3 %v757_v37 }
 0x3e1   : > { %1008 = vmatmul.msk.bf16.vlgmr.msra.gmra.mxu3 %vm491_vm1, %v750_v38 }
 0x407   : > { %v672_v40 = vpop.xlane.xlu1 %671 }
 0x408   : > { %1140 = vrcp.f32 %v672_v40 }
 0x40e   : > { %v1141_v41 = vpop.eup %1140 }
 0x40f   : > { %v696_v42 = vmul.f32 %v1141_v41, %v691_v20  ;;  %v1126_v20 = vld [vmem:[#allocation7] ss:$0 sm:$0xff] }
 0x411   : > { %v697_v43 = vpack.c.bf16 %v696_v42, %v696_v42 }
 0x413   : > { %1006 = vmatmul.msk.bf16.vlgmr.msra.gmra.mxu0 %vm491_vm1, %v697_v43 }
 0x444   : > { %v749_v46 = vpop.xlane.xlu2 %748 }
 0x445   : > { %1142 = vrcp.f32 %v749_v46 }
 0x446   : > { %1144 = vrcp.f32 %v1374_v62 }
 0x44b   : > { %v1143_v47 = vpop.eup %1142 }
 0x44c   : > { %v1145_v63 = vpop.eup %1144 }
 0x44d   : > { %v806_v0 = vmul.f32 32.0, %v1145_v63  ;;  %vm810_vm4 = vweird.f32 %v1145_v63 }
 0x44f   : > { %v807_v1 = vsub.f32 1.0, %v806_v0 }
 0x451   : > { %v808_v2 = vmul.f32 %v1145_v63, %v807_v1 }
 0x453   : > { %v809_v3 = vadd.f32 %v1145_v63, %v808_v2 }
 0x455   : > { %v811_v4 = vsel %vm810_vm4, %v1145_v63, %v809_v3 }
 0x464   : > { %v768_v48 = vpop.f32.mrf.mxu3 }
 0x465   : > { %v773_v49 = vmul.f32 %v1143_v47, %v768_v48 }
 0x467   : > { %v774_v50 = vpack.c.bf16 %v773_v49, %v773_v49 }
 0x469   : > { %1009 = vmatmul.msk.bf16.vlgmr.msrb.gmra.mxu2 %vm491_vm1, %v774_v50 }
 0x46c   : > { %v770_v51 = vpop.f32.mrf.mxu3 }
 0x490   : > { %v713_v52 = vpop.f32.mrf.mxu0 }
 0x491   : > { %v717_v53 = vadd.f32 %v713_v52, %v638_v25 }
 0x498   : > { %v715_v54 = vpop.f32.mrf.mxu0 }
 0x4ec   : > { %v790_v56 = vpop.f32.mrf.mxu2 }
 0x4ed   : > { %v794_v57 = vadd.f32 %v790_v56, %v717_v53 }
 0x4ef   : > { %v798_v58 = vadd.f32 %v1125_v55, %v794_v57 }
 0x4f1   : > { %v799_v59 = vadd.f32 %v798_v58, %v1552_v5 }
 0x4f3   : > { %v802_v60 = vsel %vm454_vm0, %v799_v59, 0.0 }
 0x4f4   : > { %v792_v61 = vpop.f32.mrf.mxu2  ;;  %803 = vadd.xlane.f32.xlu2 %v802_v60 }
 0x567   : > { %v804_v6 = vpop.xlane.xlu2 %803 }
 0x568   : > { %v812_v7 = vmul.f32 %v811_v4, %v804_v6 }
 0x56a   : > { %v813_v8 = vsub.f32 %v799_v59, %v812_v7 }
 0x56c   : > { %v814_v9 = vmul.f32 %v813_v8, %v813_v8 }
 0x56e   : > { %v815_v10 = vsel %vm454_vm0, %v814_v9, 0.0 }
 0x56f   : > { %816 = vadd.xlane.f32.xlu2 %v815_v10 }
 0x5e2   : > { %v817_v5 = vpop.xlane.xlu2 %816 }
 0x5e3   : > { %v818_v11 = vmul.f32 %v817_v5, %v811_v4 }
 0x5e5   : > { %v819_v13 = vadd.f32 1e-05, %v818_v11 }
 0x5e7   : > { %1146 = vrsqrt.f32 %v819_v13  ;;  %vm826_vm6 = vweird.f32 %v819_v13 }
 0x5ed   : > { %v1147_v14 = vpop.eup %1146 }
 0x5ee   : > { %v821_v15 = vmul.f32 %v1147_v14, %v819_v13  ;;  %vm827_vm5 = vweird.f32 %v1147_v14 }
 0x5ef   : > { %vm828_vm7 = vmor %vm826_vm6, %vm827_vm5 }
 0x5f0   : > { %v822_v16 = vmul.f32 %v1147_v14, %v821_v15 }
 0x5f2   : > { %v823_v17 = vmul.f32 0.5, %v822_v16 }
 0x5f4   : > { %v824_v18 = vsub.f32 1.5, %v823_v17 }
 0x5f6   : > { %v825_v19 = vmul.f32 %v1147_v14, %v824_v18 }
 0x5f8   : > { %v829_v21 = vsel %vm828_vm7, %v1147_v14, %v825_v19 }
 0x5f9   : > { %v830_v23 = vmul.f32 %v829_v21, %v813_v8 }
 0x5fb   : > { %v834_v24 = vmul.f32 %v1126_v20, %v830_v23 }
 0x5fd   : > { %v838_v25 = vadd.f32 %v1127_v22, %v834_v24 }
 0x5ff   : > { %v839_v26 = vpack.c.bf16 %v838_v25, %v838_v25 }
 0x601   : > { %841 = vst.msk [vmem:[%s424_s24] sm:$0xf] %vm840_vm8, %v839_v26 }
 0x602 PF: > { %s23_s10 = sadd.s32 1, %s1356_s10   ;;  %s1660_s27 = smov %s1340_s28 }
 0x603   : > { %p20_p1 = scmp.ge.s32.totalorder %s23_s10, 4   ;;  %s1661_s28 = smov %s1344_s29 }
 0x604   : > { %s1662_s29 = smov %s1513_s11  ;;  %s1663_s30 = smov %s1352_s9 }
 0x605   : > { %s1664_s9 = smov %s1666_s21  ;;  %22 = sbr.rel (!%p20_p1) target bundleno = 6 (0x6), region = 111 }
 0x60a   :  { %867 = vsyncpa [#allocation3], 1 }
 0x60b   :  { %869 = vsyncpa [#allocation3 + $0x1], 1 }
 0x60c   :  { %870 = vsyncpa [#allocation5], 1 }
 0x60d   :  { %871 = vsyncpa [#allocation8], 1 }

// kernel: custom_transformer_decoder.7
= control target key start
LH: loop header
LB: loop body
LE: loop exit
PB: predicated region body
PF: predicated region fallthrough
CT: control target
= control target key end

     0   :  { %s1659_s0 = inlined_call_operand.vmem [shape: bf16[2,8,32], index: 0, kind: input, shape index: {}]   ;;  %s1660_s1 = inlined_call_operand.vmem [shape: bf16[2,16,32], index: 1, kind: input, shape index: {}]   ;;  %s1661_s2 = inlined_call_operand.vmem [shape: bf16[32,32], index: 2, kind: input, shape index: {}]   ;;  %s1662_s3 = inlined_call_operand.vmem [shape: f32[1,32], index: 3, kind: input, shape index: {}]   ;;  %s1663_s4 = inlined_call_operand.vmem [shape: bf16[32,64], index: 4, kind: input, shape index: {}]   ;;  %s1664_s5 = inlined_call_operand.hbm [shape: f32[1,64], index: 5, kind: input, shape index: {}]   ;;  %s1665_s6 = inlined_call_operand.hbm [shape: bf16[32,32], index: 6, kind: input, shape index: {}]   ;;  %s1666_s7 = inlined_call_operand.hbm [shape: f32[1,32], index: 7, kind: input, shape index: {}]   ;;  %s1667_s8 = inlined_call_operand.hbm [shape: f32[1,32], index: 8, kind: input, shape index: {}]   ;;  %s1668_s9 = inlined_call_operand.hbm [shape: f32[1,32], index: 9, kind: input, shape index: {}]   ;;  %s1669_s10 = inlined_call_operand.vmem [shape: bf16[2,8,32], index: 10, kind: output, shape index: {}]  }
   0x1   :  { %1670 = sst [smem:[#allocation13_spill]] %s1665_s6 }
   0x2   :  { %15 = vsyncpa [#allocation3], 0 }
   0x3   :  { %16 = vsyncpa [#allocation5], 0 }
   0x4   :  { %17 = vsyncpa [#allocation8], 0  ;;  %s1489_s13 = smov 0   ;;  %s1491_s14 = smov 0  }
   0x5   :  { %s1493_s15 = smov 0  }
   0x6 LB: > { %s1671_s6 = sld [smem:[#allocation13_spill]]  ;;  %s1062_s19 = sadd.s32 4294967295, %s1417_s15   ;;  %s1417_s15 = sphi %s1493_s15, %s23_s15   ;;  %s1413_s14 = sphi %s1491_s14, %s1676_s14   ;;  %s1409_s13 = sphi %s1489_s13, %s1675_s13  }
   0x7   : > { %p1064_p0 = scmp.ge.s32.totalorder %s1417_s15, 1  ;;  %p290_p1 = scmp.lt.s32.totalorder %s1417_s15, 3 }
   0x8   : > { %p1510_p2 = scmp.eq.s32.totalorder %s1062_s19, 0  ;;  %s1419_s22 = smov [#allocation4]  }
   0x9   : > { %p1514_p3 = pnand %p1064_p0, %p290_p1  ;;  %s324_s23 = sshll.u32 %s1419_s22, 4  ;;  %s325_s23 = int_to_ptr.vmem [resolvable:$true] %s324_s23 }
   0xa   : > { %s349_s26 = sshll.u32 %s1667_s8, 4  ;;  %s1420_s28 = smov [#allocation7]   ;;  %s350_s26 = int_to_ptr.hbm [resolvable:$true] %s349_s26 }
   0xb   : > { %p1143_p4 = pneg %p1514_p3  ;;  %s351_s29 = sshll.u32 %s1420_s28, 4  ;;  %s352_s29 = int_to_ptr.vmem [resolvable:$true] %s351_s29 }
   0xc   : > { %s322_s18 = sshll.u32 %s1671_s6, 4  ;;  %s1421_s30 = smov 64   ;;  %s323_s18 = int_to_ptr.hbm [resolvable:$true] %s322_s18 }
   0xd   : > { %p1525_p5 = pnand %p1510_p2, %p1143_p4  ;;  %s1422_s11 = smov 4  }
   0xe   : > { %s311_s17 = sshll.u32 %s1664_s5, 4  ;;  %s35_s19 = sadd.s32 1, %s1413_s14  ;;  %s312_s17 = int_to_ptr.hbm [resolvable:$true] %s311_s17 }
   0xf   : > { %1149 = dma.hbm_to_vmem [thread:$0]  (!%p1525_p5), %s323_s18, 256, %s325_s23, [#allocation5], %s1421_s30, %s1421_s30, %s1422_s11  }
  0x10   : > { %1155 = dma.hbm_to_vmem [thread:$0]  (!%p1525_p5), %s350_s26, 16, %s352_s29, [#allocation8]  }
  0x11   : > { %p37_p6 = scmp.ge.s32.totalorder %s35_s19, 2  ;;  %s1423_s22 = smov [#allocation2]  }
  0x12   : > { %s313_s24 = sshll.u32 %s1423_s22, 4  ;;  %s337_s6 = sshll.u32 %s1666_s7, 4  ;;  %s314_s24 = int_to_ptr.vmem [resolvable:$true] %s313_s24  ;;  %s338_s6 = int_to_ptr.hbm [resolvable:$true] %s337_s6 }
  0x13   : > { %s1678_s19 = smov (%p37_p6, %s35_s19), 0  ;;  %s361_s26 = sshll.u32 %s1668_s9, 4  ;;  %s362_s26 = int_to_ptr.hbm [resolvable:$true] %s361_s26 }
  0x14   : > { %1146 = dma.hbm_to_vmem [thread:$0]  (!%p1525_p5), %s312_s17, 16, %s314_s24, [#allocation3]  }
  0x15   : > { %s1424_s29 = smov [#allocation6]   ;;  %s1425_s11 = smov [#allocation9]  }
  0x16   : > { %s339_s30 = sshll.u32 %s1424_s29, 4  ;;  %s363_s12 = sshll.u32 %s1425_s11, 4  ;;  %s340_s30 = int_to_ptr.vmem [resolvable:$true] %s339_s30  ;;  %s364_s12 = int_to_ptr.vmem [resolvable:$true] %s363_s12 }
  0x17   : > { %1152 = dma.hbm_to_vmem [thread:$0]  (!%p1525_p5), %s338_s6, 16, %s340_s30, [#allocation5]  }
  0x18   : > { %1158 = dma.hbm_to_vmem [thread:$0]  (!%p1525_p5), %s362_s26, 16, %s364_s12, [#allocation8]  }
  0x19   : > { %394 = sbr.rel (%p1514_p3) target bundleno = 1423 (0x58f), region = 60 }
  0x1e   : > { %1396 = dma.done.wait (%p1510_p2), [#allocation3], 16  }
  0x1f   : > { %1398 = vsyncadd (%p1510_p2), [#allocation3], 4294967280 }
  0x20   : > { %1400 = dma.done.wait (%p1510_p2), [#allocation5], 272  }
  0x21   : > { %1402 = vsyncadd (%p1510_p2), [#allocation5], 4294967024 }
  0x22   : > { %1404 = dma.done.wait (%p1510_p2), [#allocation8], 32  }
  0x23   : > { %1406 = vsyncadd (%p1510_p2), [#allocation8], 4294967264  ;;  %p462_p7 = scmp.lt.s32.totalorder %s1409_s13, 1  ;;  %v1119_v0 = vld [vmem:[%s1661_s2 + $0x8] sm:$0xff]  ;;  %v1118_v2 = vld [vmem:[%s1661_s2] sm:$0xff]  ;;  %vm504_vm0 = vcmask 261120  }
  0x24   : > { %v1122_v1 = vld [vmem:[%s1663_s4 + $0x8] sm:$0xff]  ;;  %514 = vmatpush.bf16.msra.mxu0 %v1119_v0  ;;  %v1121_v3 = vld [vmem:[%s1663_s4] sm:$0xff]  ;;  %vm578_vm1 = vcmask 64512   ;;  %s1427_s27 = smov 104   ;;  %s1428_s16 = smov 112   ;;  %vm692_vm2 = vcmask 1043456  }
  0x25   : > { %s1680_s13 = smov (!%p462_p7, %s1409_s13), 1  ;;  %558 = vmatpush.bf16.msra.mxu1 %v1122_v1  ;;  %v1208_v6 = vld [vmem:[%s1662_s3] ss:$0 sm:$0xff]  ;;  %v568_v24 = vld [vmem:[#allocation4] sm:$0xf]  ;;  %vm598_vm3 = vcmask 130048  }
  0x26   : > { %s1117_s6 = sshll.u32 %s1680_s13, 3  ;;  %s1077_s22 = sshll.u32 %s1680_s13, 2  ;;  %v1209_v10 = vld [vmem:[#allocation2] ss:$0 sm:$0xff]  ;;  %v713_v25 = vsel %vm692_vm2, %v568_v24, 0  ;;  %vm923_vm8 = vcmask 257024  }
  0x27   : > { %s473_s26 = scalar_lea.vmem %s1660_s1, %s1117_s6  ;;  %s468_s11 = scalar_lea.vmem %s1659_s0, %s1077_s22 }
  0x28   : > { %v1120_v4 = vld [vmem:[%s473_s26] sm:$0xff]  ;;  %515 = vmatpush.bf16.msra.mxu0 %v1118_v2  ;;  %s1426_s6 = smov 120   ;;  %s1429_s17 = smov 96  }
  0x29   : > { %559 = vmatpush.bf16.msra.mxu1 %v1121_v3  ;;  %v1591_v5 = vld [vmem:[%s468_s11] sm:$0xf]  ;;  %s1430_s20 = smov 88   ;;  %s1431_s24 = smov 72  }
  0x2a   : > { %s1432_s25 = smov 80   ;;  %s480_s23 = scalar_lea.vmem %s1669_s10, %s1077_s22 }
  0x2b   : > { %1089 = vmatmul.msk.bf16.vlgmr.msra.gmra.mxu0 %vm504_vm0, %v1591_v5 }
  0x2c   : > { %1102 = vmatmul.msk.bf16.vlgmr.msra.gmra.mxu1 %vm504_vm0, %v1120_v4 }
  0xa8   : > { %v517_v7 = vpop.f32.mrf.mxu0 }
  0xa9   : > { %v561_v8 = vpop.f32.mrf.mxu1  ;;  %v518_v9 = vadd.f32 %v1208_v6, %v517_v7 }
  0xaa   : > { %v562_v13 = vadd.f32 %v1209_v10, %v561_v8 }
  0xab   : > { %v521_v11 = vpack.c.bf16 %v518_v9, %v518_v9 }
  0xac   : > { %v566_v17 = vpack.c.bf16 %v562_v13, %v562_v13 }
  0xad   : > { %v632_v12 = vunpack.c.l.b16 %v521_v11 }
  0xae   : > { %v575_v20 = vunpack.c.l.b16 %v566_v17 }
  0xaf   : > { %v633_v14 = vpack.c.b16 %v632_v12, %v632_v12 }
  0xb0   : > { %v519_v16 = vpop.f32.mrf.mxu0 }
  0xb1   : > { %v563_v15 = vpop.f32.mrf.mxu1  ;;  %634 = vrot.lane.b32.xlu2 %v633_v14, %s1426_s6 }
  0xb2   : > { %v564_v18 = vadd.f32 %v1209_v10, %v563_v15 }
  0xb4   : > { %v567_v19 = vpack.c.bf16 %v564_v18, %v564_v18 }
  0xb6   : > { %v576_v21 = vunpack.c.l.b16 %v567_v19 }
  0xb8   : > { %v1600_v22 = vpack.c.b16 %v576_v21, %v575_v20  ;;  %v569_v20 = vld [vmem:[#allocation4 + $0x4] sm:$0xf] }
  0xb9   : > { %v694_v21 = vsel %vm692_vm2, %v569_v20, 0 }
  0xba   : > { %805 = vrot.lane.b32.xlu2 %v1600_v22, %s1427_s27  ;;  %v583_v23 = vsel %vm578_vm1, %v1600_v22, 0  ;;  %703 = vmatpush.bf16.msrb.mxu1 %v694_v21 }
  0xbb   : > { %592 = vmatpush.bf16.xpose.msra.mxu2 %v583_v23 }
  0xc2   : > { %730 = vrot.lane.b32.xlu2 %v1600_v22, %s1428_s16  ;;  %1103 = vmatmul.msk.bf16.vlgmr.msra.gmra.mxu2 %vm578_vm1, %v521_v11 }
  0xc3   : > { %722 = vmatpush.bf16.msrb.mxu2 %v713_v25  ;;  %v570_v25 = vld [vmem:[#allocation4 + $0x8] sm:$0xf] }
  0xca   : > { %803 = vrot.lane.b32.xlu2 %v633_v14, %s1427_s27 }
 0x10b   : > { %v635_v26 = vpop.permute.xlu2 %634 }
 0x114   : > { %v806_v27 = vpop.permute.xlu2 %805 }
 0x115   : > { %v811_v28 = vsel %vm578_vm1, %v806_v27, 0 }
 0x116   : > { %820 = vmatpush.bf16.xpose.msra.mxu2 %v811_v28 }
 0x11c   : > { %v731_v40 = vpop.permute.xlu2 %730 }
 0x11d   : > { %v736_v44 = vsel %vm578_vm1, %v731_v40, 0 }
 0x124   : > { %v804_v50 = vpop.permute.xlu2 %803 }
 0x145   : > { %v594_v29 = vpop.f32.mrf.mxu2 }
 0x146   : > { %v599_v30 = vsel %vm598_vm3, %v594_v29, -inf }
 0x147   : > { %600 = vmax.xlane.f32.xlu0 %v599_v30 }
 0x14d   : > { %v596_v31 = vpop.f32.mrf.mxu2 }
 0x15b   : > { %609 = vrot.lane.b32.xlu0 %v1600_v22, %s1429_s17 }
 0x163   : > { %728 = vrot.lane.b32.xlu0 %v633_v14, %s1428_s16 }
 0x1ba   : > { %v601_v32 = vpop.xlane.xlu0 %600 }
 0x1bb   : > { %v602_v33 = vsub.f32 %v594_v29, %v601_v32 }
 0x1bd   : > { %v603_v34 = vmul.f32 1.442695, %v602_v33 }
 0x1bf   : > { %1213 = vpow2.f32 %v603_v34 }
 0x1c5   : > { %v1214_v35 = vpop.eup %1213 }
 0x1c6   : > { %v605_v36 = vsel %vm598_vm3, %v1214_v35, 0.0  ;;  %v608_v38 = vpack.c.bf16 %v1214_v35, %v1214_v35 }
 0x1c7   : > { %606 = vadd.xlane.f32.xlu1 %v605_v36 }
 0x1cd   : > { %v610_v37 = vpop.permute.xlu0 %609 }
 0x1ce   : > { %622 = vmatpush.bf16.msra.mxu3 %v610_v37 }
 0x1d1   : > { %1104 = vmatmul.msk.bf16.vlgmr.msra.gmra.mxu3 %vm598_vm3, %v608_v38 }
 0x1d5   : > { %v729_v51 = vpop.permute.xlu0 %728 }
 0x1e0   : > { %636 = vrot.lane.b32.xlu1 %v1600_v22, %s1426_s6 }
 0x1e8   : > { %667 = vrot.lane.b32.xlu1 %v1600_v22, %s1430_s20 }
 0x23a   : > { %v607_v39 = vpop.xlane.xlu1 %606 }
 0x23b   : > { %1215 = vrcp.f32 %v607_v39 }
 0x241   : > { %v1216_v43 = vpop.eup %1215 }
 0x252   : > { %v637_v41 = vpop.permute.xlu1 %636 }
 0x253   : > { %v642_v42 = vsel %vm578_vm1, %v637_v41, 0 }
 0x254   : > { %v624_v45 = vpop.f32.mrf.mxu3  ;;  %651 = vmatpush.bf16.xpose.msrb.mxu3 %v642_v42 }
 0x255   : > { %v629_v46 = vmul.f32 %v1216_v43, %v624_v45 }
 0x257   : > { %v630_v47 = vpack.c.bf16 %v629_v46, %v629_v46 }
 0x259   : > { %1108 = vmatmul.msk.bf16.vlgmr.msrb.gmra.mxu2 %vm578_vm1, %v630_v47 }
 0x25a   : > { %v668_v48 = vpop.permute.xlu1 %667 }
 0x25b   : > { %1105 = vmatmul.msk.bf16.vlgmr.msrb.gmra.mxu3 %vm578_vm1, %v635_v26  ;;  %680 = vmatpush.bf16.msrb.mxu0 %v668_v48  ;;  %v787_v26 = vsel %vm692_vm2, %v570_v25, 0 }
 0x25c   : > { %745 = vmatpush.bf16.xpose.msra.mxu3 %v736_v44  ;;  %v626_v49 = vpop.f32.mrf.mxu3  ;;  %796 = vmatpush.bf16.msra.mxu1 %v787_v26 }
 0x269   : > { %1112 = vmatmul.msk.bf16.vlgmr.msra.gmra.mxu2 %vm578_vm1, %v804_v50  ;;  %v1210_v50 = vld [vmem:[#allocation6] ss:$0 sm:$0xff] }
 0x26b   : > { %1109 = vmatmul.msk.bf16.vlgmr.msra.gmra.mxu3 %vm578_vm1, %v729_v51  ;;  %v483_v51 = vunpack.c.l.bf16 %v1591_v5 }
 0x2dc   : > { %v1622_v52 = vpop.f32.mrf.mxu2 }
 0x2de   : > { %v653_v53 = vpop.f32.mrf.mxu3 }
 0x2df   : > { %v657_v54 = vsel %vm598_vm3, %v653_v53, -inf }
 0x2e0   : > { %658 = vmax.xlane.f32.xlu2 %v657_v54 }
 0x2e4   : > { %v726_v55 = vpop.f32.mrf.mxu2 }
 0x2e6   : > { %v655_v56 = vpop.f32.mrf.mxu3 }
 0x2ec   : > { %v822_v57 = vpop.f32.mrf.mxu2 }
 0x2ed   : > { %v826_v58 = vsel %vm598_vm3, %v822_v57, -inf }
 0x2ee   : > { %v747_v59 = vpop.f32.mrf.mxu3  ;;  %827 = vmax.xlane.f32.xlu0 %v826_v58 }
 0x2ef   : > { %v751_v60 = vsel %vm598_vm3, %v747_v59, -inf }
 0x2f0   : > { %752 = vmax.xlane.f32.xlu1 %v751_v60 }
 0x2f4   : > { %v824_v61 = vpop.f32.mrf.mxu2 }
 0x2f6   : > { %v749_v62 = vpop.f32.mrf.mxu3 }
 0x2f8   : > { %836 = vrot.lane.b32.xlu2 %v1600_v22, %s1431_s24 }
 0x302   : > { %761 = vrot.lane.b32.xlu0 %v1600_v22, %s1432_s25  ;;  %v571_v22 = vld [vmem:[#allocation4 + $0xc] sm:$0xf] }
 0x303   : > { %v862_v23 = vsel %vm692_vm2, %v571_v22, 0 }
 0x353   : > { %v659_v63 = vpop.xlane.xlu2 %658 }
 0x354   : > { %v660_v0 = vsub.f32 %v653_v53, %v659_v63 }
 0x356   : > { %v661_v1 = vmul.f32 1.442695, %v660_v0 }
 0x358   : > { %1217 = vpow2.f32 %v661_v1 }
 0x35b   : > { %v837_v2 = vpop.permute.xlu2 %836 }
 0x35c   : > { %849 = vmatpush.bf16.msrb.mxu3 %v837_v2 }
 0x35e   : > { %v1218_v3 = vpop.eup %1217 }
 0x35f   : > { %v663_v4 = vsel %vm598_vm3, %v1218_v3, 0.0  ;;  %v666_v6 = vpack.c.bf16 %v1218_v3, %v1218_v3 }
 0x360   : > { %664 = vadd.xlane.f32.xlu1 %v663_v4 }
 0x361   : > { %1106 = vmatmul.msk.bf16.vlgmr.msrb.gmra.mxu0 %vm598_vm3, %v666_v6  ;;  %v828_v7 = vpop.xlane.xlu0 %827 }
 0x362   : > { %v829_v8 = vsub.f32 %v822_v57, %v828_v7 }
 0x363   : > { %v753_v9 = vpop.xlane.xlu1 %752 }
 0x364   : > { %v830_v10 = vmul.f32 1.442695, %v829_v8  ;;  %v754_v11 = vsub.f32 %v747_v59, %v753_v9  ;;  %v1433_v59 = vmov 32.0  }
 0x366   : > { %1219 = vpow2.f32 %v830_v10  ;;  %v755_v12 = vmul.f32 1.442695, %v754_v11 }
 0x368   : > { %1221 = vpow2.f32 %v755_v12 }
 0x36c   : > { %v1220_v13 = vpop.eup %1219 }
 0x36d   : > { %v835_v14 = vpack.c.bf16 %v1220_v13, %v1220_v13  ;;  %v832_v15 = vsel %vm598_vm3, %v1220_v13, 0.0 }
 0x36e   : > { %v1222_v16 = vpop.eup %1221  ;;  %833 = vadd.xlane.f32.xlu2 %v832_v15  ;;  %v1211_v15 = vld [vmem:[#allocation7] ss:$0 sm:$0xff] }
 0x36f   : > { %1113 = vmatmul.msk.bf16.vlgmr.msrb.gmra.mxu3 %vm598_vm3, %v835_v14  ;;  %v757_v17 = vsel %vm598_vm3, %v1222_v16, 0.0  ;;  %v760_v19 = vpack.c.bf16 %v1222_v16, %v1222_v16 }
 0x370   : > { %758 = vadd.xlane.f32.xlu1 %v757_v17  ;;  %v1212_v17 = vld [vmem:[#allocation9] ss:$0 sm:$0xff] }
 0x374   : > { %v762_v18 = vpop.permute.xlu0 %761 }
 0x375   : > { %774 = vmatpush.bf16.msra.mxu0 %v762_v18 }
 0x378   : > { %1110 = vmatmul.msk.bf16.vlgmr.msra.gmra.mxu0 %vm598_vm3, %v760_v19 }
 0x379   : > { %871 = vmatpush.bf16.msrb.mxu0 %v862_v23 }
 0x3d3   : > { %v665_v24 = vpop.xlane.xlu1 %664 }
 0x3d4   : > { %1223 = vrcp.f32 %v665_v24 }
 0x3da   : > { %v1224_v27 = vpop.eup %1223 }
 0x3de   : > { %v682_v28 = vpop.f32.mrf.mxu0 }
 0x3df   : > { %v687_v29 = vmul.f32 %v1224_v27, %v682_v28 }
 0x3e1   : > { %v688_v30 = vpack.c.bf16 %v687_v29, %v687_v29  ;;  %v834_v32 = vpop.xlane.xlu2 %833 }
 0x3e2   : > { %1225 = vrcp.f32 %v834_v32 }
 0x3e3   : > { %1107 = vmatmul.msk.bf16.vlgmr.msrb.gmra.mxu1 %vm578_vm1, %v688_v30  ;;  %v759_v33 = vpop.xlane.xlu1 %758 }
 0x3e4   : > { %1227 = vrcp.f32 %v759_v33 }
 0x3e5   : > { %1229 = vrcp.f32 %v1433_v59 }
 0x3e6   : > { %v684_v31 = vpop.f32.mrf.mxu0 }
 0x3e8   : > { %v1226_v34 = vpop.eup %1225 }
 0x3ea   : > { %v1228_v37 = vpop.eup %1227 }
 0x3eb   : > { %v1230_v60 = vpop.eup %1229 }
 0x3ec   : > { %v889_v61 = vmul.f32 32.0, %v1230_v60  ;;  %vm893_vm4 = vweird.f32 %v1230_v60 }
 0x3ee   : > { %v890_v62 = vsub.f32 1.0, %v889_v61 }
 0x3f0   : > { %v891_v63 = vmul.f32 %v1230_v60, %v890_v62 }
 0x3f2   : > { %v851_v35 = vpop.f32.mrf.mxu3 }
 0x3f3   : > { %v856_v36 = vmul.f32 %v1226_v34, %v851_v35 }
 0x3f5   : > { %v857_v38 = vpack.c.bf16 %v856_v36, %v856_v36  ;;  %v776_v39 = vpop.f32.mrf.mxu0 }
 0x3f6   : > { %v781_v40 = vmul.f32 %v1228_v37, %v776_v39 }
 0x3f7   : > { %1114 = vmatmul.msk.bf16.vlgmr.msrb.gmra.mxu0 %vm578_vm1, %v857_v38 }
 0x3f8   : > { %v782_v41 = vpack.c.bf16 %v781_v40, %v781_v40 }
 0x3fa   : > { %1111 = vmatmul.msk.bf16.vlgmr.msra.gmra.mxu1 %vm578_vm1, %v782_v41  ;;  %v853_v42 = vpop.f32.mrf.mxu3 }
 0x3fd   : > { %v778_v43 = vpop.f32.mrf.mxu0 }
 0x460   : > { %v705_v44 = vpop.f32.mrf.mxu1 }
 0x461   : > { %v725_v47 = vadd.f32 %v1622_v52, %v705_v44  ;;  %v892_v52 = vadd.f32 %v1230_v60, %v891_v63 }
 0x463   : > { %v894_v0 = vsel %vm893_vm4, %v1230_v60, %v892_v52 }
 0x468   : > { %v707_v45 = vpop.f32.mrf.mxu1 }
 0x474   : > { %v873_v46 = vpop.f32.mrf.mxu0 }
 0x477   : > { %v798_v48 = vpop.f32.mrf.mxu1 }
 0x478   : > { %v802_v49 = vadd.f32 %v798_v48, %v725_v47 }
 0x47a   : > { %v877_v53 = vadd.f32 %v873_v46, %v802_v49 }
 0x47c   : > { %v875_v54 = vpop.f32.mrf.mxu0  ;;  %v881_v55 = vadd.f32 %v1210_v50, %v877_v53 }
 0x47e   : > { %v882_v56 = vadd.f32 %v881_v55, %v483_v51 }
 0x47f   : > { %v800_v57 = vpop.f32.mrf.mxu1 }
 0x480   : > { %v885_v58 = vsel %vm504_vm0, %v882_v56, 0.0 }
 0x481   : > { %886 = vadd.xlane.f32.xlu0 %v885_v58 }
 0x4f4   : > { %v887_v1 = vpop.xlane.xlu0 %886 }
 0x4f5   : > { %v895_v2 = vmul.f32 %v894_v0, %v887_v1 }
 0x4f7   : > { %v896_v5 = vsub.f32 %v882_v56, %v895_v2 }
 0x4f9   : > { %v897_v3 = vmul.f32 %v896_v5, %v896_v5 }
 0x4fb   : > { %v898_v4 = vsel %vm504_vm0, %v897_v3, 0.0 }
 0x4fc   : > { %899 = vadd.xlane.f32.xlu1 %v898_v4 }
 0x56f   : > { %v900_v6 = vpop.xlane.xlu1 %899 }
 0x570   : > { %v901_v7 = vmul.f32 %v900_v6, %v894_v0 }
 0x572   : > { %v902_v8 = vadd.f32 1e-05, %v901_v7 }
 0x574   : > { %1231 = vrsqrt.f32 %v902_v8  ;;  %vm909_vm6 = vweird.f32 %v902_v8 }
 0x57a   : > { %v1232_v9 = vpop.eup %1231 }
 0x57b   : > { %v904_v10 = vmul.f32 %v1232_v9, %v902_v8  ;;  %vm910_vm5 = vweird.f32 %v1232_v9 }
 0x57c   : > { %vm911_vm7 = vmor %vm909_vm6, %vm910_vm5 }
 0x57d   : > { %v905_v11 = vmul.f32 %v1232_v9, %v904_v10 }
 0x57f   : > { %v906_v12 = vmul.f32 0.5, %v905_v11 }
 0x581   : > { %v907_v13 = vsub.f32 1.5, %v906_v12 }
 0x583   : > { %v908_v14 = vmul.f32 %v1232_v9, %v907_v13 }
 0x585   : > { %v912_v16 = vsel %vm911_vm7, %v1232_v9, %v908_v14 }
 0x586   : > { %v913_v18 = vmul.f32 %v912_v16, %v896_v5 }
 0x588   : > { %v917_v19 = vmul.f32 %v1211_v15, %v913_v18 }
 0x58a   : > { %v921_v20 = vadd.f32 %v1212_v17, %v917_v19 }
 0x58c   : > { %v922_v21 = vpack.c.bf16 %v921_v20, %v921_v20 }
 0x58e   : > { %924 = vst.msk [vmem:[%s480_s23] sm:$0xf] %vm923_vm8, %v922_v21 }
 0x58f PF: > { %s23_s15 = sadd.s32 1, %s1417_s15   ;;  %s1675_s13 = smov %s1413_s14 }
 0x590   : > { %p20_p8 = scmp.ge.s32.totalorder %s23_s15, 4   ;;  %s1676_s14 = smov %s1678_s19 }
 0x592   :  { %22 = sbr.rel (!%p20_p8) target bundleno = 6 (0x6), region = 114 }
 0x597   :  { %950 = vsyncpa [#allocation3], 1 }
 0x598   :  { %952 = vsyncpa [#allocation3 + $0x1], 1 }
 0x599   :  { %953 = vsyncpa [#allocation5], 1 }
 0x59a   :  { %954 = vsyncpa [#allocation8], 1 }

// kernel: custom_transformer_decoder.8
= control target key start
LH: loop header
LB: loop body
LE: loop exit
PB: predicated region body
PF: predicated region fallthrough
CT: control target
= control target key end

     0   :  { %12 = vsyncpa [#allocation4], 0  ;;  %s491_s0 = inlined_call_operand.vmem [shape: bf16[16,32], index: 0, kind: input, shape index: {}]   ;;  %s492_s1 = inlined_call_operand.vmem [shape: bf16[32,64], index: 1, kind: input, shape index: {}]   ;;  %s493_s2 = inlined_call_operand.vmem [shape: f32[1,64], index: 2, kind: input, shape index: {}]   ;;  %s494_s3 = inlined_call_operand.vmem [shape: bf16[64,32], index: 3, kind: input, shape index: {}]   ;;  %s495_s4 = inlined_call_operand.hbm [shape: f32[1,32], index: 4, kind: input, shape index: {}]   ;;  %s496_s5 = inlined_call_operand.hbm [shape: f32[1,32], index: 5, kind: input, shape index: {}]   ;;  %s497_s6 = inlined_call_operand.hbm [shape: f32[1,32], index: 6, kind: input, shape index: {}]   ;;  %s498_s7 = inlined_call_operand.vmem [shape: bf16[16,32], index: 7, kind: output, shape index: {}]  }
   0x1   :  { %13 = vsyncpa [#allocation6], 0  ;;  %s38_s26 = sshll.u32 %s496_s5, 4  ;;  %s398_s27 = smov [#allocation5]   ;;  %s39_s26 = int_to_ptr.hbm [resolvable:$true] %s38_s26 }
   0x2   :  { %s40_s28 = sshll.u32 %s398_s27, 4  ;;  %s27_s8 = sshll.u32 %s495_s4, 4  ;;  %s41_s28 = int_to_ptr.vmem [resolvable:$true] %s40_s28  ;;  %s28_s8 = int_to_ptr.hbm [resolvable:$true] %s27_s8 }
   0x3   :  { %43 = dma.hbm_to_vmem [thread:$0]  %s39_s26, 16, %s41_s28, [#allocation6]  }
   0x4   :  { %s399_s9 = smov [#allocation3]   ;;  %s49_s13 = sshll.u32 %s497_s6, 4  ;;  %s50_s13 = int_to_ptr.hbm [resolvable:$true] %s49_s13 }
   0x5   :  { %s29_s10 = sshll.u32 %s399_s9, 4  ;;  %s400_s5 = smov [#allocation7]   ;;  %s30_s10 = int_to_ptr.vmem [resolvable:$true] %s29_s10 }
   0x6   :  { %32 = dma.hbm_to_vmem [thread:$0]  %s28_s8, 16, %s30_s10, [#allocation4]  }
   0x7   :  { %s51_s14 = sshll.u32 %s400_s5, 4  ;;  %s52_s14 = int_to_ptr.vmem [resolvable:$true] %s51_s14 }
   0x8   :  { %54 = dma.hbm_to_vmem [thread:$0]  %s50_s13, 16, %s52_s14, [#allocation6]  }
   0x9   :  { %394 = dma.done.wait [#allocation4], 16  }
   0xa   :  { %395 = vsyncadd [#allocation4], 4294967280 }
   0xb   :  { %396 = dma.done.wait [#allocation6], 32  }
   0xc   :  { %397 = vsyncadd [#allocation6], 4294967264  ;;  %v303_v0 = vld [vmem:[%s492_s1 + $0x8] sm:$0xff]  ;;  %v302_v1 = vld [vmem:[%s492_s1] sm:$0xff]  ;;  %vm95_vm0 = vcmask 261120   ;;  %vm148_vm1 = vcmask 523264  }
   0xd   :  { %105 = vmatpush.bf16.msra.mxu0 %v303_v0  ;;  %v301_v2 = vld [vmem:[%s491_s0] sm:$0xff]  ;;  %v307_v3 = vld [vmem:[%s494_s3 + $0x18] sm:$0xff]  ;;  %v306_v4 = vld [vmem:[%s494_s3 + $0x10] sm:$0xff]  ;;  %v401_v29 = vmov 32.0   ;;  %vm262_vm7 = vcmask 257024  }
   0xe   :  { %156 = vmatpush.bf16.msra.mxu1 %v307_v3  ;;  %v305_v5 = vld [vmem:[%s494_s3 + $0x8] sm:$0xff]  ;;  %v304_v6 = vld [vmem:[%s494_s3] sm:$0xff]  ;;  %v313_v18 = vld [vmem:[#allocation3] ss:$0 sm:$0xff]  ;;  %316 = vrcp.f32 %v401_v29 }
   0xf   :  { %v312_v8 = vld [vmem:[%s493_s2] ss:$0 sm:$0xff]  ;;  %v314_v60 = vld [vmem:[#allocation5] ss:$0 sm:$0xff]  ;;  %v315_v63 = vld [vmem:[#allocation7] ss:$0 sm:$0xff] }
  0x10   :  { %v68_v16 = vld [vmem:[%s491_s0] sm:$0xff]  }
  0x11   :  { %106 = vmatpush.bf16.msra.mxu0 %v302_v1  ;;  %v185_v17 = vunpack.c.l.bf16 %v68_v16  ;;  %v186_v24 = vunpack.c.h.bf16 %v68_v16 }
  0x12   :  { %157 = vmatpush.bf16.msra.mxu1 %v306_v4 }
  0x14   :  { %283 = vmatmul.msk.bf16.vlgmr.msra.gmra.mxu0 %vm95_vm0, %v301_v2  ;;  %v317_v30 = vpop.eup %316 }
  0x15   :  { %v206_v31 = vmul.f32 32.0, %v317_v30  ;;  %vm210_vm2 = vweird.f32 %v317_v30 }
  0x16   :  { %158 = vmatpush.bf16.msra.mxu1 %v305_v5 }
  0x17   :  { %v207_v32 = vsub.f32 1.0, %v206_v31 }
  0x19   :  { %v208_v33 = vmul.f32 %v317_v30, %v207_v32 }
  0x1a   :  { %159 = vmatpush.bf16.msra.mxu1 %v304_v6 }
  0x1b   :  { %v209_v34 = vadd.f32 %v317_v30, %v208_v33 }
  0x1d   :  { %v211_v35 = vsel %vm210_vm2, %v317_v30, %v209_v34 }
  0x91   :  { %v108_v7 = vpop.f32.mrf.mxu0 }
  0x92   :  { %v109_v9 = vadd.f32 %v312_v8, %v108_v7 }
  0x94   :  { %v113_v12 = vmax.f32 %v109_v9, 0.0 }
  0x99   :  { %v110_v10 = vpop.f32.mrf.mxu0 }
  0x9a   :  { %v111_v11 = vadd.f32 %v312_v8, %v110_v10 }
  0x9c   :  { %v114_v13 = vmax.f32 %v111_v11, 0.0 }
  0x9e   :  { %v115_v14 = vpack.c.bf16 %v114_v13, %v113_v12 }
  0xa0   :  { %300 = vmatmul.msk.bf16.vlgmr.msra.gmra.mxu1 %vm148_vm1, %v115_v14 }
 0x11d   :  { %v161_v15 = vpop.f32.mrf.mxu1 }
 0x11e   :  { %170 = vst.msk [vmem:[#allocation2] sm:$0xff] %vm95_vm0, %v161_v15 }
 0x125   :  { %v163_v19 = vpop.f32.mrf.mxu1  ;;  %v187_v20 = vld [vmem:[#allocation2] sm:$0xff] }
 0x126   :  { %171 = vst.msk [vmem:[#allocation2 + $0x8] sm:$0xff] %vm95_vm0, %v163_v19  ;;  %v189_v21 = vadd.f32 %v187_v20, %v185_v17 }
 0x128   :  { %v195_v22 = vadd.f32 %v313_v18, %v189_v21 }
 0x12a   :  { %v199_v23 = vsel %vm95_vm0, %v195_v22, 0.0 }
 0x12b   :  { %200 = vadd.xlane.f32.xlu0 %v199_v23 }
 0x12d   :  { %v188_v25 = vld [vmem:[#allocation2 + $0x8] sm:$0xff] }
 0x12e   :  { %v190_v26 = vadd.f32 %v188_v25, %v186_v24 }
 0x130   :  { %v196_v27 = vadd.f32 %v313_v18, %v190_v26 }
 0x132   :  { %v202_v28 = vsel %vm95_vm0, %v196_v27, 0.0 }
 0x133   :  { %203 = vadd.xlane.f32.xlu0 %v202_v28 }
 0x19e   :  { %v201_v36 = vpop.xlane.xlu0 %200 }
 0x19f   :  { %v212_v37 = vmul.f32 %v211_v35, %v201_v36 }
 0x1a1   :  { %v214_v38 = vsub.f32 %v195_v22, %v212_v37 }
 0x1a3   :  { %v216_v39 = vmul.f32 %v214_v38, %v214_v38 }
 0x1a5   :  { %v218_v40 = vsel %vm95_vm0, %v216_v39, 0.0 }
 0x1a6   :  { %219 = vadd.xlane.f32.xlu1 %v218_v40  ;;  %v204_v41 = vpop.xlane.xlu0 %203 }
 0x1a7   :  { %v213_v42 = vmul.f32 %v211_v35, %v204_v41 }
 0x1a9   :  { %v215_v43 = vsub.f32 %v196_v27, %v213_v42 }
 0x1ab   :  { %v217_v44 = vmul.f32 %v215_v43, %v215_v43 }
 0x1ad   :  { %v221_v45 = vsel %vm95_vm0, %v217_v44, 0.0 }
 0x1ae   :  { %222 = vadd.xlane.f32.xlu1 %v221_v45 }
 0x219   :  { %v220_v46 = vpop.xlane.xlu1 %219 }
 0x21a   :  { %v224_v47 = vmul.f32 %v220_v46, %v211_v35 }
 0x21c   :  { %v226_v48 = vadd.f32 1e-05, %v224_v47 }
 0x21e   :  { %318 = vrsqrt.f32 %v226_v48  ;;  %vm234_vm4 = vweird.f32 %v226_v48 }
 0x221   :  { %v223_v49 = vpop.xlane.xlu1 %222 }
 0x222   :  { %v225_v50 = vmul.f32 %v223_v49, %v211_v35 }
 0x224   :  { %v319_v51 = vpop.eup %318  ;;  %v227_v52 = vadd.f32 1e-05, %v225_v50 }
 0x225   :  { %v229_v53 = vmul.f32 %v319_v51, %v226_v48  ;;  %vm235_vm3 = vweird.f32 %v319_v51 }
 0x226   :  { %320 = vrsqrt.f32 %v227_v52  ;;  %vm236_vm5 = vmor %vm234_vm4, %vm235_vm3  ;;  %vm244_vm8 = vweird.f32 %v227_v52 }
 0x227   :  { %v230_v54 = vmul.f32 %v319_v51, %v229_v53 }
 0x229   :  { %v231_v55 = vmul.f32 0.5, %v230_v54 }
 0x22b   :  { %v232_v56 = vsub.f32 1.5, %v231_v55 }
 0x22c   :  { %v321_v57 = vpop.eup %320 }
 0x22d   :  { %v233_v58 = vmul.f32 %v319_v51, %v232_v56  ;;  %v239_v59 = vmul.f32 %v321_v57, %v227_v52  ;;  %vm245_vm6 = vweird.f32 %v321_v57 }
 0x22e   :  { %vm246_vm9 = vmor %vm244_vm8, %vm245_vm6 }
 0x22f   :  { %v237_v61 = vsel %vm236_vm5, %v319_v51, %v233_v58  ;;  %v240_v62 = vmul.f32 %v321_v57, %v239_v59 }
 0x230   :  { %v248_v0 = vmul.f32 %v237_v61, %v214_v38 }
 0x231   :  { %v241_v1 = vmul.f32 0.5, %v240_v62 }
 0x232   :  { %v253_v2 = vmul.f32 %v314_v60, %v248_v0 }
 0x233   :  { %v242_v3 = vsub.f32 1.5, %v241_v1 }
 0x234   :  { %v258_v4 = vadd.f32 %v315_v63, %v253_v2 }
 0x235   :  { %v243_v5 = vmul.f32 %v321_v57, %v242_v3 }
 0x236   :  { %v260_v6 = vpack.c.bf16 %v258_v4, %v258_v4 }
 0x237   :  { %v247_v7 = vsel %vm246_vm9, %v321_v57, %v243_v5 }
 0x238   :  { %263 = vst.msk [vmem:[%s498_s7] sm:$0xf] %vm262_vm7, %v260_v6  ;;  %v249_v8 = vmul.f32 %v247_v7, %v215_v43 }
 0x23a   :  { %v254_v9 = vmul.f32 %v314_v60, %v249_v8 }
 0x23c   :  { %v259_v10 = vadd.f32 %v315_v63, %v254_v9 }
 0x23e   :  { %v261_v11 = vpack.c.bf16 %v259_v10, %v259_v10 }
 0x240   :  { %264 = vst.msk [vmem:[%s498_s7 + $0x4] sm:$0xf] %vm262_vm7, %v261_v11 }
 0x241   :  { %269 = vsyncpa [#allocation4], 1 }
 0x242   :  { %270 = vsyncpa [#allocation6], 1 }

// kernel: custom_transformer_decoder.9
= control target key start
LH: loop header
LB: loop body
LE: loop exit
PB: predicated region body
PF: predicated region fallthrough
CT: control target
= control target key end

     0   :  { %s1022_s27 = smov 0   ;;  %s1024_s28 = smov 0   ;;  %s1155_s0 = inlined_call_operand.vmem [shape: bf16[2,8,32], index: 0, kind: input, shape index: {}]   ;;  %s1156_s1 = inlined_call_operand.vmem [shape: f32[2,1,32], index: 1, kind: input, shape index: {}]   ;;  %s1157_s2 = inlined_call_operand.vmem [shape: bf16[32,96], index: 2, kind: input, shape index: {}]   ;;  %s1158_s3 = inlined_call_operand.vmem [shape: f32[1,96], index: 3, kind: input, shape index: {}]   ;;  %s1159_s4 = inlined_call_operand.vmem [shape: bf16[32,32], index: 4, kind: input, shape index: {}]   ;;  %s1160_s5 = inlined_call_operand.vmem [shape: f32[1,32], index: 5, kind: input, shape index: {}]   ;;  %s1161_s6 = inlined_call_operand.vmem [shape: f32[1,32], index: 6, kind: input, shape index: {}]   ;;  %s1162_s7 = inlined_call_operand.vmem [shape: f32[1,32], index: 7, kind: input, shape index: {}]   ;;  %s1163_s8 = inlined_call_operand.vmem [shape: bf16[2,8,32], index: 8, kind: output, shape index: {}]  }
   0x1   :  { %s1026_s29 = smov 0  }
   0x2 LB: > { %s30_s30 = sadd.s32 1, %s958_s28  ;;  %p850_p0 = scmp.ge.s32.totalorder %s962_s29, 1  ;;  %s962_s29 = sphi %s1026_s29, %s18_s29   ;;  %s958_s28 = sphi %s1024_s28, %s1165_s28   ;;  %s954_s27 = sphi %s1022_s27, %s1164_s27  }
   0x3   : > { %p32_p1 = scmp.ge.s32.totalorder %s30_s30, 2  ;;  %p288_p2 = scmp.lt.s32.totalorder %s962_s29, 3 }
   0x5   : > { %s1167_s30 = smov (%p32_p1, %s30_s30), 0  ;;  %p289_p3 = pnand %p850_p0, %p288_p2 }
   0x6   : > { %p329_p4 = scmp.lt.s32.totalorder (!%p289_p3), %s954_s27, 1  ;;  %s964_s22 = smov (!%p289_p3), 88  }
   0x7   : > { %292 = sbr.rel (%p289_p3) target bundleno = 1508 (0x5e4), region = 52  ;;  %s965_s23 = smov (!%p289_p3), 64  }
   0x8   : > { %s966_s24 = smov (!%p289_p3), 96   ;;  %s967_s25 = smov (!%p289_p3), 120  }
   0x9   : > { %s968_s26 = smov (!%p289_p3), 80   ;;  %s969_s9 = smov (!%p289_p3), 72  }
   0xa   : > { %s970_s10 = smov (!%p289_p3), 112   ;;  %s971_s11 = smov (!%p289_p3), 104  }
   0xb   : > { %s973_s15 = smov (!%p289_p3), 56  }
   0xc   : > { %v877_v0 = vld [vmem:[%s1157_s2 + $0x8] sm:$0xff]  ;;  %v876_v1 = vld [vmem:[%s1157_s2] sm:$0xff]  ;;  %s1169_s27 = smov (!%p329_p4, %s954_s27), 1  ;;  %vm375_vm0 = vcmask 261120   ;;  %vm412_vm1 = vcmask 64512   ;;  %vm447_vm2 = vcmask 1043456   ;;  %v394_v28 = vlaneseq }
   0xd   : > { %385 = vmatpush.bf16.msra.mxu0 %v877_v0  ;;  %s851_s13 = sshll.u32 %s1169_s27, 2  ;;  %s338_s16 = scalar_lea.vmem %s1156_s1, %s1169_s27  ;;  %v916_v7 = vld [vmem:[%s1158_s3] ss:$0 sm:$0xff]  ;;  %v972_v31 = vmov 0.0   ;;  %v403_v63 = vld [vmem:[%s1159_s4 + $0x4] sm:$0xf] }
   0xe   : > { %s335_s19 = scalar_lea.vmem %s1155_s0, %s851_s13  ;;  %v915_v2 = vld [vmem:[%s338_s16] ss:$0 sm:$0xff]  ;;  %v395_v29 = vshrl.u32 %v394_v28, 7  ;;  %v399_v30 = vand.u32 127, %v394_v28  ;;  %s974_s16 = smov 48   ;;  %v528_v0 = vsel %vm447_vm2, %v403_v63, 0 }
   0xf   : > { %v348_v3 = vld [vmem:[%s335_s19] sm:$0xf]  ;;  %s975_s19 = smov 40   ;;  %vm761_vm8 = vcmask 257024  }
  0x10   : > { %v349_v4 = vunpack.c.l.bf16 %v348_v3  ;;  %v402_v19 = vld [vmem:[%s1159_s4] sm:$0xf]  ;;  %vm400_vm3 = vcmp.gt.s32.totalorder %v399_v30, %v395_v29 }
  0x11   : > { %386 = vmatpush.bf16.msra.mxu0 %v876_v1  ;;  %v547_v24 = vsel %vm447_vm2, %v402_v19, 0  ;;  %v1088_v32 = vsel %vm400_vm3, -1e+30, %v972_v31 }
  0x12   : > { %v1058_v5 = vadd.f32 %v915_v2, %v349_v4 }
  0x14   : > { %v354_v6 = vpack.c.bf16 %v1058_v5, %v1058_v5 }
  0x15   : > { %537 = vmatpush.bf16.msrb.mxu0 %v528_v0 }
  0x16   : > { %861 = vmatmul.msk.bf16.vlgmr.msra.gmra.mxu0 %vm375_vm0, %v354_v6 }
  0x93   : > { %v388_v8 = vpop.f32.mrf.mxu0 }
  0x94   : > { %v389_v9 = vadd.f32 %v916_v7, %v388_v8 }
  0x96   : > { %v392_v10 = vpack.c.bf16 %v389_v9, %v389_v9 }
  0x98   : > { %v408_v11 = vunpack.c.l.b16 %v392_v10 }
  0x9a   : > { %v1066_v12 = vpack.c.b16 %v408_v11, %v408_v11 }
  0x9b   : > { %v390_v13 = vpop.f32.mrf.mxu0 }
  0x9c   : > { %469 = vrot.lane.b32.xlu2 %v1066_v12, %s964_s22  ;;  %442 = vrot.lane.b32.xlu1 %v1066_v12, %s965_s23 }
  0x9d   : > { %410 = vrot.lane.b32.xlu0 %v1066_v12, %s966_s24 }
  0xa4   : > { %467 = vrot.lane.b32.xlu2 %v1066_v12, %s967_s25 }
  0xac   : > { %564 = vrot.lane.b32.xlu2 %v1066_v12, %s968_s26 }
  0xb4   : > { %641 = vrot.lane.b32.xlu2 %v1066_v12, %s969_s9 }
  0xbc   : > { %562 = vrot.lane.b32.xlu2 %v1066_v12, %s970_s10 }
  0xc4   : > { %639 = vrot.lane.b32.xlu2 %v1066_v12, %s971_s11 }
  0xf6   : > { %v470_v14 = vpop.permute.xlu2 %469 }
  0xf7   : > { %v475_v15 = vsel %vm412_vm1, %v470_v14, 0 }
  0xf8   : > { %484 = vmatpush.bf16.xpose.msra.mxu3 %v475_v15 }
  0xfe   : > { %v468_v16 = vpop.permute.xlu2 %467 }
  0xff   : > { %864 = vmatmul.msk.bf16.vlgmr.msra.gmra.mxu3 %vm412_vm1, %v468_v16 }
 0x106   : > { %v565_v17 = vpop.permute.xlu2 %564 }
 0x107   : > { %v570_v18 = vsel %vm412_vm1, %v565_v17, 0 }
 0x108   : > { %579 = vmatpush.bf16.xpose.msrb.mxu3 %v570_v18 }
 0x10e   : > { %v642_v20 = vpop.permute.xlu2 %641  ;;  %v443_v21 = vpop.permute.xlu1 %442 }
 0x10f   : > { %v411_v22 = vpop.permute.xlu0 %410  ;;  %v449_v23 = vsel %vm447_vm2, %v443_v21, 0  ;;  %v647_v27 = vsel %vm412_vm1, %v642_v20, 0 }
 0x110   : > { %v417_v25 = vsel %vm412_vm1, %v411_v22, 0  ;;  %458 = vmatpush.bf16.msra.mxu2 %v449_v23 }
 0x111   : > { %426 = vmatpush.bf16.xpose.msra.mxu1 %v417_v25 }
 0x116   : > { %v563_v26 = vpop.permute.xlu2 %562 }
 0x117   : > { %868 = vmatmul.msk.bf16.vlgmr.msrb.gmra.mxu3 %vm412_vm1, %v563_v26 }
 0x118   : > { %862 = vmatmul.msk.bf16.vlgmr.msra.gmra.mxu1 %vm412_vm1, %v392_v10 }
 0x119   : > { %556 = vmatpush.bf16.msrb.mxu1 %v547_v24 }
 0x11d   : > { %656 = vmatpush.bf16.xpose.msra.mxu1 %v647_v27 }
 0x11e   : > { %v640_v43 = vpop.permute.xlu2 %639 }
 0x182   : > { %v486_v33 = vpop.f32.mrf.mxu3 }
 0x183   : > { %v487_v34 = vadd.f32 %v486_v33, %v1088_v32 }
 0x185   : > { %v490_v35 = vsel %vm412_vm1, %v487_v34, -inf }
 0x186   : > { %491 = vmax.xlane.f32.xlu2 %v490_v35 }
 0x18a   : > { %v488_v36 = vpop.f32.mrf.mxu3 }
 0x195   : > { %v428_v37 = vpop.f32.mrf.mxu1 }
 0x196   : > { %v429_v38 = vadd.f32 %v428_v37, %v1088_v32 }
 0x198   : > { %v432_v39 = vsel %vm412_vm1, %v429_v38, -inf }
 0x199   : > { %433 = vmax.xlane.f32.xlu0 %v432_v39 }
 0x19a   : > { %v581_v40 = vpop.f32.mrf.mxu3 }
 0x19b   : > { %v582_v55 = vadd.f32 %v581_v40, %v1088_v32 }
 0x19d   : > { %v430_v41 = vpop.f32.mrf.mxu1  ;;  %v585_v57 = vsel %vm412_vm1, %v582_v55, -inf }
 0x1a2   : > { %v583_v42 = vpop.f32.mrf.mxu3 }
 0x1ad   : > { %500 = vrot.lane.b32.xlu0 %v1066_v12, %s973_s15  ;;  %s345_s15 = scalar_lea.vmem %s1163_s8, %s851_s13 }
 0x1b5   : > { %595 = vrot.lane.b32.xlu0 %v1066_v12, %s974_s16 }
 0x1f9   : > { %v492_v44 = vpop.xlane.xlu2 %491 }
 0x1fa   : > { %v493_v45 = vsub.f32 %v487_v34, %v492_v44  ;;  %v405_v44 = vld [vmem:[%s1159_s4 + $0xc] sm:$0xf] }
 0x1fc   : > { %v494_v46 = vmul.f32 1.442695, %v493_v45  ;;  %v700_v45 = vsel %vm447_vm2, %v405_v44, 0 }
 0x1fe   : > { %920 = vpow2.f32 %v494_v46 }
 0x204   : > { %v921_v47 = vpop.eup %920 }
 0x205   : > { %v496_v48 = vsel %vm412_vm1, %v921_v47, 0.0  ;;  %v499_v61 = vpack.c.bf16 %v921_v47, %v921_v47 }
 0x206   : > { %497 = vadd.xlane.f32.xlu0 %v496_v48 }
 0x20c   : > { %v434_v49 = vpop.xlane.xlu0 %433 }
 0x20d   : > { %v435_v50 = vsub.f32 %v429_v38, %v434_v49 }
 0x20f   : > { %v436_v51 = vmul.f32 1.442695, %v435_v50 }
 0x211   : > { %922 = vpow2.f32 %v436_v51 }
 0x217   : > { %v923_v52 = vpop.eup %922 }
 0x218   : > { %v438_v53 = vsel %vm412_vm1, %v923_v52, 0.0  ;;  %v441_v54 = vpack.c.bf16 %v923_v52, %v923_v52 }
 0x219   : > { %439 = vadd.xlane.f32.xlu1 %v438_v53 }
 0x21a   : > { %863 = vmatmul.msk.bf16.vlgmr.msra.gmra.mxu2 %vm412_vm1, %v441_v54 }
 0x21f   : > { %v501_v56 = vpop.permute.xlu0 %500 }
 0x220   : > { %v506_v58 = vsel %vm447_vm2, %v501_v56, 0 }
 0x221   : > { %586 = vmax.xlane.f32.xlu1 %v585_v57  ;;  %515 = vmatpush.bf16.msrb.mxu2 %v506_v58 }
 0x227   : > { %v596_v59 = vpop.permute.xlu0 %595 }
 0x228   : > { %v601_v60 = vsel %vm447_vm2, %v596_v59, 0 }
 0x229   : > { %610 = vmatpush.bf16.msra.mxu2 %v601_v60 }
 0x22a   : > { %865 = vmatmul.msk.bf16.vlgmr.msrb.gmra.mxu2 %vm412_vm1, %v499_v61 }
 0x22d   : > { %709 = vmatpush.bf16.msrb.mxu2 %v700_v45 }
 0x279   : > { %v498_v11 = vpop.xlane.xlu0 %497 }
 0x28c   : > { %v440_v62 = vpop.xlane.xlu1 %439 }
 0x28d   : > { %924 = vrcp.f32 %v440_v62  ;;  %v976_v62 = vmov 32.0  }
 0x293   : > { %v925_v4 = vpop.eup %924 }
 0x294   : > { %v587_v1 = vpop.xlane.xlu1 %586 }
 0x295   : > { %v588_v2 = vsub.f32 %v582_v55, %v587_v1  ;;  %v917_v55 = vld [vmem:[%s1160_s5] ss:$0 sm:$0xff] }
 0x297   : > { %v589_v3 = vmul.f32 1.442695, %v588_v2 }
 0x299   : > { %926 = vpow2.f32 %v589_v3 }
 0x29a   : > { %928 = vrcp.f32 %v498_v11 }
 0x29d   : > { %v460_v6 = vpop.f32.mrf.mxu2 }
 0x29e   : > { %v465_v7 = vmul.f32 %v925_v4, %v460_v6 }
 0x29f   : > { %v927_v8 = vpop.eup %926 }
 0x2a0   : > { %v594_v9 = vpack.c.bf16 %v927_v8, %v927_v8  ;;  %v466_v10 = vpack.c.bf16 %v465_v7, %v465_v7  ;;  %v929_v14 = vpop.eup %928  ;;  %v591_v30 = vsel %vm412_vm1, %v927_v8, 0.0 }
 0x2a2   : > { %867 = vmatmul.msk.bf16.vlgmr.msrb.gmra.mxu1 %vm412_vm1, %v466_v10  ;;  %869 = vmatmul.msk.bf16.vlgmr.msra.gmra.mxu2 %vm412_vm1, %v594_v9 }
 0x2a5   : > { %v462_v13 = vpop.f32.mrf.mxu2 }
 0x2ad   : > { %v517_v15 = vpop.f32.mrf.mxu2 }
 0x2ae   : > { %v522_v16 = vmul.f32 %v929_v14, %v517_v15 }
 0x2b0   : > { %v523_v17 = vpack.c.bf16 %v522_v16, %v522_v16 }
 0x2b2   : > { %866 = vmatmul.msk.bf16.vlgmr.msrb.gmra.mxu0 %vm412_vm1, %v523_v17  ;;  %871 = vmatmul.msk.bf16.vlgmr.msra.gmra.mxu1 %vm412_vm1, %v640_v43 }
 0x2b5   : > { %v519_v18 = vpop.f32.mrf.mxu2 }
 0x31f   : > { %v558_v19 = vpop.f32.mrf.mxu1 }
 0x325   : > { %v612_v20 = vpop.f32.mrf.mxu2 }
 0x327   : > { %v560_v21 = vpop.f32.mrf.mxu1 }
 0x32d   : > { %v614_v22 = vpop.f32.mrf.mxu2 }
 0x32e   : > { %v919_v22 = vld [vmem:[%s1162_s7] ss:$0 sm:$0xff] }
 0x32f   : > { %v539_v23 = vpop.f32.mrf.mxu0  ;;  %v658_v24 = vpop.f32.mrf.mxu1 }
 0x330   : > { %v559_v25 = vadd.f32 %v558_v19, %v539_v23  ;;  %v659_v26 = vadd.f32 %v658_v24, %v1088_v32 }
 0x332   : > { %v662_v27 = vsel %vm412_vm1, %v659_v26, -inf }
 0x333   : > { %663 = vmax.xlane.f32.xlu1 %v662_v27 }
 0x337   : > { %v541_v28 = vpop.f32.mrf.mxu0  ;;  %v660_v29 = vpop.f32.mrf.mxu1 }
 0x34c   : > { %672 = vrot.lane.b32.xlu1 %v1066_v12, %s975_s19  ;;  %v404_v12 = vld [vmem:[%s1159_s4 + $0x8] sm:$0xf] }
 0x34d   : > { %v623_v39 = vsel %vm447_vm2, %v404_v12, 0 }
 0x34e   : > { %632 = vmatpush.bf16.msra.mxu0 %v623_v39 }
 0x376   : > { %592 = vadd.xlane.f32.xlu1 %v591_v30 }
 0x3a6   : > { %v664_v31 = vpop.xlane.xlu1 %663 }
 0x3a7   : > { %v665_v33 = vsub.f32 %v659_v26, %v664_v31 }
 0x3a9   : > { %v666_v34 = vmul.f32 1.442695, %v665_v33 }
 0x3ab   : > { %930 = vpow2.f32 %v666_v34 }
 0x3b1   : > { %v931_v35 = vpop.eup %930 }
 0x3b2   : > { %v668_v36 = vsel %vm412_vm1, %v931_v35, 0.0  ;;  %v671_v38 = vpack.c.bf16 %v931_v35, %v931_v35 }
 0x3b3   : > { %669 = vadd.xlane.f32.xlu2 %v668_v36 }
 0x3be   : > { %v673_v32 = vpop.permute.xlu1 %672 }
 0x3bf   : > { %v678_v37 = vsel %vm447_vm2, %v673_v32, 0 }
 0x3c0   : > { %687 = vmatpush.bf16.msra.mxu3 %v678_v37 }
 0x3c3   : > { %872 = vmatmul.msk.bf16.vlgmr.msra.gmra.mxu3 %vm412_vm1, %v671_v38 }
 0x3e9   : > { %v593_v40 = vpop.xlane.xlu1 %592 }
 0x3ea   : > { %932 = vrcp.f32 %v593_v40 }
 0x3f0   : > { %v933_v41 = vpop.eup %932 }
 0x3f1   : > { %v617_v42 = vmul.f32 %v933_v41, %v612_v20  ;;  %v918_v20 = vld [vmem:[%s1161_s6] ss:$0 sm:$0xff] }
 0x3f3   : > { %v618_v43 = vpack.c.bf16 %v617_v42, %v617_v42 }
 0x3f5   : > { %870 = vmatmul.msk.bf16.vlgmr.msra.gmra.mxu0 %vm412_vm1, %v618_v43 }
 0x426   : > { %v670_v46 = vpop.xlane.xlu2 %669 }
 0x427   : > { %934 = vrcp.f32 %v670_v46 }
 0x428   : > { %936 = vrcp.f32 %v976_v62 }
 0x42d   : > { %v935_v47 = vpop.eup %934 }
 0x42e   : > { %v937_v63 = vpop.eup %936 }
 0x42f   : > { %v727_v0 = vmul.f32 32.0, %v937_v63  ;;  %vm731_vm4 = vweird.f32 %v937_v63 }
 0x431   : > { %v728_v1 = vsub.f32 1.0, %v727_v0 }
 0x433   : > { %v729_v2 = vmul.f32 %v937_v63, %v728_v1 }
 0x435   : > { %v730_v3 = vadd.f32 %v937_v63, %v729_v2 }
 0x437   : > { %v732_v4 = vsel %vm731_vm4, %v937_v63, %v730_v3 }
 0x446   : > { %v689_v48 = vpop.f32.mrf.mxu3 }
 0x447   : > { %v694_v49 = vmul.f32 %v935_v47, %v689_v48 }
 0x449   : > { %v695_v50 = vpack.c.bf16 %v694_v49, %v694_v49 }
 0x44b   : > { %873 = vmatmul.msk.bf16.vlgmr.msrb.gmra.mxu2 %vm412_vm1, %v695_v50 }
 0x44e   : > { %v691_v51 = vpop.f32.mrf.mxu3 }
 0x472   : > { %v634_v52 = vpop.f32.mrf.mxu0 }
 0x473   : > { %v638_v53 = vadd.f32 %v634_v52, %v559_v25 }
 0x47a   : > { %v636_v54 = vpop.f32.mrf.mxu0 }
 0x4ce   : > { %v711_v56 = vpop.f32.mrf.mxu2 }
 0x4cf   : > { %v715_v57 = vadd.f32 %v711_v56, %v638_v53 }
 0x4d1   : > { %v719_v58 = vadd.f32 %v917_v55, %v715_v57 }
 0x4d3   : > { %v720_v59 = vadd.f32 %v719_v58, %v1058_v5 }
 0x4d5   : > { %v723_v60 = vsel %vm375_vm0, %v720_v59, 0.0 }
 0x4d6   : > { %v713_v61 = vpop.f32.mrf.mxu2  ;;  %724 = vadd.xlane.f32.xlu2 %v723_v60 }
 0x549   : > { %v725_v6 = vpop.xlane.xlu2 %724 }
 0x54a   : > { %v733_v7 = vmul.f32 %v732_v4, %v725_v6 }
 0x54c   : > { %v734_v8 = vsub.f32 %v720_v59, %v733_v7 }
 0x54e   : > { %v735_v9 = vmul.f32 %v734_v8, %v734_v8 }
 0x550   : > { %v736_v10 = vsel %vm375_vm0, %v735_v9, 0.0 }
 0x551   : > { %737 = vadd.xlane.f32.xlu2 %v736_v10 }
 0x5c4   : > { %v738_v5 = vpop.xlane.xlu2 %737 }
 0x5c5   : > { %v739_v11 = vmul.f32 %v738_v5, %v732_v4 }
 0x5c7   : > { %v740_v13 = vadd.f32 1e-05, %v739_v11 }
 0x5c9   : > { %938 = vrsqrt.f32 %v740_v13  ;;  %vm747_vm6 = vweird.f32 %v740_v13 }
 0x5cf   : > { %v939_v14 = vpop.eup %938 }
 0x5d0   : > { %v742_v15 = vmul.f32 %v939_v14, %v740_v13  ;;  %vm748_vm5 = vweird.f32 %v939_v14 }
 0x5d1   : > { %vm749_vm7 = vmor %vm747_vm6, %vm748_vm5 }
 0x5d2   : > { %v743_v16 = vmul.f32 %v939_v14, %v742_v15 }
 0x5d4   : > { %v744_v17 = vmul.f32 0.5, %v743_v16 }
 0x5d6   : > { %v745_v18 = vsub.f32 1.5, %v744_v17 }
 0x5d8   : > { %v746_v19 = vmul.f32 %v939_v14, %v745_v18 }
 0x5da   : > { %v750_v21 = vsel %vm749_vm7, %v939_v14, %v746_v19 }
 0x5db   : > { %v751_v23 = vmul.f32 %v750_v21, %v734_v8 }
 0x5dd   : > { %v755_v24 = vmul.f32 %v918_v20, %v751_v23 }
 0x5df   : > { %v759_v25 = vadd.f32 %v919_v22, %v755_v24 }
 0x5e1   : > { %v760_v26 = vpack.c.bf16 %v759_v25, %v759_v25 }
 0x5e3   : > { %762 = vst.msk [vmem:[%s345_s15] sm:$0xf] %vm761_vm8, %v760_v26 }
 0x5e4 PF: > { %s18_s29 = sadd.s32 1, %s962_s29   ;;  %s1164_s27 = smov %s958_s28 }
 0x5e5   : > { %p15_p5 = scmp.ge.s32.totalorder %s18_s29, 4   ;;  %s1165_s28 = smov %s1167_s30 }
 0x5e7   :  { %17 = sbr.rel (!%p15_p5) target bundleno = 2 (0x2), region = 85 }

// kernel: custom_transformer_decoder.11
= control target key start
LH: loop header
LB: loop body
LE: loop exit
PB: predicated region body
PF: predicated region fallthrough
CT: control target
= control target key end

     0   :  { %vm60_vm0 = vcmask 261120   ;;  %vm113_vm1 = vcmask 523264   ;;  %v341_v29 = vmov 32.0   ;;  %s463_s1 = inlined_call_operand.vmem [shape: bf16[32,64], index: 1, kind: input, shape index: {}]   ;;  %s464_s2 = inlined_call_operand.vmem [shape: f32[1,64], index: 2, kind: input, shape index: {}]   ;;  %s465_s0 = inlined_call_operand.vmem [shape: bf16[16,32], index: 0, kind: input, shape index: {}]   ;;  %s466_s3 = inlined_call_operand.vmem [shape: bf16[64,32], index: 3, kind: input, shape index: {}]   ;;  %s467_s4 = inlined_call_operand.vmem [shape: f32[1,32], index: 4, kind: input, shape index: {}]   ;;  %s468_s5 = inlined_call_operand.vmem [shape: f32[1,32], index: 5, kind: input, shape index: {}]   ;;  %s469_s6 = inlined_call_operand.vmem [shape: f32[1,32], index: 6, kind: input, shape index: {}]   ;;  %s470_s7 = inlined_call_operand.vmem [shape: f32[1,32], index: 7, kind: input, shape index: {}]   ;;  %s471_s8 = inlined_call_operand.vmem [shape: f32[1,32], index: 8, kind: input, shape index: {}]   ;;  %s472_s9 = inlined_call_operand.vmem [shape: f32[16,32], index: 9, kind: output, shape index: {}]  }
   0x1   :  { %v319_v0 = vld [vmem:[%s463_s1 + $0x8] sm:$0xff]  ;;  %v318_v1 = vld [vmem:[%s463_s1] sm:$0xff]  ;;  %v323_v3 = vld [vmem:[%s466_s3 + $0x18] sm:$0xff]  ;;  %331 = vrcp.f32 %v341_v29 }
   0x2   :  { %70 = vmatpush.bf16.msra.mxu0 %v319_v0  ;;  %v317_v2 = vld [vmem:[%s465_s0] sm:$0xff]  ;;  %121 = vmatpush.bf16.msra.mxu1 %v323_v3  ;;  %v322_v4 = vld [vmem:[%s466_s3 + $0x10] sm:$0xff]  ;;  %v321_v5 = vld [vmem:[%s466_s3 + $0x8] sm:$0xff] }
   0x3   :  { %v320_v6 = vld [vmem:[%s466_s3] sm:$0xff] }
   0x4   :  { %v325_v8 = vld [vmem:[%s464_s2] ss:$0 sm:$0xff] }
   0x5   :  { %v33_v16 = vld [vmem:[%s465_s0] sm:$0xff]  }
   0x6   :  { %71 = vmatpush.bf16.msra.mxu0 %v318_v1  ;;  %122 = vmatpush.bf16.msra.mxu1 %v322_v4  ;;  %v150_v17 = vunpack.c.l.bf16 %v33_v16  ;;  %v326_v18 = vld [vmem:[%s467_s4] ss:$0 sm:$0xff]  ;;  %v151_v24 = vunpack.c.h.bf16 %v33_v16 }
   0x7   :  { %v332_v30 = vpop.eup %331  ;;  %v327_v60 = vld [vmem:[%s468_s5] ss:$0 sm:$0xff] }
   0x8   :  { %v171_v31 = vmul.f32 32.0, %v332_v30  ;;  %vm175_vm2 = vweird.f32 %v332_v30  ;;  %v328_v0 = vld [vmem:[%s469_s6] ss:$0 sm:$0xff] }
   0x9   :  { %299 = vmatmul.msk.bf16.vlgmr.msra.gmra.mxu0 %vm60_vm0, %v317_v2 }
   0xa   :  { %123 = vmatpush.bf16.msra.mxu1 %v321_v5  ;;  %v172_v32 = vsub.f32 1.0, %v171_v31 }
   0xc   :  { %v173_v33 = vmul.f32 %v332_v30, %v172_v32 }
   0xe   :  { %124 = vmatpush.bf16.msra.mxu1 %v320_v6  ;;  %v174_v34 = vadd.f32 %v332_v30, %v173_v33 }
  0x10   :  { %v427_v35 = vsel %vm175_vm2, %v332_v30, %v174_v34 }
  0x86   :  { %v73_v7 = vpop.f32.mrf.mxu0 }
  0x87   :  { %v74_v9 = vadd.f32 %v325_v8, %v73_v7 }
  0x89   :  { %v78_v12 = vmax.f32 %v74_v9, 0.0 }
  0x8e   :  { %v75_v10 = vpop.f32.mrf.mxu0 }
  0x8f   :  { %v76_v11 = vadd.f32 %v325_v8, %v75_v10 }
  0x91   :  { %v79_v13 = vmax.f32 %v76_v11, 0.0 }
  0x93   :  { %v80_v14 = vpack.c.bf16 %v79_v13, %v78_v12 }
  0x95   :  { %316 = vmatmul.msk.bf16.vlgmr.msra.gmra.mxu1 %vm113_vm1, %v80_v14 }
 0x112   :  { %v126_v15 = vpop.f32.mrf.mxu1 }
 0x113   :  { %135 = vst.msk [vmem:[#allocation2] sm:$0xff] %vm60_vm0, %v126_v15 }
 0x11a   :  { %v128_v19 = vpop.f32.mrf.mxu1  ;;  %v152_v20 = vld [vmem:[#allocation2] sm:$0xff] }
 0x11b   :  { %136 = vst.msk [vmem:[#allocation2 + $0x8] sm:$0xff] %vm60_vm0, %v128_v19  ;;  %v154_v21 = vadd.f32 %v152_v20, %v150_v17 }
 0x11d   :  { %v160_v22 = vadd.f32 %v326_v18, %v154_v21 }
 0x11f   :  { %v164_v23 = vsel %vm60_vm0, %v160_v22, 0.0 }
 0x120   :  { %165 = vadd.xlane.f32.xlu0 %v164_v23 }
 0x122   :  { %v153_v25 = vld [vmem:[#allocation2 + $0x8] sm:$0xff] }
 0x123   :  { %v155_v26 = vadd.f32 %v153_v25, %v151_v24 }
 0x125   :  { %v161_v27 = vadd.f32 %v326_v18, %v155_v26 }
 0x127   :  { %v167_v28 = vsel %vm60_vm0, %v161_v27, 0.0 }
 0x128   :  { %168 = vadd.xlane.f32.xlu0 %v167_v28 }
 0x193   :  { %v166_v36 = vpop.xlane.xlu0 %165 }
 0x194   :  { %v177_v37 = vmul.f32 %v427_v35, %v166_v36 }
 0x196   :  { %v179_v38 = vsub.f32 %v160_v22, %v177_v37  ;;  %v329_v37 = vld [vmem:[%s470_s7] ss:$0 sm:$0xff] }
 0x198   :  { %v181_v39 = vmul.f32 %v179_v38, %v179_v38 }
 0x19a   :  { %v183_v40 = vsel %vm60_vm0, %v181_v39, 0.0 }
 0x19b   :  { %184 = vadd.xlane.f32.xlu1 %v183_v40  ;;  %v169_v41 = vpop.xlane.xlu0 %168 }
 0x19c   :  { %v178_v42 = vmul.f32 %v427_v35, %v169_v41 }
 0x19e   :  { %v180_v43 = vsub.f32 %v161_v27, %v178_v42 }
 0x1a0   :  { %v182_v44 = vmul.f32 %v180_v43, %v180_v43 }
 0x1a2   :  { %v186_v45 = vsel %vm60_vm0, %v182_v44, 0.0 }
 0x1a3   :  { %187 = vadd.xlane.f32.xlu1 %v186_v45 }
 0x20e   :  { %v185_v46 = vpop.xlane.xlu1 %184 }
 0x20f   :  { %v189_v47 = vmul.f32 %v185_v46, %v427_v35 }
 0x211   :  { %v191_v48 = vadd.f32 1e-05, %v189_v47 }
 0x213   :  { %333 = vrsqrt.f32 %v191_v48  ;;  %vm199_vm4 = vweird.f32 %v191_v48 }
 0x216   :  { %v188_v49 = vpop.xlane.xlu1 %187 }
 0x217   :  { %v190_v50 = vmul.f32 %v188_v49, %v427_v35 }
 0x219   :  { %v334_v51 = vpop.eup %333  ;;  %v192_v52 = vadd.f32 1e-05, %v190_v50 }
 0x21a   :  { %v194_v53 = vmul.f32 %v334_v51, %v191_v48  ;;  %vm200_vm3 = vweird.f32 %v334_v51 }
 0x21b   :  { %335 = vrsqrt.f32 %v192_v52  ;;  %vm201_vm5 = vmor %vm199_vm4, %vm200_vm3  ;;  %vm209_vm7 = vweird.f32 %v192_v52 }
 0x21c   :  { %v195_v54 = vmul.f32 %v334_v51, %v194_v53 }
 0x21e   :  { %v196_v55 = vmul.f32 0.5, %v195_v54 }
 0x220   :  { %v197_v56 = vsub.f32 1.5, %v196_v55 }
 0x221   :  { %v336_v57 = vpop.eup %335 }
 0x222   :  { %v198_v58 = vmul.f32 %v334_v51, %v197_v56  ;;  %v204_v59 = vmul.f32 %v336_v57, %v192_v52  ;;  %vm210_vm6 = vweird.f32 %v336_v57 }
 0x223   :  { %vm211_vm8 = vmor %vm209_vm7, %vm210_vm6 }
 0x224   :  { %v205_v61 = vmul.f32 %v336_v57, %v204_v59  ;;  %v202_v62 = vsel %vm201_vm5, %v334_v51, %v198_v58 }
 0x225   :  { %v213_v63 = vmul.f32 %v202_v62, %v179_v38 }
 0x226   :  { %v206_v1 = vmul.f32 0.5, %v205_v61 }
 0x227   :  { %v218_v2 = vmul.f32 %v327_v60, %v213_v63 }
 0x228   :  { %v207_v3 = vsub.f32 1.5, %v206_v1 }
 0x229   :  { %v223_v4 = vadd.f32 %v328_v0, %v218_v2 }
 0x22a   :  { %v208_v5 = vmul.f32 %v336_v57, %v207_v3 }
 0x22b   :  { %v227_v6 = vsel %vm60_vm0, %v223_v4, 0.0 }
 0x22c   :  { %228 = vadd.xlane.f32.xlu2 %v227_v6  ;;  %v212_v7 = vsel %vm211_vm8, %v336_v57, %v208_v5 }
 0x22d   :  { %v214_v8 = vmul.f32 %v212_v7, %v180_v43 }
 0x22f   :  { %v219_v9 = vmul.f32 %v327_v60, %v214_v8 }
 0x231   :  { %v224_v10 = vadd.f32 %v328_v0, %v219_v9 }
 0x233   :  { %v230_v11 = vsel %vm60_vm0, %v224_v10, 0.0 }
 0x234   :  { %231 = vadd.xlane.f32.xlu2 %v230_v11 }
 0x29f   :  { %v229_v12 = vpop.xlane.xlu2 %228 }
 0x2a0   :  { %v233_v13 = vmul.f32 %v229_v12, %v427_v35 }
 0x2a2   :  { %v235_v14 = vsub.f32 %v223_v4, %v233_v13 }
 0x2a4   :  { %v237_v15 = vmul.f32 %v235_v14, %v235_v14 }
 0x2a6   :  { %v239_v16 = vsel %vm60_vm0, %v237_v15, 0.0 }
 0x2a7   :  { %240 = vadd.xlane.f32.xlu0 %v239_v16  ;;  %v232_v17 = vpop.xlane.xlu2 %231 }
 0x2a8   :  { %v234_v18 = vmul.f32 %v232_v17, %v427_v35 }
 0x2aa   :  { %v236_v19 = vsub.f32 %v224_v10, %v234_v18 }
 0x2ac   :  { %v238_v20 = vmul.f32 %v236_v19, %v236_v19 }
 0x2ae   :  { %v242_v21 = vsel %vm60_vm0, %v238_v20, 0.0 }
 0x2af   :  { %243 = vadd.xlane.f32.xlu1 %v242_v21 }
 0x31a   :  { %v241_v22 = vpop.xlane.xlu0 %240 }
 0x31b   :  { %v245_v23 = vmul.f32 %v241_v22, %v427_v35 }
 0x31d   :  { %v247_v24 = vadd.f32 1e-05, %v245_v23 }
 0x31f   :  { %337 = vrsqrt.f32 %v247_v24  ;;  %vm255_vm10 = vweird.f32 %v247_v24 }
 0x322   :  { %v244_v25 = vpop.xlane.xlu1 %243 }
 0x323   :  { %v246_v26 = vmul.f32 %v244_v25, %v427_v35  ;;  %v330_v35 = vld [vmem:[%s471_s8] ss:$0 sm:$0xff] }
 0x325   :  { %v338_v27 = vpop.eup %337  ;;  %v248_v28 = vadd.f32 1e-05, %v246_v26 }
 0x326   :  { %v250_v29 = vmul.f32 %v338_v27, %v247_v24  ;;  %vm256_vm9 = vweird.f32 %v338_v27 }
 0x327   :  { %339 = vrsqrt.f32 %v248_v28  ;;  %vm257_vm11 = vmor %vm255_vm10, %vm256_vm9  ;;  %vm265_vm13 = vweird.f32 %v248_v28 }
 0x328   :  { %v251_v30 = vmul.f32 %v338_v27, %v250_v29 }
 0x32a   :  { %v252_v31 = vmul.f32 0.5, %v251_v30 }
 0x32c   :  { %v253_v32 = vsub.f32 1.5, %v252_v31 }
 0x32d   :  { %v340_v33 = vpop.eup %339 }
 0x32e   :  { %v254_v34 = vmul.f32 %v338_v27, %v253_v32  ;;  %v260_v36 = vmul.f32 %v340_v33, %v248_v28  ;;  %vm266_vm12 = vweird.f32 %v340_v33 }
 0x32f   :  { %vm267_vm14 = vmor %vm265_vm13, %vm266_vm12 }
 0x330   :  { %v258_v38 = vsel %vm257_vm11, %v338_v27, %v254_v34  ;;  %v261_v39 = vmul.f32 %v340_v33, %v260_v36 }
 0x331   :  { %v269_v40 = vmul.f32 %v258_v38, %v235_v14 }
 0x332   :  { %v262_v41 = vmul.f32 0.5, %v261_v39 }
 0x333   :  { %v274_v42 = vmul.f32 %v329_v37, %v269_v40 }
 0x334   :  { %v263_v43 = vsub.f32 1.5, %v262_v41 }
 0x335   :  { %v279_v44 = vadd.f32 %v330_v35, %v274_v42 }
 0x336   :  { %v264_v45 = vmul.f32 %v340_v33, %v263_v43 }
 0x337   :  { %281 = vst.msk [vmem:[%s472_s9] sm:$0xff] %vm60_vm0, %v279_v44 }
 0x338   :  { %v268_v46 = vsel %vm267_vm14, %v340_v33, %v264_v45 }
 0x339   :  { %v270_v47 = vmul.f32 %v268_v46, %v236_v19 }
 0x33b   :  { %v275_v48 = vmul.f32 %v329_v37, %v270_v47 }
 0x33d   :  { %v280_v49 = vadd.f32 %v330_v35, %v275_v48 }
 0x33f   :  { %282 = vst.msk [vmem:[%s472_s9 + $0x8] sm:$0xff] %vm60_vm0, %v280_v49 }

// kernel: custom_transformer_decoder.10
= control target key start
LH: loop header
LB: loop body
LE: loop exit
PB: predicated region body
PF: predicated region fallthrough
CT: control target
= control target key end

     0   :  { %s1803_s0 = inlined_call_operand.vmem [shape: bf16[2,8,32], index: 0, kind: input, shape index: {}]   ;;  %s1804_s1 = inlined_call_operand.vmem [shape: bf16[2,16,32], index: 1, kind: input, shape index: {}]   ;;  %s1805_s2 = inlined_call_operand.hbm [shape: bf16[32,32], index: 2, kind: input, shape index: {}]   ;;  %s1806_s3 = inlined_call_operand.vmem [shape: f32[1,32], index: 3, kind: input, shape index: {}]   ;;  %s1807_s4 = inlined_call_operand.hbm [shape: bf16[32,64], index: 4, kind: input, shape index: {}]   ;;  %s1808_s5 = inlined_call_operand.hbm [shape: f32[1,64], index: 5, kind: input, shape index: {}]   ;;  %s1809_s6 = inlined_call_operand.hbm [shape: bf16[32,32], index: 6, kind: input, shape index: {}]   ;;  %s1810_s7 = inlined_call_operand.hbm [shape: f32[1,32], index: 7, kind: input, shape index: {}]   ;;  %s1811_s8 = inlined_call_operand.hbm [shape: f32[1,32], index: 8, kind: input, shape index: {}]   ;;  %s1812_s9 = inlined_call_operand.hbm [shape: f32[1,32], index: 9, kind: input, shape index: {}]   ;;  %s1813_s10 = inlined_call_operand.vmem [shape: bf16[2,8,32], index: 10, kind: output, shape index: {}]  }
   0x1   :  { %1814 = sst [smem:[#allocation17_spill]] %s1805_s2 }
   0x2   :  { %1815 = sst [smem:[#allocation18_spill]] %s1807_s4 }
   0x3   :  { %15 = vsyncpa [#allocation3], 0 }
   0x4   :  { %16 = vsyncpa [#allocation5], 0 }
   0x5   :  { %17 = vsyncpa [#allocation8], 0 }
   0x6   :  { %18 = vsyncpa [#allocation11], 0  ;;  %s1631_s13 = smov 0   ;;  %s1633_s14 = smov 0  }
   0x7   :  { %s1635_s15 = smov 0  }
   0x8 LB: > { %s1114_s16 = sadd.s32 4294967295, %s1557_s15   ;;  %p1116_p0 = scmp.ge.s32.totalorder %s1557_s15, 1  ;;  %s1557_s15 = sphi %s1635_s15, %s24_s15   ;;  %s1553_s14 = sphi %s1633_s14, %s1822_s14   ;;  %s1549_s13 = sphi %s1631_s13, %s1821_s13  }
   0x9   : > { %p291_p1 = scmp.lt.s32.totalorder %s1557_s15, 3  ;;  %p1649_p2 = scmp.eq.s32.totalorder %s1114_s16, 0 }
   0xa   : > { %s1817_s4 = sld [smem:[#allocation18_spill]]  ;;  %s345_s24 = sshll.u32 %s1809_s6, 4  ;;  %s346_s24 = int_to_ptr.hbm [resolvable:$true] %s345_s24 }
   0xb   : > { %p1656_p3 = pnand %p1116_p0, %p291_p1  ;;  %s1559_s25 = smov [#allocation4]  }
   0xc   : > { %s321_s26 = sshll.u32 %s1559_s25, 4  ;;  %s1560_s28 = smov [#allocation7]   ;;  %s322_s26 = int_to_ptr.vmem [resolvable:$true] %s321_s26 }
   0xd   : > { %p1207_p4 = pneg %p1656_p3  ;;  %s347_s29 = sshll.u32 %s1560_s28, 4  ;;  %s348_s29 = int_to_ptr.vmem [resolvable:$true] %s347_s29 }
   0xe   : > { %s372_s12 = sshll.u32 %s1811_s8, 4  ;;  %s1561_s16 = smov 64   ;;  %s373_s12 = int_to_ptr.hbm [resolvable:$true] %s372_s12 }
   0xf   : > { %p1667_p5 = pnand %p1649_p2, %p1207_p4  ;;  %s1562_s18 = smov 4  }
  0x10   : > { %s319_s20 = sshll.u32 %s1817_s4, 4  ;;  %s1563_s19 = smov [#allocation10]   ;;  %s320_s20 = int_to_ptr.hbm [resolvable:$true] %s319_s20 }
  0x11   : > { %1213 = dma.hbm_to_vmem [thread:$0]  (!%p1667_p5), %s320_s20, 256, %s322_s26, [#allocation5], %s1561_s16, %s1561_s16, %s1562_s18  }
  0x12   : > { %1219 = dma.hbm_to_vmem [thread:$0]  (!%p1667_p5), %s346_s24, 256, %s348_s29, [#allocation8], %s1561_s16, %s1561_s16, %s1562_s18  }
  0x13   : > { %s374_s22 = sshll.u32 %s1563_s19, 4  ;;  %s36_s23 = sadd.s32 1, %s1553_s14  ;;  %s375_s22 = int_to_ptr.vmem [resolvable:$true] %s374_s22 }
  0x14   : > { %1225 = dma.hbm_to_vmem [thread:$0]  (!%p1667_p5), %s373_s12, 16, %s375_s22, [#allocation11]  }
  0x15   : > { %s1820_s2 = sld [smem:[#allocation17_spill]]  ;;  %p38_p6 = scmp.ge.s32.totalorder %s36_s23, 2 }
  0x16   : > { %s334_s20 = sshll.u32 %s1808_s5, 4  ;;  %s1564_s24 = smov [#allocation2]   ;;  %s335_s20 = int_to_ptr.hbm [resolvable:$true] %s334_s20 }
  0x17   : > { %s1824_s23 = smov (%p38_p6, %s36_s23), 0  ;;  %s304_s26 = sshll.u32 %s1564_s24, 4  ;;  %s305_s26 = int_to_ptr.vmem [resolvable:$true] %s304_s26 }
  0x18   : > { %s1565_s29 = smov [#allocation6]   ;;  %s360_s25 = sshll.u32 %s1810_s7, 4  ;;  %s361_s25 = int_to_ptr.hbm [resolvable:$true] %s360_s25 }
  0x19   : > { %s336_s12 = sshll.u32 %s1565_s29, 4  ;;  %s384_s11 = sshll.u32 %s1812_s9, 4  ;;  %s337_s12 = int_to_ptr.vmem [resolvable:$true] %s336_s12  ;;  %s385_s11 = int_to_ptr.hbm [resolvable:$true] %s384_s11 }
  0x1a   : > { %1216 = dma.hbm_to_vmem [thread:$0]  (!%p1667_p5), %s335_s20, 16, %s337_s12, [#allocation5]  }
  0x1b   : > { %s302_s30 = sshll.u32 %s1820_s2, 4  ;;  %s1566_s24 = smov [#allocation9]   ;;  %s303_s30 = int_to_ptr.hbm [resolvable:$true] %s302_s30 }
  0x1c   : > { %1210 = dma.hbm_to_vmem [thread:$0]  (!%p1667_p5), %s303_s30, 256, %s305_s26, [#allocation3], %s1561_s16, %s1561_s16, %s1562_s18  }
  0x1d   : > { %s362_s2 = sshll.u32 %s1566_s24, 4  ;;  %s1567_s16 = smov [#allocation12]   ;;  %s363_s2 = int_to_ptr.vmem [resolvable:$true] %s362_s2 }
  0x1e   : > { %1222 = dma.hbm_to_vmem [thread:$0]  (!%p1667_p5), %s361_s25, 16, %s363_s2, [#allocation8]  }
  0x1f   : > { %s386_s18 = sshll.u32 %s1567_s16, 4  ;;  %417 = sbr.rel (%p1656_p3) target bundleno = 1430 (0x596), region = 60  ;;  %s387_s18 = int_to_ptr.vmem [resolvable:$true] %s386_s18 }
  0x20   : > { %1228 = dma.hbm_to_vmem [thread:$0]  (!%p1667_p5), %s385_s11, 16, %s387_s18, [#allocation11]  }
  0x24   : > { %1532 = dma.done.wait (%p1649_p2), [#allocation3], 256  }
  0x25   : > { %1534 = vsyncadd (%p1649_p2), [#allocation3], 4294967040 }
  0x26   : > { %1536 = dma.done.wait (%p1649_p2), [#allocation5], 272  }
  0x27   : > { %1538 = vsyncadd (%p1649_p2), [#allocation5], 4294967024 }
  0x28   : > { %1540 = dma.done.wait (%p1649_p2), [#allocation8], 272  }
  0x29   : > { %1542 = vsyncadd (%p1649_p2), [#allocation8], 4294967024 }
  0x2a   : > { %1544 = dma.done.wait (%p1649_p2), [#allocation11], 32  }
  0x2b   : > { %1546 = vsyncadd (%p1649_p2), [#allocation11], 4294967264  ;;  %p495_p7 = scmp.lt.s32.totalorder %s1549_s13, 1  ;;  %v1175_v0 = vld [vmem:[#allocation2 + $0x8] sm:$0xff]  ;;  %v1178_v1 = vld [vmem:[#allocation4 + $0x8] sm:$0xff]  ;;  %vm537_vm0 = vcmask 261120  }
  0x2c   : > { %v1174_v2 = vld [vmem:[#allocation2] sm:$0xff]  ;;  %547 = vmatpush.bf16.msra.mxu0 %v1175_v0  ;;  %591 = vmatpush.bf16.msra.mxu1 %v1178_v1  ;;  %v1177_v3 = vld [vmem:[#allocation4] sm:$0xff]  ;;  %s1568_s22 = smov 120   ;;  %vm611_vm1 = vcmask 64512   ;;  %s1569_s25 = smov 104   ;;  %vm725_vm2 = vcmask 1043456  }
  0x2d   : > { %s1826_s13 = smov (!%p495_p7, %s1549_s13), 1  ;;  %v1284_v6 = vld [vmem:[%s1806_s3] ss:$0 sm:$0xff]  ;;  %s1570_s4 = smov 112   ;;  %v601_v24 = vld [vmem:[#allocation7] sm:$0xf] }
  0x2e   : > { %s1173_s2 = sshll.u32 %s1826_s13, 3  ;;  %s1133_s21 = sshll.u32 %s1826_s13, 2  ;;  %v1285_v10 = vld [vmem:[#allocation6] ss:$0 sm:$0xff]  ;;  %v746_v25 = vsel %vm725_vm2, %v601_v24, 0  ;;  %vm631_vm3 = vcmask 130048  }
  0x2f   : > { %s506_s17 = scalar_lea.vmem %s1804_s1, %s1173_s2  ;;  %s501_s29 = scalar_lea.vmem %s1803_s0, %s1133_s21  ;;  %vm956_vm8 = vcmask 257024  }
  0x30   : > { %v1176_v4 = vld [vmem:[%s506_s17] sm:$0xff]  ;;  %548 = vmatpush.bf16.msra.mxu0 %v1174_v2  ;;  %592 = vmatpush.bf16.msra.mxu1 %v1177_v3  ;;  %s1571_s28 = smov 96   ;;  %s1572_s11 = smov 88  }
  0x31   : > { %v1735_v5 = vld [vmem:[%s501_s29] sm:$0xf]  ;;  %s1573_s24 = smov 72   ;;  %s1574_s16 = smov 80  }
  0x32   : > { %s513_s27 = scalar_lea.vmem %s1813_s10, %s1133_s21 }
  0x33   : > { %1145 = vmatmul.msk.bf16.vlgmr.msra.gmra.mxu0 %vm537_vm0, %v1735_v5  ;;  %1158 = vmatmul.msk.bf16.vlgmr.msra.gmra.mxu1 %vm537_vm0, %v1176_v4 }
  0xb0   : > { %v550_v7 = vpop.f32.mrf.mxu0  ;;  %v594_v8 = vpop.f32.mrf.mxu1 }
  0xb1   : > { %v551_v9 = vadd.f32 %v1284_v6, %v550_v7  ;;  %v595_v13 = vadd.f32 %v1285_v10, %v594_v8 }
  0xb3   : > { %v554_v11 = vpack.c.bf16 %v551_v9, %v551_v9  ;;  %v599_v17 = vpack.c.bf16 %v595_v13, %v595_v13 }
  0xb5   : > { %v665_v12 = vunpack.c.l.b16 %v554_v11  ;;  %v608_v20 = vunpack.c.l.b16 %v599_v17 }
  0xb7   : > { %v666_v14 = vpack.c.b16 %v665_v12, %v665_v12 }
  0xb8   : > { %v596_v15 = vpop.f32.mrf.mxu1  ;;  %v552_v16 = vpop.f32.mrf.mxu0 }
  0xb9   : > { %v597_v18 = vadd.f32 %v1285_v10, %v596_v15  ;;  %667 = vrot.lane.b32.xlu2 %v666_v14, %s1568_s22 }
  0xbb   : > { %v600_v19 = vpack.c.bf16 %v597_v18, %v597_v18 }
  0xbd   : > { %v609_v21 = vunpack.c.l.b16 %v600_v19 }
  0xbf   : > { %v1744_v22 = vpack.c.b16 %v609_v21, %v608_v20  ;;  %v602_v20 = vld [vmem:[#allocation7 + $0x4] sm:$0xf] }
  0xc0   : > { %v727_v21 = vsel %vm725_vm2, %v602_v20, 0 }
  0xc1   : > { %838 = vrot.lane.b32.xlu2 %v1744_v22, %s1569_s25  ;;  %v616_v23 = vsel %vm611_vm1, %v1744_v22, 0  ;;  %736 = vmatpush.bf16.msrb.mxu1 %v727_v21 }
  0xc2   : > { %625 = vmatpush.bf16.xpose.msra.mxu2 %v616_v23 }
  0xc9   : > { %763 = vrot.lane.b32.xlu2 %v1744_v22, %s1570_s4  ;;  %1159 = vmatmul.msk.bf16.vlgmr.msra.gmra.mxu2 %vm611_vm1, %v554_v11 }
  0xca   : > { %755 = vmatpush.bf16.msrb.mxu2 %v746_v25  ;;  %v603_v25 = vld [vmem:[#allocation7 + $0x8] sm:$0xf] }
  0xd1   : > { %836 = vrot.lane.b32.xlu2 %v666_v14, %s1569_s25 }
 0x113   : > { %v668_v26 = vpop.permute.xlu2 %667 }
 0x11b   : > { %v839_v27 = vpop.permute.xlu2 %838 }
 0x11c   : > { %v844_v28 = vsel %vm611_vm1, %v839_v27, 0 }
 0x11d   : > { %853 = vmatpush.bf16.xpose.msra.mxu2 %v844_v28 }
 0x123   : > { %v764_v40 = vpop.permute.xlu2 %763 }
 0x124   : > { %v769_v44 = vsel %vm611_vm1, %v764_v40, 0 }
 0x12b   : > { %v837_v50 = vpop.permute.xlu2 %836 }
 0x14c   : > { %v627_v29 = vpop.f32.mrf.mxu2 }
 0x14d   : > { %v632_v30 = vsel %vm631_vm3, %v627_v29, -inf }
 0x14e   : > { %633 = vmax.xlane.f32.xlu0 %v632_v30 }
 0x154   : > { %v629_v31 = vpop.f32.mrf.mxu2 }
 0x162   : > { %642 = vrot.lane.b32.xlu0 %v1744_v22, %s1571_s28 }
 0x16a   : > { %761 = vrot.lane.b32.xlu0 %v666_v14, %s1570_s4 }
 0x1c1   : > { %v634_v32 = vpop.xlane.xlu0 %633 }
 0x1c2   : > { %v635_v33 = vsub.f32 %v627_v29, %v634_v32 }
 0x1c4   : > { %v636_v34 = vmul.f32 1.442695, %v635_v33 }
 0x1c6   : > { %1289 = vpow2.f32 %v636_v34 }
 0x1cc   : > { %v1290_v35 = vpop.eup %1289 }
 0x1cd   : > { %v638_v36 = vsel %vm631_vm3, %v1290_v35, 0.0  ;;  %v641_v38 = vpack.c.bf16 %v1290_v35, %v1290_v35 }
 0x1ce   : > { %639 = vadd.xlane.f32.xlu1 %v638_v36 }
 0x1d4   : > { %v643_v37 = vpop.permute.xlu0 %642 }
 0x1d5   : > { %655 = vmatpush.bf16.msra.mxu3 %v643_v37 }
 0x1d8   : > { %1160 = vmatmul.msk.bf16.vlgmr.msra.gmra.mxu3 %vm631_vm3, %v641_v38 }
 0x1dc   : > { %v762_v51 = vpop.permute.xlu0 %761 }
 0x1e7   : > { %669 = vrot.lane.b32.xlu1 %v1744_v22, %s1568_s22 }
 0x1ef   : > { %700 = vrot.lane.b32.xlu1 %v1744_v22, %s1572_s11 }
 0x241   : > { %v640_v39 = vpop.xlane.xlu1 %639 }
 0x242   : > { %1291 = vrcp.f32 %v640_v39 }
 0x248   : > { %v1292_v43 = vpop.eup %1291 }
 0x259   : > { %v670_v41 = vpop.permute.xlu1 %669 }
 0x25a   : > { %v675_v42 = vsel %vm611_vm1, %v670_v41, 0 }
 0x25b   : > { %v657_v45 = vpop.f32.mrf.mxu3  ;;  %684 = vmatpush.bf16.xpose.msrb.mxu3 %v675_v42 }
 0x25c   : > { %v662_v46 = vmul.f32 %v1292_v43, %v657_v45 }
 0x25e   : > { %v663_v47 = vpack.c.bf16 %v662_v46, %v662_v46 }
 0x260   : > { %1164 = vmatmul.msk.bf16.vlgmr.msrb.gmra.mxu2 %vm611_vm1, %v663_v47 }
 0x261   : > { %v701_v48 = vpop.permute.xlu1 %700 }
 0x262   : > { %1161 = vmatmul.msk.bf16.vlgmr.msrb.gmra.mxu3 %vm611_vm1, %v668_v26  ;;  %713 = vmatpush.bf16.msrb.mxu0 %v701_v48  ;;  %v820_v26 = vsel %vm725_vm2, %v603_v25, 0 }
 0x263   : > { %778 = vmatpush.bf16.xpose.msra.mxu3 %v769_v44  ;;  %v659_v49 = vpop.f32.mrf.mxu3  ;;  %829 = vmatpush.bf16.msra.mxu1 %v820_v26 }
 0x270   : > { %1168 = vmatmul.msk.bf16.vlgmr.msra.gmra.mxu2 %vm611_vm1, %v837_v50  ;;  %v1286_v50 = vld [vmem:[#allocation9] ss:$0 sm:$0xff] }
 0x272   : > { %1165 = vmatmul.msk.bf16.vlgmr.msra.gmra.mxu3 %vm611_vm1, %v762_v51  ;;  %v516_v51 = vunpack.c.l.bf16 %v1735_v5 }
 0x2e3   : > { %v1766_v52 = vpop.f32.mrf.mxu2 }
 0x2e5   : > { %v686_v53 = vpop.f32.mrf.mxu3 }
 0x2e6   : > { %v690_v54 = vsel %vm631_vm3, %v686_v53, -inf }
 0x2e7   : > { %691 = vmax.xlane.f32.xlu2 %v690_v54 }
 0x2eb   : > { %v759_v55 = vpop.f32.mrf.mxu2 }
 0x2ed   : > { %v688_v56 = vpop.f32.mrf.mxu3 }
 0x2f3   : > { %v855_v57 = vpop.f32.mrf.mxu2 }
 0x2f4   : > { %v859_v58 = vsel %vm631_vm3, %v855_v57, -inf }
 0x2f5   : > { %v780_v59 = vpop.f32.mrf.mxu3  ;;  %860 = vmax.xlane.f32.xlu0 %v859_v58 }
 0x2f6   : > { %v784_v60 = vsel %vm631_vm3, %v780_v59, -inf }
 0x2f7   : > { %785 = vmax.xlane.f32.xlu1 %v784_v60 }
 0x2fb   : > { %v857_v61 = vpop.f32.mrf.mxu2 }
 0x2fd   : > { %v782_v62 = vpop.f32.mrf.mxu3 }
 0x2ff   : > { %869 = vrot.lane.b32.xlu2 %v1744_v22, %s1573_s24 }
 0x309   : > { %794 = vrot.lane.b32.xlu0 %v1744_v22, %s1574_s16  ;;  %v604_v22 = vld [vmem:[#allocation7 + $0xc] sm:$0xf] }
 0x30a   : > { %v895_v23 = vsel %vm725_vm2, %v604_v22, 0 }
 0x35a   : > { %v692_v63 = vpop.xlane.xlu2 %691 }
 0x35b   : > { %v693_v0 = vsub.f32 %v686_v53, %v692_v63 }
 0x35d   : > { %v694_v1 = vmul.f32 1.442695, %v693_v0 }
 0x35f   : > { %1293 = vpow2.f32 %v694_v1 }
 0x362   : > { %v870_v2 = vpop.permute.xlu2 %869 }
 0x363   : > { %882 = vmatpush.bf16.msrb.mxu3 %v870_v2 }
 0x365   : > { %v1294_v3 = vpop.eup %1293 }
 0x366   : > { %v696_v4 = vsel %vm631_vm3, %v1294_v3, 0.0  ;;  %v699_v6 = vpack.c.bf16 %v1294_v3, %v1294_v3 }
 0x367   : > { %697 = vadd.xlane.f32.xlu1 %v696_v4 }
 0x368   : > { %1162 = vmatmul.msk.bf16.vlgmr.msrb.gmra.mxu0 %vm631_vm3, %v699_v6  ;;  %v861_v7 = vpop.xlane.xlu0 %860 }
 0x369   : > { %v862_v8 = vsub.f32 %v855_v57, %v861_v7 }
 0x36a   : > { %v786_v9 = vpop.xlane.xlu1 %785 }
 0x36b   : > { %v863_v10 = vmul.f32 1.442695, %v862_v8  ;;  %v787_v11 = vsub.f32 %v780_v59, %v786_v9  ;;  %v1575_v59 = vmov 32.0  }
 0x36d   : > { %1295 = vpow2.f32 %v863_v10  ;;  %v788_v12 = vmul.f32 1.442695, %v787_v11 }
 0x36f   : > { %1297 = vpow2.f32 %v788_v12 }
 0x373   : > { %v1296_v13 = vpop.eup %1295 }
 0x374   : > { %v868_v14 = vpack.c.bf16 %v1296_v13, %v1296_v13  ;;  %v865_v15 = vsel %vm631_vm3, %v1296_v13, 0.0 }
 0x375   : > { %v1298_v16 = vpop.eup %1297  ;;  %866 = vadd.xlane.f32.xlu2 %v865_v15  ;;  %v1287_v15 = vld [vmem:[#allocation10] ss:$0 sm:$0xff] }
 0x376   : > { %1169 = vmatmul.msk.bf16.vlgmr.msrb.gmra.mxu3 %vm631_vm3, %v868_v14  ;;  %v790_v17 = vsel %vm631_vm3, %v1298_v16, 0.0  ;;  %v793_v19 = vpack.c.bf16 %v1298_v16, %v1298_v16 }
 0x377   : > { %791 = vadd.xlane.f32.xlu1 %v790_v17  ;;  %v1288_v17 = vld [vmem:[#allocation12] ss:$0 sm:$0xff] }
 0x37b   : > { %v795_v18 = vpop.permute.xlu0 %794 }
 0x37c   : > { %807 = vmatpush.bf16.msra.mxu0 %v795_v18 }
 0x37f   : > { %1166 = vmatmul.msk.bf16.vlgmr.msra.gmra.mxu0 %vm631_vm3, %v793_v19 }
 0x380   : > { %904 = vmatpush.bf16.msrb.mxu0 %v895_v23 }
 0x3da   : > { %v698_v24 = vpop.xlane.xlu1 %697 }
 0x3db   : > { %1299 = vrcp.f32 %v698_v24 }
 0x3e1   : > { %v1300_v27 = vpop.eup %1299 }
 0x3e5   : > { %v715_v28 = vpop.f32.mrf.mxu0 }
 0x3e6   : > { %v720_v29 = vmul.f32 %v1300_v27, %v715_v28 }
 0x3e8   : > { %v721_v30 = vpack.c.bf16 %v720_v29, %v720_v29  ;;  %v867_v32 = vpop.xlane.xlu2 %866 }
 0x3e9   : > { %1301 = vrcp.f32 %v867_v32 }
 0x3ea   : > { %1163 = vmatmul.msk.bf16.vlgmr.msrb.gmra.mxu1 %vm611_vm1, %v721_v30  ;;  %v792_v33 = vpop.xlane.xlu1 %791 }
 0x3eb   : > { %1303 = vrcp.f32 %v792_v33 }
 0x3ec   : > { %1305 = vrcp.f32 %v1575_v59 }
 0x3ed   : > { %v717_v31 = vpop.f32.mrf.mxu0 }
 0x3ef   : > { %v1302_v34 = vpop.eup %1301 }
 0x3f1   : > { %v1304_v37 = vpop.eup %1303 }
 0x3f2   : > { %v1306_v60 = vpop.eup %1305 }
 0x3f3   : > { %v922_v61 = vmul.f32 32.0, %v1306_v60  ;;  %vm926_vm4 = vweird.f32 %v1306_v60 }
 0x3f5   : > { %v923_v62 = vsub.f32 1.0, %v922_v61 }
 0x3f7   : > { %v924_v63 = vmul.f32 %v1306_v60, %v923_v62 }
 0x3f9   : > { %v884_v35 = vpop.f32.mrf.mxu3 }
 0x3fa   : > { %v889_v36 = vmul.f32 %v1302_v34, %v884_v35 }
 0x3fc   : > { %v890_v38 = vpack.c.bf16 %v889_v36, %v889_v36  ;;  %v809_v39 = vpop.f32.mrf.mxu0 }
 0x3fd   : > { %v814_v40 = vmul.f32 %v1304_v37, %v809_v39 }
 0x3fe   : > { %1170 = vmatmul.msk.bf16.vlgmr.msrb.gmra.mxu0 %vm611_vm1, %v890_v38 }
 0x3ff   : > { %v815_v41 = vpack.c.bf16 %v814_v40, %v814_v40 }
 0x401   : > { %1167 = vmatmul.msk.bf16.vlgmr.msra.gmra.mxu1 %vm611_vm1, %v815_v41  ;;  %v886_v42 = vpop.f32.mrf.mxu3 }
 0x404   : > { %v811_v43 = vpop.f32.mrf.mxu0 }
 0x467   : > { %v738_v44 = vpop.f32.mrf.mxu1 }
 0x468   : > { %v758_v47 = vadd.f32 %v1766_v52, %v738_v44  ;;  %v925_v52 = vadd.f32 %v1306_v60, %v924_v63 }
 0x46a   : > { %v927_v0 = vsel %vm926_vm4, %v1306_v60, %v925_v52 }
 0x46f   : > { %v740_v45 = vpop.f32.mrf.mxu1 }
 0x47b   : > { %v906_v46 = vpop.f32.mrf.mxu0 }
 0x47e   : > { %v831_v48 = vpop.f32.mrf.mxu1 }
 0x47f   : > { %v835_v49 = vadd.f32 %v831_v48, %v758_v47 }
 0x481   : > { %v910_v53 = vadd.f32 %v906_v46, %v835_v49 }
 0x483   : > { %v908_v54 = vpop.f32.mrf.mxu0  ;;  %v914_v55 = vadd.f32 %v1286_v50, %v910_v53 }
 0x485   : > { %v915_v56 = vadd.f32 %v914_v55, %v516_v51 }
 0x486   : > { %v833_v57 = vpop.f32.mrf.mxu1 }
 0x487   : > { %v918_v58 = vsel %vm537_vm0, %v915_v56, 0.0 }
 0x488   : > { %919 = vadd.xlane.f32.xlu0 %v918_v58 }
 0x4fb   : > { %v920_v1 = vpop.xlane.xlu0 %919 }
 0x4fc   : > { %v928_v2 = vmul.f32 %v927_v0, %v920_v1 }
 0x4fe   : > { %v929_v5 = vsub.f32 %v915_v56, %v928_v2 }
 0x500   : > { %v930_v3 = vmul.f32 %v929_v5, %v929_v5 }
 0x502   : > { %v931_v4 = vsel %vm537_vm0, %v930_v3, 0.0 }
 0x503   : > { %932 = vadd.xlane.f32.xlu1 %v931_v4 }
 0x576   : > { %v933_v6 = vpop.xlane.xlu1 %932 }
 0x577   : > { %v934_v7 = vmul.f32 %v933_v6, %v927_v0 }
 0x579   : > { %v935_v8 = vadd.f32 1e-05, %v934_v7 }
 0x57b   : > { %1307 = vrsqrt.f32 %v935_v8  ;;  %vm942_vm6 = vweird.f32 %v935_v8 }
 0x581   : > { %v1308_v9 = vpop.eup %1307 }
 0x582   : > { %v937_v10 = vmul.f32 %v1308_v9, %v935_v8  ;;  %vm943_vm5 = vweird.f32 %v1308_v9 }
 0x583   : > { %vm944_vm7 = vmor %vm942_vm6, %vm943_vm5 }
 0x584   : > { %v938_v11 = vmul.f32 %v1308_v9, %v937_v10 }
 0x586   : > { %v939_v12 = vmul.f32 0.5, %v938_v11 }
 0x588   : > { %v940_v13 = vsub.f32 1.5, %v939_v12 }
 0x58a   : > { %v941_v14 = vmul.f32 %v1308_v9, %v940_v13 }
 0x58c   : > { %v945_v16 = vsel %vm944_vm7, %v1308_v9, %v941_v14 }
 0x58d   : > { %v946_v18 = vmul.f32 %v945_v16, %v929_v5 }
 0x58f   : > { %v950_v19 = vmul.f32 %v1287_v15, %v946_v18 }
 0x591   : > { %v954_v20 = vadd.f32 %v1288_v17, %v950_v19 }
 0x593   : > { %v955_v21 = vpack.c.bf16 %v954_v20, %v954_v20 }
 0x595   : > { %957 = vst.msk [vmem:[%s513_s27] sm:$0xf] %vm956_vm8, %v955_v21 }
 0x596 PF: > { %s24_s15 = sadd.s32 1, %s1557_s15   ;;  %s1821_s13 = smov %s1553_s14 }
 0x597   : > { %p21_p8 = scmp.ge.s32.totalorder %s24_s15, 4   ;;  %s1822_s14 = smov %s1824_s23 }
 0x599   :  { %23 = sbr.rel (!%p21_p8) target bundleno = 8 (0x8), region = 122 }
 0x59e   :  { %983 = vsyncpa [#allocation3], 1 }
 0x59f   :  { %985 = vsyncpa [#allocation3 + $0x1], 1 }
 0x5a0   :  { %986 = vsyncpa [#allocation5], 1 }
 0x5a1   :  { %987 = vsyncpa [#allocation8], 1 }
 0x5a2   :  { %988 = vsyncpa [#allocation11], 1 }

</bundles_post_ra>
